<compile_context>
chip_gen: v6e
topology: v6e:2x2x1
jax: 0.10.0
libtpu: 0.0.40
codegen_flags: <defaults>
</compile_context>

<pallas_src>
import jax
import jax.numpy as jnp
from jax.experimental import pallas as pl
from jax.experimental.pallas import tpu as pltpu

INPUT_SIZE = 4
HIDDEN = 32
NUM_LAYERS = 4
FC1_OUT = 16
OUT_SIZE = 1


def lstm_model_kernel(x_ref, wih0_ref, wih_ref, whh_ref, b_ref,
                      fc1w_ref, fc1b_ref, fc2w_ref, fc2b_ref, out_ref):
    # x_ref:    (B, T, D)      batch-first input (no wrapper transpose)
    # wih0_ref: (D, 4H)        layer-0 input weights (transposed, bf16)
    # wih_ref:  (L-1, H, 4H)   layer 1..L-1 input weights (transposed, bf16)
    # whh_ref:  (L, H, 4H)     recurrent weights (transposed, bf16)
    # b_ref:    (L, 4H)        b_ih + b_hh combined (f32)
    # fc1w_ref: (H, 16), fc1b_ref: (1, 16)
    # fc2w_ref: (1, 16) row form (applied on the VPU), fc2b_ref: (1, 1)
    # out_ref:  (B, 1)
    B, T, D = x_ref.shape
    L, H, _ = whh_ref.shape

    # ---- resident weights / biases (loaded once, off the recurrence chain) --
    wih0 = wih0_ref[...]                                    # (D, 4H)  bf16
    whh_l = [whh_ref[l] for l in range(L)]                  # (H, 4H)  bf16
    wih_l = [wih_ref[l] for l in range(L - 1)]              # (H, 4H)  bf16
    bias = b_ref[...]                                       # (L, 4H)  f32
    bias_full = [jnp.broadcast_to(bias[l:l + 1, :], (B, 4 * H))
                 for l in range(L)]                         # hoisted broadcasts

    # ---- layer-0 input projections for every timestep: independent of the
    #      recurrence, issued up-front so the MXU pipeline is already full ----
    x_bf = x_ref[...].astype(jnp.bfloat16)                  # (B, T, D)
    xz = [jnp.dot(x_bf[:, t, :], wih0, preferred_element_type=jnp.float32)
          + bias_full[0] for t in range(T)]                 # T x (B, 4H) f32

    zero = jnp.zeros((B, H), jnp.float32)
    h = [zero] * L
    c = [zero] * L
    acc = zero                                              # sum_t h_top(t)

    # ---- wavefront over (layer, time): wave s holds all cells with l+t == s.
    #      Serial dependence = L+T-1 waves instead of L*T cells. --------------
    for s in range(L + T - 1):                              # static unroll
        new_h = list(h)
        new_c = list(c)
        for l in range(max(0, s - (T - 1)), min(L - 1, s) + 1):
            t = s - l
            # Recurrent projection (on-chain); bf16 operands, f32 accumulate.
            z = jnp.dot(h[l].astype(jnp.bfloat16), whh_l[l],
                        preferred_element_type=jnp.float32)
            if l == 0:
                z = z + xz[t]
            else:
                # Input projection from the layer below (independent MXU push
                # within the same wave).
                z = z + jnp.dot(h[l - 1].astype(jnp.bfloat16), wih_l[l - 1],
                                preferred_element_type=jnp.float32)
                z = z + bias_full[l]
            # Two EUP pushes over the full 4H gate vector; 32-lane gate slices
            # become XLU lane rotates (free slot vs. the VPU/EUP chain).
            sig = jax.nn.sigmoid(z)                         # i, f, o
            th = jnp.tanh(z)                                # g
            # PyTorch gate order: i, f, g, o
            i_g = sig[:, 0 * H:1 * H]
            f_g = sig[:, 1 * H:2 * H]
            g_g = th[:, 2 * H:3 * H]
            o_g = sig[:, 3 * H:4 * H]
            c_new = f_g * c[l] + i_g * g_g
            h_new = o_g * jnp.tanh(c_new)
            new_c[l] = c_new
            new_h[l] = h_new
            if l == L - 1:                                  # top-layer output
                acc = acc + h_new
        h, c = new_h, new_c

    mean_out = acc * (1.0 / T)                              # torch.mean(out, 1)

    # TODO(synk): nn.Dropout(0.3) is identity at inference; training-mode
    # stochastic dropout is not reproduced here.
    hid = jnp.maximum(
        jnp.dot(mean_out, fc1w_ref[...], preferred_element_type=jnp.float32)
        + fc1b_ref[...], 0.0)                               # relu(fc1(.))
    # fc2 (16 -> 1): VPU multiply + lane reduction (no 1-lane-wide MXU matmul).
    out_ref[...] = (jnp.sum(hid * fc2w_ref[...], axis=-1, keepdims=True)
                    + fc2b_ref[...])


def lstm_model_forward(x, params):
    """x: (B, T, D) batch_first float32. Returns (B, 1) float32."""
    B = x.shape[0]
    vmem = pl.BlockSpec(memory_space=pltpu.MemorySpace.VMEM)
    args = (
        x,
        params["wih0"], params["wih_rest"], params["whh"], params["bias"],
        params["fc1w"], params["fc1b"], params["fc2w"], params["fc2b"],
    )
    return pl.pallas_call(
        lstm_model_kernel,
        out_shape=jax.ShapeDtypeStruct((B, OUT_SIZE), jnp.float32),
        in_specs=[vmem] * len(args),
        out_specs=vmem,
    )(*args)


def make_params(key):
    """Deterministic parameter init mirroring PyTorch shapes / uniform init."""
    k = 1.0 / jnp.sqrt(jnp.float32(HIDDEN))
    keys = jax.random.split(key, 4 * NUM_LAYERS + 4)
    idx = 0

    w_ih, w_hh, b_ih, b_hh = [], [], [], []
    for l in range(NUM_LAYERS):
        in_dim = INPUT_SIZE if l == 0 else HIDDEN
        w_ih.append(jax.random.uniform(keys[idx], (4 * HIDDEN, in_dim),
                                       minval=-k, maxval=k)); idx += 1
        w_hh.append(jax.random.uniform(keys[idx], (4 * HIDDEN, HIDDEN),
                                       minval=-k, maxval=k)); idx += 1
        b_ih.append(jax.random.uniform(keys[idx], (4 * HIDDEN,),
                                       minval=-k, maxval=k)); idx += 1
        b_hh.append(jax.random.uniform(keys[idx], (4 * HIDDEN,),
                                       minval=-k, maxval=k)); idx += 1

    fc1w = jax.random.uniform(keys[idx], (FC1_OUT, HIDDEN), minval=-k, maxval=k); idx += 1
    fc1b = jax.random.uniform(keys[idx], (FC1_OUT,), minval=-k, maxval=k); idx += 1
    fc2w = jax.random.uniform(keys[idx], (OUT_SIZE, FC1_OUT), minval=-k, maxval=k); idx += 1
    fc2b = jax.random.uniform(keys[idx], (OUT_SIZE,), minval=-k, maxval=k); idx += 1

    # PyTorch-layout params (for the pure-JAX f32 reference).
    torch_layout = dict(w_ih=w_ih, w_hh=w_hh, b_ih=b_ih, b_hh=b_hh,
                        fc1w=fc1w, fc1b=fc1b, fc2w=fc2w, fc2b=fc2b)

    # Kernel-layout params: weights transposed for act @ W; LSTM matmul
    # operands stored in bf16 (cast once here, f32 accumulation in-kernel).
    bf16 = jnp.bfloat16
    kernel_layout = dict(
        wih0=w_ih[0].T.astype(bf16),                                           # (D, 4H)
        wih_rest=jnp.stack([w_ih[l].T for l in range(1, NUM_LAYERS)]).astype(bf16),  # (L-1,H,4H)
        whh=jnp.stack([w.T for w in w_hh]).astype(bf16),                       # (L, H, 4H)
        bias=jnp.stack([b_ih[l] + b_hh[l] for l in range(NUM_LAYERS)]),        # (L, 4H) f32
        fc1w=fc1w.T, fc1b=fc1b.reshape(1, FC1_OUT),
        fc2w=fc2w.reshape(1, FC1_OUT), fc2b=fc2b.reshape(1, OUT_SIZE),
    )
    return torch_layout, kernel_layout


def reference_forward(x, p):
    """Pure-JAX (f32) replica of the PyTorch forward (eval mode)."""
    B, T, D = x.shape
    h = jnp.zeros((NUM_LAYERS, B, HIDDEN))
    c = jnp.zeros((NUM_LAYERS, B, HIDDEN))
    outs = []
    for t in range(T):
        inp = x[:, t, :]
        new_h, new_c = [], []
        for l in range(NUM_LAYERS):
            z = inp @ p["w_ih"][l].T + h[l] @ p["w_hh"][l].T + p["b_ih"][l] + p["b_hh"][l]
            i = jax.nn.sigmoid(z[:, :HIDDEN])
            f = jax.nn.sigmoid(z[:, HIDDEN:2 * HIDDEN])
            g = jnp.tanh(z[:, 2 * HIDDEN:3 * HIDDEN])
            o = jax.nn.sigmoid(z[:, 3 * HIDDEN:])
            cl = f * c[l] + i * g
            hl = o * jnp.tanh(cl)
            new_h.append(hl)
            new_c.append(cl)
            inp = hl
        h = jnp.stack(new_h)
        c = jnp.stack(new_c)
        outs.append(inp)
    out = jnp.mean(jnp.stack(outs, axis=1), axis=1)
    hid = jax.nn.relu(out @ p["fc1w"].T + p["fc1b"])
    return hid @ p["fc2w"].T + p["fc2b"]


if __name__ == "__main__":
    key = jax.random.PRNGKey(0)
    kx, kp = jax.random.split(key)

    B, T = 2, 8
    x = jax.random.normal(kx, (B, T, INPUT_SIZE), dtype=jnp.float32)

    torch_params, kernel_params = make_params(kp)

    out = lstm_model_forward(x, kernel_params)
    out = jax.block_until_ready(out)

    ref = reference_forward(x, torch_params)
    assert out.shape == (B, OUT_SIZE)
    # bf16 MXU operands vs. f32 reference: tolerance relaxed per review
    # (rounding compounds mildly over the T=8 recurrence, still << any bug).
    assert jnp.allclose(out, ref, atol=2e-2, rtol=2e-2), (out, ref)
    print("KERNEL_OK")
</pallas_src>

<mosaic_0001>
module attributes {stable_mosaic.version = 11 : i64} {
  func.func @lstm_model_kernel(%arg0: memref<2x8x4xf32, #tpu.memory_space<vmem>>, %arg1: memref<4x128xbf16, #tpu.memory_space<vmem>>, %arg2: memref<3x32x128xbf16, #tpu.memory_space<vmem>>, %arg3: memref<4x32x128xbf16, #tpu.memory_space<vmem>>, %arg4: memref<4x128xf32, #tpu.memory_space<vmem>>, %arg5: memref<32x16xf32, #tpu.memory_space<vmem>>, %arg6: memref<1x16xf32, #tpu.memory_space<vmem>>, %arg7: memref<1x16xf32, #tpu.memory_space<vmem>>, %arg8: memref<1x1xf32, #tpu.memory_space<vmem>>, %arg9: memref<2x1xf32, #tpu.memory_space<vmem>>) attributes {dimension_semantics = [], scalar_prefetch = 0 : i64, scratch_operands = 0 : i64, tpu.core_type = #tpu.core_type<tc>} {
    %c0 = arith.constant 0 : index
    %c0_0 = arith.constant 0 : index
    %0 = vector.load %arg1[%c0, %c0_0] : memref<4x128xbf16, #tpu.memory_space<vmem>>, vector<4x128xbf16>
    %c0_1 = arith.constant 0 : index
    %c0_2 = arith.constant 0 : index
    %c0_3 = arith.constant 0 : index
    %1 = vector.load %arg3[%c0_1, %c0_2, %c0_3] : memref<4x32x128xbf16, #tpu.memory_space<vmem>>, vector<1x32x128xbf16>
    %2 = vector.shape_cast %1 : vector<1x32x128xbf16> to vector<32x128xbf16>
    %c1 = arith.constant 1 : index
    %c0_4 = arith.constant 0 : index
    %c0_5 = arith.constant 0 : index
    %3 = vector.load %arg3[%c1, %c0_4, %c0_5] : memref<4x32x128xbf16, #tpu.memory_space<vmem>>, vector<1x32x128xbf16>
    %4 = vector.shape_cast %3 : vector<1x32x128xbf16> to vector<32x128xbf16>
    %c2 = arith.constant 2 : index
    %c0_6 = arith.constant 0 : index
    %c0_7 = arith.constant 0 : index
    %5 = vector.load %arg3[%c2, %c0_6, %c0_7] : memref<4x32x128xbf16, #tpu.memory_space<vmem>>, vector<1x32x128xbf16>
    %6 = vector.shape_cast %5 : vector<1x32x128xbf16> to vector<32x128xbf16>
    %c3 = arith.constant 3 : index
    %c0_8 = arith.constant 0 : index
    %c0_9 = arith.constant 0 : index
    %7 = vector.load %arg3[%c3, %c0_8, %c0_9] : memref<4x32x128xbf16, #tpu.memory_space<vmem>>, vector<1x32x128xbf16>
    %8 = vector.shape_cast %7 : vector<1x32x128xbf16> to vector<32x128xbf16>
    %c0_10 = arith.constant 0 : index
    %c0_11 = arith.constant 0 : index
    %c0_12 = arith.constant 0 : index
    %9 = vector.load %arg2[%c0_10, %c0_11, %c0_12] : memref<3x32x128xbf16, #tpu.memory_space<vmem>>, vector<1x32x128xbf16>
    %10 = vector.shape_cast %9 : vector<1x32x128xbf16> to vector<32x128xbf16>
    %c1_13 = arith.constant 1 : index
    %c0_14 = arith.constant 0 : index
    %c0_15 = arith.constant 0 : index
    %11 = vector.load %arg2[%c1_13, %c0_14, %c0_15] : memref<3x32x128xbf16, #tpu.memory_space<vmem>>, vector<1x32x128xbf16>
    %12 = vector.shape_cast %11 : vector<1x32x128xbf16> to vector<32x128xbf16>
    %c2_16 = arith.constant 2 : index
    %c0_17 = arith.constant 0 : index
    %c0_18 = arith.constant 0 : index
    %13 = vector.load %arg2[%c2_16, %c0_17, %c0_18] : memref<3x32x128xbf16, #tpu.memory_space<vmem>>, vector<1x32x128xbf16>
    %14 = vector.shape_cast %13 : vector<1x32x128xbf16> to vector<32x128xbf16>
    %c0_19 = arith.constant 0 : index
    %c0_20 = arith.constant 0 : index
    %15 = vector.load %arg4[%c0_19, %c0_20] : memref<4x128xf32, #tpu.memory_space<vmem>>, vector<4x128xf32>
    %16 = vector.extract_strided_slice %15 {offsets = [0, 0], sizes = [1, 128], strides = [1, 1]} : vector<4x128xf32> to vector<1x128xf32>
    %17 = vector.shape_cast %16 : vector<1x128xf32> to vector<1x128xf32>
    %18 = vector.broadcast %17 : vector<1x128xf32> to vector<2x128xf32>
    %19 = vector.extract_strided_slice %15 {offsets = [1, 0], sizes = [1, 128], strides = [1, 1]} : vector<4x128xf32> to vector<1x128xf32>
    %20 = vector.shape_cast %19 : vector<1x128xf32> to vector<1x128xf32>
    %21 = vector.broadcast %20 : vector<1x128xf32> to vector<2x128xf32>
    %22 = vector.extract_strided_slice %15 {offsets = [2, 0], sizes = [1, 128], strides = [1, 1]} : vector<4x128xf32> to vector<1x128xf32>
    %23 = vector.shape_cast %22 : vector<1x128xf32> to vector<1x128xf32>
    %24 = vector.broadcast %23 : vector<1x128xf32> to vector<2x128xf32>
    %25 = vector.extract_strided_slice %15 {offsets = [3, 0], sizes = [1, 128], strides = [1, 1]} : vector<4x128xf32> to vector<1x128xf32>
    %26 = vector.shape_cast %25 : vector<1x128xf32> to vector<1x128xf32>
    %27 = vector.broadcast %26 : vector<1x128xf32> to vector<2x128xf32>
    %c0_21 = arith.constant 0 : index
    %c0_22 = arith.constant 0 : index
    %c0_23 = arith.constant 0 : index
    %28 = vector.load %arg0[%c0_21, %c0_22, %c0_23] : memref<2x8x4xf32, #tpu.memory_space<vmem>>, vector<2x8x4xf32>
    %29 = arith.truncf %28 : vector<2x8x4xf32> to vector<2x8x4xbf16>
    %30 = vector.extract_strided_slice %29 {offsets = [0, 0, 0], sizes = [2, 1, 4], strides = [1, 1, 1]} : vector<2x8x4xbf16> to vector<2x1x4xbf16>
    %31 = vector.shape_cast %30 : vector<2x1x4xbf16> to vector<2x4xbf16>
    %cst = arith.constant dense<0.000000e+00> : vector<2x128xf32>
    %32 = tpu.matmul %31, %0, %cst {dimension_numbers = #tpu.dot_dimension_numbers<[1], [0], [0], [1], [0, 0, 1, 1], [], []>} : vector<2x4xbf16>, vector<4x128xbf16>, vector<2x128xf32> -> vector<2x128xf32>
    %33 = arith.addf %32, %18 : vector<2x128xf32>
    %34 = vector.extract_strided_slice %29 {offsets = [0, 1, 0], sizes = [2, 1, 4], strides = [1, 1, 1]} : vector<2x8x4xbf16> to vector<2x1x4xbf16>
    %35 = vector.shape_cast %34 : vector<2x1x4xbf16> to vector<2x4xbf16>
    %cst_24 = arith.constant dense<0.000000e+00> : vector<2x128xf32>
    %36 = tpu.matmul %35, %0, %cst_24 {dimension_numbers = #tpu.dot_dimension_numbers<[1], [0], [0], [1], [0, 0, 1, 1], [], []>} : vector<2x4xbf16>, vector<4x128xbf16>, vector<2x128xf32> -> vector<2x128xf32>
    %37 = arith.addf %36, %18 : vector<2x128xf32>
    %38 = vector.extract_strided_slice %29 {offsets = [0, 2, 0], sizes = [2, 1, 4], strides = [1, 1, 1]} : vector<2x8x4xbf16> to vector<2x1x4xbf16>
    %39 = vector.shape_cast %38 : vector<2x1x4xbf16> to vector<2x4xbf16>
    %cst_25 = arith.constant dense<0.000000e+00> : vector<2x128xf32>
    %40 = tpu.matmul %39, %0, %cst_25 {dimension_numbers = #tpu.dot_dimension_numbers<[1], [0], [0], [1], [0, 0, 1, 1], [], []>} : vector<2x4xbf16>, vector<4x128xbf16>, vector<2x128xf32> -> vector<2x128xf32>
    %41 = arith.addf %40, %18 : vector<2x128xf32>
    %42 = vector.extract_strided_slice %29 {offsets = [0, 3, 0], sizes = [2, 1, 4], strides = [1, 1, 1]} : vector<2x8x4xbf16> to vector<2x1x4xbf16>
    %43 = vector.shape_cast %42 : vector<2x1x4xbf16> to vector<2x4xbf16>
    %cst_26 = arith.constant dense<0.000000e+00> : vector<2x128xf32>
    %44 = tpu.matmul %43, %0, %cst_26 {dimension_numbers = #tpu.dot_dimension_numbers<[1], [0], [0], [1], [0, 0, 1, 1], [], []>} : vector<2x4xbf16>, vector<4x128xbf16>, vector<2x128xf32> -> vector<2x128xf32>
    %45 = arith.addf %44, %18 : vector<2x128xf32>
    %46 = vector.extract_strided_slice %29 {offsets = [0, 4, 0], sizes = [2, 1, 4], strides = [1, 1, 1]} : vector<2x8x4xbf16> to vector<2x1x4xbf16>
    %47 = vector.shape_cast %46 : vector<2x1x4xbf16> to vector<2x4xbf16>
    %cst_27 = arith.constant dense<0.000000e+00> : vector<2x128xf32>
    %48 = tpu.matmul %47, %0, %cst_27 {dimension_numbers = #tpu.dot_dimension_numbers<[1], [0], [0], [1], [0, 0, 1, 1], [], []>} : vector<2x4xbf16>, vector<4x128xbf16>, vector<2x128xf32> -> vector<2x128xf32>
    %49 = arith.addf %48, %18 : vector<2x128xf32>
    %50 = vector.extract_strided_slice %29 {offsets = [0, 5, 0], sizes = [2, 1, 4], strides = [1, 1, 1]} : vector<2x8x4xbf16> to vector<2x1x4xbf16>
    %51 = vector.shape_cast %50 : vector<2x1x4xbf16> to vector<2x4xbf16>
    %cst_28 = arith.constant dense<0.000000e+00> : vector<2x128xf32>
    %52 = tpu.matmul %51, %0, %cst_28 {dimension_numbers = #tpu.dot_dimension_numbers<[1], [0], [0], [1], [0, 0, 1, 1], [], []>} : vector<2x4xbf16>, vector<4x128xbf16>, vector<2x128xf32> -> vector<2x128xf32>
    %53 = arith.addf %52, %18 : vector<2x128xf32>
    %54 = vector.extract_strided_slice %29 {offsets = [0, 6, 0], sizes = [2, 1, 4], strides = [1, 1, 1]} : vector<2x8x4xbf16> to vector<2x1x4xbf16>
    %55 = vector.shape_cast %54 : vector<2x1x4xbf16> to vector<2x4xbf16>
    %cst_29 = arith.constant dense<0.000000e+00> : vector<2x128xf32>
    %56 = tpu.matmul %55, %0, %cst_29 {dimension_numbers = #tpu.dot_dimension_numbers<[1], [0], [0], [1], [0, 0, 1, 1], [], []>} : vector<2x4xbf16>, vector<4x128xbf16>, vector<2x128xf32> -> vector<2x128xf32>
    %57 = arith.addf %56, %18 : vector<2x128xf32>
    %58 = vector.extract_strided_slice %29 {offsets = [0, 7, 0], sizes = [2, 1, 4], strides = [1, 1, 1]} : vector<2x8x4xbf16> to vector<2x1x4xbf16>
    %59 = vector.shape_cast %58 : vector<2x1x4xbf16> to vector<2x4xbf16>
    %cst_30 = arith.constant dense<0.000000e+00> : vector<2x128xf32>
    %60 = tpu.matmul %59, %0, %cst_30 {dimension_numbers = #tpu.dot_dimension_numbers<[1], [0], [0], [1], [0, 0, 1, 1], [], []>} : vector<2x4xbf16>, vector<4x128xbf16>, vector<2x128xf32> -> vector<2x128xf32>
    %61 = arith.addf %60, %18 : vector<2x128xf32>
    %cst_31 = arith.constant 0.000000e+00 : f32
    %62 = vector.broadcast %cst_31 : f32 to vector<2x32xf32>
    %63 = arith.truncf %62 : vector<2x32xf32> to vector<2x32xbf16>
    %cst_32 = arith.constant dense<0.000000e+00> : vector<2x128xf32>
    %64 = tpu.matmul %63, %2, %cst_32 {dimension_numbers = #tpu.dot_dimension_numbers<[1], [0], [0], [1], [0, 0, 1, 1], [], []>} : vector<2x32xbf16>, vector<32x128xbf16>, vector<2x128xf32> -> vector<2x128xf32>
    %65 = arith.addf %64, %33 : vector<2x128xf32>
    %66 = arith.negf %65 : vector<2x128xf32>
    %67 = math.exp %66 : vector<2x128xf32>
    %cst_33 = arith.constant 1.000000e+00 : f32
    %68 = vector.broadcast %cst_33 : f32 to vector<2x128xf32>
    %69 = arith.addf %68, %67 : vector<2x128xf32>
    %70 = arith.divf %68, %69 : vector<2x128xf32>
    %71 = math.tanh %65 : vector<2x128xf32>
    %72 = vector.extract_strided_slice %70 {offsets = [0, 0], sizes = [2, 32], strides = [1, 1]} : vector<2x128xf32> to vector<2x32xf32>
    %73 = vector.extract_strided_slice %70 {offsets = [0, 32], sizes = [2, 32], strides = [1, 1]} : vector<2x128xf32> to vector<2x32xf32>
    %74 = vector.extract_strided_slice %71 {offsets = [0, 64], sizes = [2, 32], strides = [1, 1]} : vector<2x128xf32> to vector<2x32xf32>
    %75 = vector.extract_strided_slice %70 {offsets = [0, 96], sizes = [2, 32], strides = [1, 1]} : vector<2x128xf32> to vector<2x32xf32>
    %76 = arith.mulf %73, %62 : vector<2x32xf32>
    %77 = arith.mulf %72, %74 : vector<2x32xf32>
    %78 = arith.addf %76, %77 : vector<2x32xf32>
    %79 = math.tanh %78 : vector<2x32xf32>
    %80 = arith.mulf %75, %79 : vector<2x32xf32>
    %81 = arith.truncf %80 : vector<2x32xf32> to vector<2x32xbf16>
    %cst_34 = arith.constant dense<0.000000e+00> : vector<2x128xf32>
    %82 = tpu.matmul %81, %2, %cst_34 {dimension_numbers = #tpu.dot_dimension_numbers<[1], [0], [0], [1], [0, 0, 1, 1], [], []>} : vector<2x32xbf16>, vector<32x128xbf16>, vector<2x128xf32> -> vector<2x128xf32>
    %83 = arith.addf %82, %37 : vector<2x128xf32>
    %84 = arith.negf %83 : vector<2x128xf32>
    %85 = math.exp %84 : vector<2x128xf32>
    %cst_35 = arith.constant 1.000000e+00 : f32
    %86 = vector.broadcast %cst_35 : f32 to vector<2x128xf32>
    %87 = arith.addf %86, %85 : vector<2x128xf32>
    %88 = arith.divf %86, %87 : vector<2x128xf32>
    %89 = math.tanh %83 : vector<2x128xf32>
    %90 = vector.extract_strided_slice %88 {offsets = [0, 0], sizes = [2, 32], strides = [1, 1]} : vector<2x128xf32> to vector<2x32xf32>
    %91 = vector.extract_strided_slice %88 {offsets = [0, 32], sizes = [2, 32], strides = [1, 1]} : vector<2x128xf32> to vector<2x32xf32>
    %92 = vector.extract_strided_slice %89 {offsets = [0, 64], sizes = [2, 32], strides = [1, 1]} : vector<2x128xf32> to vector<2x32xf32>
    %93 = vector.extract_strided_slice %88 {offsets = [0, 96], sizes = [2, 32], strides = [1, 1]} : vector<2x128xf32> to vector<2x32xf32>
    %94 = arith.mulf %91, %78 : vector<2x32xf32>
    %95 = arith.mulf %90, %92 : vector<2x32xf32>
    %96 = arith.addf %94, %95 : vector<2x32xf32>
    %97 = math.tanh %96 : vector<2x32xf32>
    %98 = arith.mulf %93, %97 : vector<2x32xf32>
    %99 = arith.truncf %62 : vector<2x32xf32> to vector<2x32xbf16>
    %cst_36 = arith.constant dense<0.000000e+00> : vector<2x128xf32>
    %100 = tpu.matmul %99, %4, %cst_36 {dimension_numbers = #tpu.dot_dimension_numbers<[1], [0], [0], [1], [0, 0, 1, 1], [], []>} : vector<2x32xbf16>, vector<32x128xbf16>, vector<2x128xf32> -> vector<2x128xf32>
    %101 = arith.truncf %80 : vector<2x32xf32> to vector<2x32xbf16>
    %cst_37 = arith.constant dense<0.000000e+00> : vector<2x128xf32>
    %102 = tpu.matmul %101, %10, %cst_37 {dimension_numbers = #tpu.dot_dimension_numbers<[1], [0], [0], [1], [0, 0, 1, 1], [], []>} : vector<2x32xbf16>, vector<32x128xbf16>, vector<2x128xf32> -> vector<2x128xf32>
    %103 = arith.addf %100, %102 : vector<2x128xf32>
    %104 = arith.addf %103, %21 : vector<2x128xf32>
    %105 = arith.negf %104 : vector<2x128xf32>
    %106 = math.exp %105 : vector<2x128xf32>
    %cst_38 = arith.constant 1.000000e+00 : f32
    %107 = vector.broadcast %cst_38 : f32 to vector<2x128xf32>
    %108 = arith.addf %107, %106 : vector<2x128xf32>
    %109 = arith.divf %107, %108 : vector<2x128xf32>
    %110 = math.tanh %104 : vector<2x128xf32>
    %111 = vector.extract_strided_slice %109 {offsets = [0, 0], sizes = [2, 32], strides = [1, 1]} : vector<2x128xf32> to vector<2x32xf32>
    %112 = vector.extract_strided_slice %109 {offsets = [0, 32], sizes = [2, 32], strides = [1, 1]} : vector<2x128xf32> to vector<2x32xf32>
    %113 = vector.extract_strided_slice %110 {offsets = [0, 64], sizes = [2, 32], strides = [1, 1]} : vector<2x128xf32> to vector<2x32xf32>
    %114 = vector.extract_strided_slice %109 {offsets = [0, 96], sizes = [2, 32], strides = [1, 1]} : vector<2x128xf32> to vector<2x32xf32>
    %115 = arith.mulf %112, %62 : vector<2x32xf32>
    %116 = arith.mulf %111, %113 : vector<2x32xf32>
    %117 = arith.addf %115, %116 : vector<2x32xf32>
    %118 = math.tanh %117 : vector<2x32xf32>
    %119 = arith.mulf %114, %118 : vector<2x32xf32>
    %120 = arith.truncf %98 : vector<2x32xf32> to vector<2x32xbf16>
    %cst_39 = arith.constant dense<0.000000e+00> : vector<2x128xf32>
    %121 = tpu.matmul %120, %2, %cst_39 {dimension_numbers = #tpu.dot_dimension_numbers<[1], [0], [0], [1], [0, 0, 1, 1], [], []>} : vector<2x32xbf16>, vector<32x128xbf16>, vector<2x128xf32> -> vector<2x128xf32>
    %122 = arith.addf %121, %41 : vector<2x128xf32>
    %123 = arith.negf %122 : vector<2x128xf32>
    %124 = math.exp %123 : vector<2x128xf32>
    %cst_40 = arith.constant 1.000000e+00 : f32
    %125 = vector.broadcast %cst_40 : f32 to vector<2x128xf32>
    %126 = arith.addf %125, %124 : vector<2x128xf32>
    %127 = arith.divf %125, %126 : vector<2x128xf32>
    %128 = math.tanh %122 : vector<2x128xf32>
    %129 = vector.extract_strided_slice %127 {offsets = [0, 0], sizes = [2, 32], strides = [1, 1]} : vector<2x128xf32> to vector<2x32xf32>
    %130 = vector.extract_strided_slice %127 {offsets = [0, 32], sizes = [2, 32], strides = [1, 1]} : vector<2x128xf32> to vector<2x32xf32>
    %131 = vector.extract_strided_slice %128 {offsets = [0, 64], sizes = [2, 32], strides = [1, 1]} : vector<2x128xf32> to vector<2x32xf32>
    %132 = vector.extract_strided_slice %127 {offsets = [0, 96], sizes = [2, 32], strides = [1, 1]} : vector<2x128xf32> to vector<2x32xf32>
    %133 = arith.mulf %130, %96 : vector<2x32xf32>
    %134 = arith.mulf %129, %131 : vector<2x32xf32>
    %135 = arith.addf %133, %134 : vector<2x32xf32>
    %136 = math.tanh %135 : vector<2x32xf32>
    %137 = arith.mulf %132, %136 : vector<2x32xf32>
    %138 = arith.truncf %119 : vector<2x32xf32> to vector<2x32xbf16>
    %cst_41 = arith.constant dense<0.000000e+00> : vector<2x128xf32>
    %139 = tpu.matmul %138, %4, %cst_41 {dimension_numbers = #tpu.dot_dimension_numbers<[1], [0], [0], [1], [0, 0, 1, 1], [], []>} : vector<2x32xbf16>, vector<32x128xbf16>, vector<2x128xf32> -> vector<2x128xf32>
    %140 = arith.truncf %98 : vector<2x32xf32> to vector<2x32xbf16>
    %cst_42 = arith.constant dense<0.000000e+00> : vector<2x128xf32>
    %141 = tpu.matmul %140, %10, %cst_42 {dimension_numbers = #tpu.dot_dimension_numbers<[1], [0], [0], [1], [0, 0, 1, 1], [], []>} : vector<2x32xbf16>, vector<32x128xbf16>, vector<2x128xf32> -> vector<2x128xf32>
    %142 = arith.addf %139, %141 : vector<2x128xf32>
    %143 = arith.addf %142, %21 : vector<2x128xf32>
    %144 = arith.negf %143 : vector<2x128xf32>
    %145 = math.exp %144 : vector<2x128xf32>
    %cst_43 = arith.constant 1.000000e+00 : f32
    %146 = vector.broadcast %cst_43 : f32 to vector<2x128xf32>
    %147 = arith.addf %146, %145 : vector<2x128xf32>
    %148 = arith.divf %146, %147 : vector<2x128xf32>
    %149 = math.tanh %143 : vector<2x128xf32>
    %150 = vector.extract_strided_slice %148 {offsets = [0, 0], sizes = [2, 32], strides = [1, 1]} : vector<2x128xf32> to vector<2x32xf32>
    %151 = vector.extract_strided_slice %148 {offsets = [0, 32], sizes = [2, 32], strides = [1, 1]} : vector<2x128xf32> to vector<2x32xf32>
    %152 = vector.extract_strided_slice %149 {offsets = [0, 64], sizes = [2, 32], strides = [1, 1]} : vector<2x128xf32> to vector<2x32xf32>
    %153 = vector.extract_strided_slice %148 {offsets = [0, 96], sizes = [2, 32], strides = [1, 1]} : vector<2x128xf32> to vector<2x32xf32>
    %154 = arith.mulf %151, %117 : vector<2x32xf32>
    %155 = arith.mulf %150, %152 : vector<2x32xf32>
    %156 = arith.addf %154, %155 : vector<2x32xf32>
    %157 = math.tanh %156 : vector<2x32xf32>
    %158 = arith.mulf %153, %157 : vector<2x32xf32>
    %159 = arith.truncf %62 : vector<2x32xf32> to vector<2x32xbf16>
    %cst_44 = arith.constant dense<0.000000e+00> : vector<2x128xf32>
    %160 = tpu.matmul %159, %6, %cst_44 {dimension_numbers = #tpu.dot_dimension_numbers<[1], [0], [0], [1], [0, 0, 1, 1], [], []>} : vector<2x32xbf16>, vector<32x128xbf16>, vector<2x128xf32> -> vector<2x128xf32>
    %161 = arith.truncf %119 : vector<2x32xf32> to vector<2x32xbf16>
    %cst_45 = arith.constant dense<0.000000e+00> : vector<2x128xf32>
    %162 = tpu.matmul %161, %12, %cst_45 {dimension_numbers = #tpu.dot_dimension_numbers<[1], [0], [0], [1], [0, 0, 1, 1], [], []>} : vector<2x32xbf16>, vector<32x128xbf16>, vector<2x128xf32> -> vector<2x128xf32>
    %163 = arith.addf %160, %162 : vector<2x128xf32>
    %164 = arith.addf %163, %24 : vector<2x128xf32>
    %165 = arith.negf %164 : vector<2x128xf32>
    %166 = math.exp %165 : vector<2x128xf32>
    %cst_46 = arith.constant 1.000000e+00 : f32
    %167 = vector.broadcast %cst_46 : f32 to vector<2x128xf32>
    %168 = arith.addf %167, %166 : vector<2x128xf32>
    %169 = arith.divf %167, %168 : vector<2x128xf32>
    %170 = math.tanh %164 : vector<2x128xf32>
    %171 = vector.extract_strided_slice %169 {offsets = [0, 0], sizes = [2, 32], strides = [1, 1]} : vector<2x128xf32> to vector<2x32xf32>
    %172 = vector.extract_strided_slice %169 {offsets = [0, 32], sizes = [2, 32], strides = [1, 1]} : vector<2x128xf32> to vector<2x32xf32>
    %173 = vector.extract_strided_slice %170 {offsets = [0, 64], sizes = [2, 32], strides = [1, 1]} : vector<2x128xf32> to vector<2x32xf32>
    %174 = vector.extract_strided_slice %169 {offsets = [0, 96], sizes = [2, 32], strides = [1, 1]} : vector<2x128xf32> to vector<2x32xf32>
    %175 = arith.mulf %172, %62 : vector<2x32xf32>
    %176 = arith.mulf %171, %173 : vector<2x32xf32>
    %177 = arith.addf %175, %176 : vector<2x32xf32>
    %178 = math.tanh %177 : vector<2x32xf32>
    %179 = arith.mulf %174, %178 : vector<2x32xf32>
    %180 = arith.truncf %137 : vector<2x32xf32> to vector<2x32xbf16>
    %cst_47 = arith.constant dense<0.000000e+00> : vector<2x128xf32>
    %181 = tpu.matmul %180, %2, %cst_47 {dimension_numbers = #tpu.dot_dimension_numbers<[1], [0], [0], [1], [0, 0, 1, 1], [], []>} : vector<2x32xbf16>, vector<32x128xbf16>, vector<2x128xf32> -> vector<2x128xf32>
    %182 = arith.addf %181, %45 : vector<2x128xf32>
    %183 = arith.negf %182 : vector<2x128xf32>
    %184 = math.exp %183 : vector<2x128xf32>
    %cst_48 = arith.constant 1.000000e+00 : f32
    %185 = vector.broadcast %cst_48 : f32 to vector<2x128xf32>
    %186 = arith.addf %185, %184 : vector<2x128xf32>
    %187 = arith.divf %185, %186 : vector<2x128xf32>
    %188 = math.tanh %182 : vector<2x128xf32>
    %189 = vector.extract_strided_slice %187 {offsets = [0, 0], sizes = [2, 32], strides = [1, 1]} : vector<2x128xf32> to vector<2x32xf32>
    %190 = vector.extract_strided_slice %187 {offsets = [0, 32], sizes = [2, 32], strides = [1, 1]} : vector<2x128xf32> to vector<2x32xf32>
    %191 = vector.extract_strided_slice %188 {offsets = [0, 64], sizes = [2, 32], strides = [1, 1]} : vector<2x128xf32> to vector<2x32xf32>
    %192 = vector.extract_strided_slice %187 {offsets = [0, 96], sizes = [2, 32], strides = [1, 1]} : vector<2x128xf32> to vector<2x32xf32>
    %193 = arith.mulf %190, %135 : vector<2x32xf32>
    %194 = arith.mulf %189, %191 : vector<2x32xf32>
    %195 = arith.addf %193, %194 : vector<2x32xf32>
    %196 = math.tanh %195 : vector<2x32xf32>
    %197 = arith.mulf %192, %196 : vector<2x32xf32>
    %198 = arith.truncf %158 : vector<2x32xf32> to vector<2x32xbf16>
    %cst_49 = arith.constant dense<0.000000e+00> : vector<2x128xf32>
    %199 = tpu.matmul %198, %4, %cst_49 {dimension_numbers = #tpu.dot_dimension_numbers<[1], [0], [0], [1], [0, 0, 1, 1], [], []>} : vector<2x32xbf16>, vector<32x128xbf16>, vector<2x128xf32> -> vector<2x128xf32>
    %200 = arith.truncf %137 : vector<2x32xf32> to vector<2x32xbf16>
    %cst_50 = arith.constant dense<0.000000e+00> : vector<2x128xf32>
    %201 = tpu.matmul %200, %10, %cst_50 {dimension_numbers = #tpu.dot_dimension_numbers<[1], [0], [0], [1], [0, 0, 1, 1], [], []>} : vector<2x32xbf16>, vector<32x128xbf16>, vector<2x128xf32> -> vector<2x128xf32>
    %202 = arith.addf %199, %201 : vector<2x128xf32>
    %203 = arith.addf %202, %21 : vector<2x128xf32>
    %204 = arith.negf %203 : vector<2x128xf32>
    %205 = math.exp %204 : vector<2x128xf32>
    %cst_51 = arith.constant 1.000000e+00 : f32
    %206 = vector.broadcast %cst_51 : f32 to vector<2x128xf32>
    %207 = arith.addf %206, %205 : vector<2x128xf32>
    %208 = arith.divf %206, %207 : vector<2x128xf32>
    %209 = math.tanh %203 : vector<2x128xf32>
    %210 = vector.extract_strided_slice %208 {offsets = [0, 0], sizes = [2, 32], strides = [1, 1]} : vector<2x128xf32> to vector<2x32xf32>
    %211 = vector.extract_strided_slice %208 {offsets = [0, 32], sizes = [2, 32], strides = [1, 1]} : vector<2x128xf32> to vector<2x32xf32>
    %212 = vector.extract_strided_slice %209 {offsets = [0, 64], sizes = [2, 32], strides = [1, 1]} : vector<2x128xf32> to vector<2x32xf32>
    %213 = vector.extract_strided_slice %208 {offsets = [0, 96], sizes = [2, 32], strides = [1, 1]} : vector<2x128xf32> to vector<2x32xf32>
    %214 = arith.mulf %211, %156 : vector<2x32xf32>
    %215 = arith.mulf %210, %212 : vector<2x32xf32>
    %216 = arith.addf %214, %215 : vector<2x32xf32>
    %217 = math.tanh %216 : vector<2x32xf32>
    %218 = arith.mulf %213, %217 : vector<2x32xf32>
    %219 = arith.truncf %179 : vector<2x32xf32> to vector<2x32xbf16>
    %cst_52 = arith.constant dense<0.000000e+00> : vector<2x128xf32>
    %220 = tpu.matmul %219, %6, %cst_52 {dimension_numbers = #tpu.dot_dimension_numbers<[1], [0], [0], [1], [0, 0, 1, 1], [], []>} : vector<2x32xbf16>, vector<32x128xbf16>, vector<2x128xf32> -> vector<2x128xf32>
    %221 = arith.truncf %158 : vector<2x32xf32> to vector<2x32xbf16>
    %cst_53 = arith.constant dense<0.000000e+00> : vector<2x128xf32>
    %222 = tpu.matmul %221, %12, %cst_53 {dimension_numbers = #tpu.dot_dimension_numbers<[1], [0], [0], [1], [0, 0, 1, 1], [], []>} : vector<2x32xbf16>, vector<32x128xbf16>, vector<2x128xf32> -> vector<2x128xf32>
    %223 = arith.addf %220, %222 : vector<2x128xf32>
    %224 = arith.addf %223, %24 : vector<2x128xf32>
    %225 = arith.negf %224 : vector<2x128xf32>
    %226 = math.exp %225 : vector<2x128xf32>
    %cst_54 = arith.constant 1.000000e+00 : f32
    %227 = vector.broadcast %cst_54 : f32 to vector<2x128xf32>
    %228 = arith.addf %227, %226 : vector<2x128xf32>
    %229 = arith.divf %227, %228 : vector<2x128xf32>
    %230 = math.tanh %224 : vector<2x128xf32>
    %231 = vector.extract_strided_slice %229 {offsets = [0, 0], sizes = [2, 32], strides = [1, 1]} : vector<2x128xf32> to vector<2x32xf32>
    %232 = vector.extract_strided_slice %229 {offsets = [0, 32], sizes = [2, 32], strides = [1, 1]} : vector<2x128xf32> to vector<2x32xf32>
    %233 = vector.extract_strided_slice %230 {offsets = [0, 64], sizes = [2, 32], strides = [1, 1]} : vector<2x128xf32> to vector<2x32xf32>
    %234 = vector.extract_strided_slice %229 {offsets = [0, 96], sizes = [2, 32], strides = [1, 1]} : vector<2x128xf32> to vector<2x32xf32>
    %235 = arith.mulf %232, %177 : vector<2x32xf32>
    %236 = arith.mulf %231, %233 : vector<2x32xf32>
    %237 = arith.addf %235, %236 : vector<2x32xf32>
    %238 = math.tanh %237 : vector<2x32xf32>
    %239 = arith.mulf %234, %238 : vector<2x32xf32>
    %240 = arith.truncf %62 : vector<2x32xf32> to vector<2x32xbf16>
    %cst_55 = arith.constant dense<0.000000e+00> : vector<2x128xf32>
    %241 = tpu.matmul %240, %8, %cst_55 {dimension_numbers = #tpu.dot_dimension_numbers<[1], [0], [0], [1], [0, 0, 1, 1], [], []>} : vector<2x32xbf16>, vector<32x128xbf16>, vector<2x128xf32> -> vector<2x128xf32>
    %242 = arith.truncf %179 : vector<2x32xf32> to vector<2x32xbf16>
    %cst_56 = arith.constant dense<0.000000e+00> : vector<2x128xf32>
    %243 = tpu.matmul %242, %14, %cst_56 {dimension_numbers = #tpu.dot_dimension_numbers<[1], [0], [0], [1], [0, 0, 1, 1], [], []>} : vector<2x32xbf16>, vector<32x128xbf16>, vector<2x128xf32> -> vector<2x128xf32>
    %244 = arith.addf %241, %243 : vector<2x128xf32>
    %245 = arith.addf %244, %27 : vector<2x128xf32>
    %246 = arith.negf %245 : vector<2x128xf32>
    %247 = math.exp %246 : vector<2x128xf32>
    %cst_57 = arith.constant 1.000000e+00 : f32
    %248 = vector.broadcast %cst_57 : f32 to vector<2x128xf32>
    %249 = arith.addf %248, %247 : vector<2x128xf32>
    %250 = arith.divf %248, %249 : vector<2x128xf32>
    %251 = math.tanh %245 : vector<2x128xf32>
    %252 = vector.extract_strided_slice %250 {offsets = [0, 0], sizes = [2, 32], strides = [1, 1]} : vector<2x128xf32> to vector<2x32xf32>
    %253 = vector.extract_strided_slice %250 {offsets = [0, 32], sizes = [2, 32], strides = [1, 1]} : vector<2x128xf32> to vector<2x32xf32>
    %254 = vector.extract_strided_slice %251 {offsets = [0, 64], sizes = [2, 32], strides = [1, 1]} : vector<2x128xf32> to vector<2x32xf32>
    %255 = vector.extract_strided_slice %250 {offsets = [0, 96], sizes = [2, 32], strides = [1, 1]} : vector<2x128xf32> to vector<2x32xf32>
    %256 = arith.mulf %253, %62 : vector<2x32xf32>
    %257 = arith.mulf %252, %254 : vector<2x32xf32>
    %258 = arith.addf %256, %257 : vector<2x32xf32>
    %259 = math.tanh %258 : vector<2x32xf32>
    %260 = arith.mulf %255, %259 : vector<2x32xf32>
    %261 = arith.addf %62, %260 : vector<2x32xf32>
    %262 = arith.truncf %197 : vector<2x32xf32> to vector<2x32xbf16>
    %cst_58 = arith.constant dense<0.000000e+00> : vector<2x128xf32>
    %263 = tpu.matmul %262, %2, %cst_58 {dimension_numbers = #tpu.dot_dimension_numbers<[1], [0], [0], [1], [0, 0, 1, 1], [], []>} : vector<2x32xbf16>, vector<32x128xbf16>, vector<2x128xf32> -> vector<2x128xf32>
    %264 = arith.addf %263, %49 : vector<2x128xf32>
    %265 = arith.negf %264 : vector<2x128xf32>
    %266 = math.exp %265 : vector<2x128xf32>
    %cst_59 = arith.constant 1.000000e+00 : f32
    %267 = vector.broadcast %cst_59 : f32 to vector<2x128xf32>
    %268 = arith.addf %267, %266 : vector<2x128xf32>
    %269 = arith.divf %267, %268 : vector<2x128xf32>
    %270 = math.tanh %264 : vector<2x128xf32>
    %271 = vector.extract_strided_slice %269 {offsets = [0, 0], sizes = [2, 32], strides = [1, 1]} : vector<2x128xf32> to vector<2x32xf32>
    %272 = vector.extract_strided_slice %269 {offsets = [0, 32], sizes = [2, 32], strides = [1, 1]} : vector<2x128xf32> to vector<2x32xf32>
    %273 = vector.extract_strided_slice %270 {offsets = [0, 64], sizes = [2, 32], strides = [1, 1]} : vector<2x128xf32> to vector<2x32xf32>
    %274 = vector.extract_strided_slice %269 {offsets = [0, 96], sizes = [2, 32], strides = [1, 1]} : vector<2x128xf32> to vector<2x32xf32>
    %275 = arith.mulf %272, %195 : vector<2x32xf32>
    %276 = arith.mulf %271, %273 : vector<2x32xf32>
    %277 = arith.addf %275, %276 : vector<2x32xf32>
    %278 = math.tanh %277 : vector<2x32xf32>
    %279 = arith.mulf %274, %278 : vector<2x32xf32>
    %280 = arith.truncf %218 : vector<2x32xf32> to vector<2x32xbf16>
    %cst_60 = arith.constant dense<0.000000e+00> : vector<2x128xf32>
    %281 = tpu.matmul %280, %4, %cst_60 {dimension_numbers = #tpu.dot_dimension_numbers<[1], [0], [0], [1], [0, 0, 1, 1], [], []>} : vector<2x32xbf16>, vector<32x128xbf16>, vector<2x128xf32> -> vector<2x128xf32>
    %282 = arith.truncf %197 : vector<2x32xf32> to vector<2x32xbf16>
    %cst_61 = arith.constant dense<0.000000e+00> : vector<2x128xf32>
    %283 = tpu.matmul %282, %10, %cst_61 {dimension_numbers = #tpu.dot_dimension_numbers<[1], [0], [0], [1], [0, 0, 1, 1], [], []>} : vector<2x32xbf16>, vector<32x128xbf16>, vector<2x128xf32> -> vector<2x128xf32>
    %284 = arith.addf %281, %283 : vector<2x128xf32>
    %285 = arith.addf %284, %21 : vector<2x128xf32>
    %286 = arith.negf %285 : vector<2x128xf32>
    %287 = math.exp %286 : vector<2x128xf32>
    %cst_62 = arith.constant 1.000000e+00 : f32
    %288 = vector.broadcast %cst_62 : f32 to vector<2x128xf32>
    %289 = arith.addf %288, %287 : vector<2x128xf32>
    %290 = arith.divf %288, %289 : vector<2x128xf32>
    %291 = math.tanh %285 : vector<2x128xf32>
    %292 = vector.extract_strided_slice %290 {offsets = [0, 0], sizes = [2, 32], strides = [1, 1]} : vector<2x128xf32> to vector<2x32xf32>
    %293 = vector.extract_strided_slice %290 {offsets = [0, 32], sizes = [2, 32], strides = [1, 1]} : vector<2x128xf32> to vector<2x32xf32>
    %294 = vector.extract_strided_slice %291 {offsets = [0, 64], sizes = [2, 32], strides = [1, 1]} : vector<2x128xf32> to vector<2x32xf32>
    %295 = vector.extract_strided_slice %290 {offsets = [0, 96], sizes = [2, 32], strides = [1, 1]} : vector<2x128xf32> to vector<2x32xf32>
    %296 = arith.mulf %293, %216 : vector<2x32xf32>
    %297 = arith.mulf %292, %294 : vector<2x32xf32>
    %298 = arith.addf %296, %297 : vector<2x32xf32>
    %299 = math.tanh %298 : vector<2x32xf32>
    %300 = arith.mulf %295, %299 : vector<2x32xf32>
    %301 = arith.truncf %239 : vector<2x32xf32> to vector<2x32xbf16>
    %cst_63 = arith.constant dense<0.000000e+00> : vector<2x128xf32>
    %302 = tpu.matmul %301, %6, %cst_63 {dimension_numbers = #tpu.dot_dimension_numbers<[1], [0], [0], [1], [0, 0, 1, 1], [], []>} : vector<2x32xbf16>, vector<32x128xbf16>, vector<2x128xf32> -> vector<2x128xf32>
    %303 = arith.truncf %218 : vector<2x32xf32> to vector<2x32xbf16>
    %cst_64 = arith.constant dense<0.000000e+00> : vector<2x128xf32>
    %304 = tpu.matmul %303, %12, %cst_64 {dimension_numbers = #tpu.dot_dimension_numbers<[1], [0], [0], [1], [0, 0, 1, 1], [], []>} : vector<2x32xbf16>, vector<32x128xbf16>, vector<2x128xf32> -> vector<2x128xf32>
    %305 = arith.addf %302, %304 : vector<2x128xf32>
    %306 = arith.addf %305, %24 : vector<2x128xf32>
    %307 = arith.negf %306 : vector<2x128xf32>
    %308 = math.exp %307 : vector<2x128xf32>
    %cst_65 = arith.constant 1.000000e+00 : f32
    %309 = vector.broadcast %cst_65 : f32 to vector<2x128xf32>
    %310 = arith.addf %309, %308 : vector<2x128xf32>
    %311 = arith.divf %309, %310 : vector<2x128xf32>
    %312 = math.tanh %306 : vector<2x128xf32>
    %313 = vector.extract_strided_slice %311 {offsets = [0, 0], sizes = [2, 32], strides = [1, 1]} : vector<2x128xf32> to vector<2x32xf32>
    %314 = vector.extract_strided_slice %311 {offsets = [0, 32], sizes = [2, 32], strides = [1, 1]} : vector<2x128xf32> to vector<2x32xf32>
    %315 = vector.extract_strided_slice %312 {offsets = [0, 64], sizes = [2, 32], strides = [1, 1]} : vector<2x128xf32> to vector<2x32xf32>
    %316 = vector.extract_strided_slice %311 {offsets = [0, 96], sizes = [2, 32], strides = [1, 1]} : vector<2x128xf32> to vector<2x32xf32>
    %317 = arith.mulf %314, %237 : vector<2x32xf32>
    %318 = arith.mulf %313, %315 : vector<2x32xf32>
    %319 = arith.addf %317, %318 : vector<2x32xf32>
    %320 = math.tanh %319 : vector<2x32xf32>
    %321 = arith.mulf %316, %320 : vector<2x32xf32>
    %322 = arith.truncf %260 : vector<2x32xf32> to vector<2x32xbf16>
    %cst_66 = arith.constant dense<0.000000e+00> : vector<2x128xf32>
    %323 = tpu.matmul %322, %8, %cst_66 {dimension_numbers = #tpu.dot_dimension_numbers<[1], [0], [0], [1], [0, 0, 1, 1], [], []>} : vector<2x32xbf16>, vector<32x128xbf16>, vector<2x128xf32> -> vector<2x128xf32>
    %324 = arith.truncf %239 : vector<2x32xf32> to vector<2x32xbf16>
    %cst_67 = arith.constant dense<0.000000e+00> : vector<2x128xf32>
    %325 = tpu.matmul %324, %14, %cst_67 {dimension_numbers = #tpu.dot_dimension_numbers<[1], [0], [0], [1], [0, 0, 1, 1], [], []>} : vector<2x32xbf16>, vector<32x128xbf16>, vector<2x128xf32> -> vector<2x128xf32>
    %326 = arith.addf %323, %325 : vector<2x128xf32>
    %327 = arith.addf %326, %27 : vector<2x128xf32>
    %328 = arith.negf %327 : vector<2x128xf32>
    %329 = math.exp %328 : vector<2x128xf32>
    %cst_68 = arith.constant 1.000000e+00 : f32
    %330 = vector.broadcast %cst_68 : f32 to vector<2x128xf32>
    %331 = arith.addf %330, %329 : vector<2x128xf32>
    %332 = arith.divf %330, %331 : vector<2x128xf32>
    %333 = math.tanh %327 : vector<2x128xf32>
    %334 = vector.extract_strided_slice %332 {offsets = [0, 0], sizes = [2, 32], strides = [1, 1]} : vector<2x128xf32> to vector<2x32xf32>
    %335 = vector.extract_strided_slice %332 {offsets = [0, 32], sizes = [2, 32], strides = [1, 1]} : vector<2x128xf32> to vector<2x32xf32>
    %336 = vector.extract_strided_slice %333 {offsets = [0, 64], sizes = [2, 32], strides = [1, 1]} : vector<2x128xf32> to vector<2x32xf32>
    %337 = vector.extract_strided_slice %332 {offsets = [0, 96], sizes = [2, 32], strides = [1, 1]} : vector<2x128xf32> to vector<2x32xf32>
    %338 = arith.mulf %335, %258 : vector<2x32xf32>
    %339 = arith.mulf %334, %336 : vector<2x32xf32>
    %340 = arith.addf %338, %339 : vector<2x32xf32>
    %341 = math.tanh %340 : vector<2x32xf32>
    %342 = arith.mulf %337, %341 : vector<2x32xf32>
    %343 = arith.addf %261, %342 : vector<2x32xf32>
    %344 = arith.truncf %279 : vector<2x32xf32> to vector<2x32xbf16>
    %cst_69 = arith.constant dense<0.000000e+00> : vector<2x128xf32>
    %345 = tpu.matmul %344, %2, %cst_69 {dimension_numbers = #tpu.dot_dimension_numbers<[1], [0], [0], [1], [0, 0, 1, 1], [], []>} : vector<2x32xbf16>, vector<32x128xbf16>, vector<2x128xf32> -> vector<2x128xf32>
    %346 = arith.addf %345, %53 : vector<2x128xf32>
    %347 = arith.negf %346 : vector<2x128xf32>
    %348 = math.exp %347 : vector<2x128xf32>
    %cst_70 = arith.constant 1.000000e+00 : f32
    %349 = vector.broadcast %cst_70 : f32 to vector<2x128xf32>
    %350 = arith.addf %349, %348 : vector<2x128xf32>
    %351 = arith.divf %349, %350 : vector<2x128xf32>
    %352 = math.tanh %346 : vector<2x128xf32>
    %353 = vector.extract_strided_slice %351 {offsets = [0, 0], sizes = [2, 32], strides = [1, 1]} : vector<2x128xf32> to vector<2x32xf32>
    %354 = vector.extract_strided_slice %351 {offsets = [0, 32], sizes = [2, 32], strides = [1, 1]} : vector<2x128xf32> to vector<2x32xf32>
    %355 = vector.extract_strided_slice %352 {offsets = [0, 64], sizes = [2, 32], strides = [1, 1]} : vector<2x128xf32> to vector<2x32xf32>
    %356 = vector.extract_strided_slice %351 {offsets = [0, 96], sizes = [2, 32], strides = [1, 1]} : vector<2x128xf32> to vector<2x32xf32>
    %357 = arith.mulf %354, %277 : vector<2x32xf32>
    %358 = arith.mulf %353, %355 : vector<2x32xf32>
    %359 = arith.addf %357, %358 : vector<2x32xf32>
    %360 = math.tanh %359 : vector<2x32xf32>
    %361 = arith.mulf %356, %360 : vector<2x32xf32>
    %362 = arith.truncf %300 : vector<2x32xf32> to vector<2x32xbf16>
    %cst_71 = arith.constant dense<0.000000e+00> : vector<2x128xf32>
    %363 = tpu.matmul %362, %4, %cst_71 {dimension_numbers = #tpu.dot_dimension_numbers<[1], [0], [0], [1], [0, 0, 1, 1], [], []>} : vector<2x32xbf16>, vector<32x128xbf16>, vector<2x128xf32> -> vector<2x128xf32>
    %364 = arith.truncf %279 : vector<2x32xf32> to vector<2x32xbf16>
    %cst_72 = arith.constant dense<0.000000e+00> : vector<2x128xf32>
    %365 = tpu.matmul %364, %10, %cst_72 {dimension_numbers = #tpu.dot_dimension_numbers<[1], [0], [0], [1], [0, 0, 1, 1], [], []>} : vector<2x32xbf16>, vector<32x128xbf16>, vector<2x128xf32> -> vector<2x128xf32>
    %366 = arith.addf %363, %365 : vector<2x128xf32>
    %367 = arith.addf %366, %21 : vector<2x128xf32>
    %368 = arith.negf %367 : vector<2x128xf32>
    %369 = math.exp %368 : vector<2x128xf32>
    %cst_73 = arith.constant 1.000000e+00 : f32
    %370 = vector.broadcast %cst_73 : f32 to vector<2x128xf32>
    %371 = arith.addf %370, %369 : vector<2x128xf32>
    %372 = arith.divf %370, %371 : vector<2x128xf32>
    %373 = math.tanh %367 : vector<2x128xf32>
    %374 = vector.extract_strided_slice %372 {offsets = [0, 0], sizes = [2, 32], strides = [1, 1]} : vector<2x128xf32> to vector<2x32xf32>
    %375 = vector.extract_strided_slice %372 {offsets = [0, 32], sizes = [2, 32], strides = [1, 1]} : vector<2x128xf32> to vector<2x32xf32>
    %376 = vector.extract_strided_slice %373 {offsets = [0, 64], sizes = [2, 32], strides = [1, 1]} : vector<2x128xf32> to vector<2x32xf32>
    %377 = vector.extract_strided_slice %372 {offsets = [0, 96], sizes = [2, 32], strides = [1, 1]} : vector<2x128xf32> to vector<2x32xf32>
    %378 = arith.mulf %375, %298 : vector<2x32xf32>
    %379 = arith.mulf %374, %376 : vector<2x32xf32>
    %380 = arith.addf %378, %379 : vector<2x32xf32>
    %381 = math.tanh %380 : vector<2x32xf32>
    %382 = arith.mulf %377, %381 : vector<2x32xf32>
    %383 = arith.truncf %321 : vector<2x32xf32> to vector<2x32xbf16>
    %cst_74 = arith.constant dense<0.000000e+00> : vector<2x128xf32>
    %384 = tpu.matmul %383, %6, %cst_74 {dimension_numbers = #tpu.dot_dimension_numbers<[1], [0], [0], [1], [0, 0, 1, 1], [], []>} : vector<2x32xbf16>, vector<32x128xbf16>, vector<2x128xf32> -> vector<2x128xf32>
    %385 = arith.truncf %300 : vector<2x32xf32> to vector<2x32xbf16>
    %cst_75 = arith.constant dense<0.000000e+00> : vector<2x128xf32>
    %386 = tpu.matmul %385, %12, %cst_75 {dimension_numbers = #tpu.dot_dimension_numbers<[1], [0], [0], [1], [0, 0, 1, 1], [], []>} : vector<2x32xbf16>, vector<32x128xbf16>, vector<2x128xf32> -> vector<2x128xf32>
    %387 = arith.addf %384, %386 : vector<2x128xf32>
    %388 = arith.addf %387, %24 : vector<2x128xf32>
    %389 = arith.negf %388 : vector<2x128xf32>
    %390 = math.exp %389 : vector<2x128xf32>
    %cst_76 = arith.constant 1.000000e+00 : f32
    %391 = vector.broadcast %cst_76 : f32 to vector<2x128xf32>
    %392 = arith.addf %391, %390 : vector<2x128xf32>
    %393 = arith.divf %391, %392 : vector<2x128xf32>
    %394 = math.tanh %388 : vector<2x128xf32>
    %395 = vector.extract_strided_slice %393 {offsets = [0, 0], sizes = [2, 32], strides = [1, 1]} : vector<2x128xf32> to vector<2x32xf32>
    %396 = vector.extract_strided_slice %393 {offsets = [0, 32], sizes = [2, 32], strides = [1, 1]} : vector<2x128xf32> to vector<2x32xf32>
    %397 = vector.extract_strided_slice %394 {offsets = [0, 64], sizes = [2, 32], strides = [1, 1]} : vector<2x128xf32> to vector<2x32xf32>
    %398 = vector.extract_strided_slice %393 {offsets = [0, 96], sizes = [2, 32], strides = [1, 1]} : vector<2x128xf32> to vector<2x32xf32>
    %399 = arith.mulf %396, %319 : vector<2x32xf32>
    %400 = arith.mulf %395, %397 : vector<2x32xf32>
    %401 = arith.addf %399, %400 : vector<2x32xf32>
    %402 = math.tanh %401 : vector<2x32xf32>
    %403 = arith.mulf %398, %402 : vector<2x32xf32>
    %404 = arith.truncf %342 : vector<2x32xf32> to vector<2x32xbf16>
    %cst_77 = arith.constant dense<0.000000e+00> : vector<2x128xf32>
    %405 = tpu.matmul %404, %8, %cst_77 {dimension_numbers = #tpu.dot_dimension_numbers<[1], [0], [0], [1], [0, 0, 1, 1], [], []>} : vector<2x32xbf16>, vector<32x128xbf16>, vector<2x128xf32> -> vector<2x128xf32>
    %406 = arith.truncf %321 : vector<2x32xf32> to vector<2x32xbf16>
    %cst_78 = arith.constant dense<0.000000e+00> : vector<2x128xf32>
    %407 = tpu.matmul %406, %14, %cst_78 {dimension_numbers = #tpu.dot_dimension_numbers<[1], [0], [0], [1], [0, 0, 1, 1], [], []>} : vector<2x32xbf16>, vector<32x128xbf16>, vector<2x128xf32> -> vector<2x128xf32>
    %408 = arith.addf %405, %407 : vector<2x128xf32>
    %409 = arith.addf %408, %27 : vector<2x128xf32>
    %410 = arith.negf %409 : vector<2x128xf32>
    %411 = math.exp %410 : vector<2x128xf32>
    %cst_79 = arith.constant 1.000000e+00 : f32
    %412 = vector.broadcast %cst_79 : f32 to vector<2x128xf32>
    %413 = arith.addf %412, %411 : vector<2x128xf32>
    %414 = arith.divf %412, %413 : vector<2x128xf32>
    %415 = math.tanh %409 : vector<2x128xf32>
    %416 = vector.extract_strided_slice %414 {offsets = [0, 0], sizes = [2, 32], strides = [1, 1]} : vector<2x128xf32> to vector<2x32xf32>
    %417 = vector.extract_strided_slice %414 {offsets = [0, 32], sizes = [2, 32], strides = [1, 1]} : vector<2x128xf32> to vector<2x32xf32>
    %418 = vector.extract_strided_slice %415 {offsets = [0, 64], sizes = [2, 32], strides = [1, 1]} : vector<2x128xf32> to vector<2x32xf32>
    %419 = vector.extract_strided_slice %414 {offsets = [0, 96], sizes = [2, 32], strides = [1, 1]} : vector<2x128xf32> to vector<2x32xf32>
    %420 = arith.mulf %417, %340 : vector<2x32xf32>
    %421 = arith.mulf %416, %418 : vector<2x32xf32>
    %422 = arith.addf %420, %421 : vector<2x32xf32>
    %423 = math.tanh %422 : vector<2x32xf32>
    %424 = arith.mulf %419, %423 : vector<2x32xf32>
    %425 = arith.addf %343, %424 : vector<2x32xf32>
    %426 = arith.truncf %361 : vector<2x32xf32> to vector<2x32xbf16>
    %cst_80 = arith.constant dense<0.000000e+00> : vector<2x128xf32>
    %427 = tpu.matmul %426, %2, %cst_80 {dimension_numbers = #tpu.dot_dimension_numbers<[1], [0], [0], [1], [0, 0, 1, 1], [], []>} : vector<2x32xbf16>, vector<32x128xbf16>, vector<2x128xf32> -> vector<2x128xf32>
    %428 = arith.addf %427, %57 : vector<2x128xf32>
    %429 = arith.negf %428 : vector<2x128xf32>
    %430 = math.exp %429 : vector<2x128xf32>
    %cst_81 = arith.constant 1.000000e+00 : f32
    %431 = vector.broadcast %cst_81 : f32 to vector<2x128xf32>
    %432 = arith.addf %431, %430 : vector<2x128xf32>
    %433 = arith.divf %431, %432 : vector<2x128xf32>
    %434 = math.tanh %428 : vector<2x128xf32>
    %435 = vector.extract_strided_slice %433 {offsets = [0, 0], sizes = [2, 32], strides = [1, 1]} : vector<2x128xf32> to vector<2x32xf32>
    %436 = vector.extract_strided_slice %433 {offsets = [0, 32], sizes = [2, 32], strides = [1, 1]} : vector<2x128xf32> to vector<2x32xf32>
    %437 = vector.extract_strided_slice %434 {offsets = [0, 64], sizes = [2, 32], strides = [1, 1]} : vector<2x128xf32> to vector<2x32xf32>
    %438 = vector.extract_strided_slice %433 {offsets = [0, 96], sizes = [2, 32], strides = [1, 1]} : vector<2x128xf32> to vector<2x32xf32>
    %439 = arith.mulf %436, %359 : vector<2x32xf32>
    %440 = arith.mulf %435, %437 : vector<2x32xf32>
    %441 = arith.addf %439, %440 : vector<2x32xf32>
    %442 = math.tanh %441 : vector<2x32xf32>
    %443 = arith.mulf %438, %442 : vector<2x32xf32>
    %444 = arith.truncf %382 : vector<2x32xf32> to vector<2x32xbf16>
    %cst_82 = arith.constant dense<0.000000e+00> : vector<2x128xf32>
    %445 = tpu.matmul %444, %4, %cst_82 {dimension_numbers = #tpu.dot_dimension_numbers<[1], [0], [0], [1], [0, 0, 1, 1], [], []>} : vector<2x32xbf16>, vector<32x128xbf16>, vector<2x128xf32> -> vector<2x128xf32>
    %446 = arith.truncf %361 : vector<2x32xf32> to vector<2x32xbf16>
    %cst_83 = arith.constant dense<0.000000e+00> : vector<2x128xf32>
    %447 = tpu.matmul %446, %10, %cst_83 {dimension_numbers = #tpu.dot_dimension_numbers<[1], [0], [0], [1], [0, 0, 1, 1], [], []>} : vector<2x32xbf16>, vector<32x128xbf16>, vector<2x128xf32> -> vector<2x128xf32>
    %448 = arith.addf %445, %447 : vector<2x128xf32>
    %449 = arith.addf %448, %21 : vector<2x128xf32>
    %450 = arith.negf %449 : vector<2x128xf32>
    %451 = math.exp %450 : vector<2x128xf32>
    %cst_84 = arith.constant 1.000000e+00 : f32
    %452 = vector.broadcast %cst_84 : f32 to vector<2x128xf32>
    %453 = arith.addf %452, %451 : vector<2x128xf32>
    %454 = arith.divf %452, %453 : vector<2x128xf32>
    %455 = math.tanh %449 : vector<2x128xf32>
    %456 = vector.extract_strided_slice %454 {offsets = [0, 0], sizes = [2, 32], strides = [1, 1]} : vector<2x128xf32> to vector<2x32xf32>
    %457 = vector.extract_strided_slice %454 {offsets = [0, 32], sizes = [2, 32], strides = [1, 1]} : vector<2x128xf32> to vector<2x32xf32>
    %458 = vector.extract_strided_slice %455 {offsets = [0, 64], sizes = [2, 32], strides = [1, 1]} : vector<2x128xf32> to vector<2x32xf32>
    %459 = vector.extract_strided_slice %454 {offsets = [0, 96], sizes = [2, 32], strides = [1, 1]} : vector<2x128xf32> to vector<2x32xf32>
    %460 = arith.mulf %457, %380 : vector<2x32xf32>
    %461 = arith.mulf %456, %458 : vector<2x32xf32>
    %462 = arith.addf %460, %461 : vector<2x32xf32>
    %463 = math.tanh %462 : vector<2x32xf32>
    %464 = arith.mulf %459, %463 : vector<2x32xf32>
    %465 = arith.truncf %403 : vector<2x32xf32> to vector<2x32xbf16>
    %cst_85 = arith.constant dense<0.000000e+00> : vector<2x128xf32>
    %466 = tpu.matmul %465, %6, %cst_85 {dimension_numbers = #tpu.dot_dimension_numbers<[1], [0], [0], [1], [0, 0, 1, 1], [], []>} : vector<2x32xbf16>, vector<32x128xbf16>, vector<2x128xf32> -> vector<2x128xf32>
    %467 = arith.truncf %382 : vector<2x32xf32> to vector<2x32xbf16>
    %cst_86 = arith.constant dense<0.000000e+00> : vector<2x128xf32>
    %468 = tpu.matmul %467, %12, %cst_86 {dimension_numbers = #tpu.dot_dimension_numbers<[1], [0], [0], [1], [0, 0, 1, 1], [], []>} : vector<2x32xbf16>, vector<32x128xbf16>, vector<2x128xf32> -> vector<2x128xf32>
    %469 = arith.addf %466, %468 : vector<2x128xf32>
    %470 = arith.addf %469, %24 : vector<2x128xf32>
    %471 = arith.negf %470 : vector<2x128xf32>
    %472 = math.exp %471 : vector<2x128xf32>
    %cst_87 = arith.constant 1.000000e+00 : f32
    %473 = vector.broadcast %cst_87 : f32 to vector<2x128xf32>
    %474 = arith.addf %473, %472 : vector<2x128xf32>
    %475 = arith.divf %473, %474 : vector<2x128xf32>
    %476 = math.tanh %470 : vector<2x128xf32>
    %477 = vector.extract_strided_slice %475 {offsets = [0, 0], sizes = [2, 32], strides = [1, 1]} : vector<2x128xf32> to vector<2x32xf32>
    %478 = vector.extract_strided_slice %475 {offsets = [0, 32], sizes = [2, 32], strides = [1, 1]} : vector<2x128xf32> to vector<2x32xf32>
    %479 = vector.extract_strided_slice %476 {offsets = [0, 64], sizes = [2, 32], strides = [1, 1]} : vector<2x128xf32> to vector<2x32xf32>
    %480 = vector.extract_strided_slice %475 {offsets = [0, 96], sizes = [2, 32], strides = [1, 1]} : vector<2x128xf32> to vector<2x32xf32>
    %481 = arith.mulf %478, %401 : vector<2x32xf32>
    %482 = arith.mulf %477, %479 : vector<2x32xf32>
    %483 = arith.addf %481, %482 : vector<2x32xf32>
    %484 = math.tanh %483 : vector<2x32xf32>
    %485 = arith.mulf %480, %484 : vector<2x32xf32>
    %486 = arith.truncf %424 : vector<2x32xf32> to vector<2x32xbf16>
    %cst_88 = arith.constant dense<0.000000e+00> : vector<2x128xf32>
    %487 = tpu.matmul %486, %8, %cst_88 {dimension_numbers = #tpu.dot_dimension_numbers<[1], [0], [0], [1], [0, 0, 1, 1], [], []>} : vector<2x32xbf16>, vector<32x128xbf16>, vector<2x128xf32> -> vector<2x128xf32>
    %488 = arith.truncf %403 : vector<2x32xf32> to vector<2x32xbf16>
    %cst_89 = arith.constant dense<0.000000e+00> : vector<2x128xf32>
    %489 = tpu.matmul %488, %14, %cst_89 {dimension_numbers = #tpu.dot_dimension_numbers<[1], [0], [0], [1], [0, 0, 1, 1], [], []>} : vector<2x32xbf16>, vector<32x128xbf16>, vector<2x128xf32> -> vector<2x128xf32>
    %490 = arith.addf %487, %489 : vector<2x128xf32>
    %491 = arith.addf %490, %27 : vector<2x128xf32>
    %492 = arith.negf %491 : vector<2x128xf32>
    %493 = math.exp %492 : vector<2x128xf32>
    %cst_90 = arith.constant 1.000000e+00 : f32
    %494 = vector.broadcast %cst_90 : f32 to vector<2x128xf32>
    %495 = arith.addf %494, %493 : vector<2x128xf32>
    %496 = arith.divf %494, %495 : vector<2x128xf32>
    %497 = math.tanh %491 : vector<2x128xf32>
    %498 = vector.extract_strided_slice %496 {offsets = [0, 0], sizes = [2, 32], strides = [1, 1]} : vector<2x128xf32> to vector<2x32xf32>
    %499 = vector.extract_strided_slice %496 {offsets = [0, 32], sizes = [2, 32], strides = [1, 1]} : vector<2x128xf32> to vector<2x32xf32>
    %500 = vector.extract_strided_slice %497 {offsets = [0, 64], sizes = [2, 32], strides = [1, 1]} : vector<2x128xf32> to vector<2x32xf32>
    %501 = vector.extract_strided_slice %496 {offsets = [0, 96], sizes = [2, 32], strides = [1, 1]} : vector<2x128xf32> to vector<2x32xf32>
    %502 = arith.mulf %499, %422 : vector<2x32xf32>
    %503 = arith.mulf %498, %500 : vector<2x32xf32>
    %504 = arith.addf %502, %503 : vector<2x32xf32>
    %505 = math.tanh %504 : vector<2x32xf32>
    %506 = arith.mulf %501, %505 : vector<2x32xf32>
    %507 = arith.addf %425, %506 : vector<2x32xf32>
    %508 = arith.truncf %443 : vector<2x32xf32> to vector<2x32xbf16>
    %cst_91 = arith.constant dense<0.000000e+00> : vector<2x128xf32>
    %509 = tpu.matmul %508, %2, %cst_91 {dimension_numbers = #tpu.dot_dimension_numbers<[1], [0], [0], [1], [0, 0, 1, 1], [], []>} : vector<2x32xbf16>, vector<32x128xbf16>, vector<2x128xf32> -> vector<2x128xf32>
    %510 = arith.addf %509, %61 : vector<2x128xf32>
    %511 = arith.negf %510 : vector<2x128xf32>
    %512 = math.exp %511 : vector<2x128xf32>
    %cst_92 = arith.constant 1.000000e+00 : f32
    %513 = vector.broadcast %cst_92 : f32 to vector<2x128xf32>
    %514 = arith.addf %513, %512 : vector<2x128xf32>
    %515 = arith.divf %513, %514 : vector<2x128xf32>
    %516 = math.tanh %510 : vector<2x128xf32>
    %517 = vector.extract_strided_slice %515 {offsets = [0, 0], sizes = [2, 32], strides = [1, 1]} : vector<2x128xf32> to vector<2x32xf32>
    %518 = vector.extract_strided_slice %515 {offsets = [0, 32], sizes = [2, 32], strides = [1, 1]} : vector<2x128xf32> to vector<2x32xf32>
    %519 = vector.extract_strided_slice %516 {offsets = [0, 64], sizes = [2, 32], strides = [1, 1]} : vector<2x128xf32> to vector<2x32xf32>
    %520 = vector.extract_strided_slice %515 {offsets = [0, 96], sizes = [2, 32], strides = [1, 1]} : vector<2x128xf32> to vector<2x32xf32>
    %521 = arith.mulf %518, %441 : vector<2x32xf32>
    %522 = arith.mulf %517, %519 : vector<2x32xf32>
    %523 = arith.addf %521, %522 : vector<2x32xf32>
    %524 = math.tanh %523 : vector<2x32xf32>
    %525 = arith.mulf %520, %524 : vector<2x32xf32>
    %526 = arith.truncf %464 : vector<2x32xf32> to vector<2x32xbf16>
    %cst_93 = arith.constant dense<0.000000e+00> : vector<2x128xf32>
    %527 = tpu.matmul %526, %4, %cst_93 {dimension_numbers = #tpu.dot_dimension_numbers<[1], [0], [0], [1], [0, 0, 1, 1], [], []>} : vector<2x32xbf16>, vector<32x128xbf16>, vector<2x128xf32> -> vector<2x128xf32>
    %528 = arith.truncf %443 : vector<2x32xf32> to vector<2x32xbf16>
    %cst_94 = arith.constant dense<0.000000e+00> : vector<2x128xf32>
    %529 = tpu.matmul %528, %10, %cst_94 {dimension_numbers = #tpu.dot_dimension_numbers<[1], [0], [0], [1], [0, 0, 1, 1], [], []>} : vector<2x32xbf16>, vector<32x128xbf16>, vector<2x128xf32> -> vector<2x128xf32>
    %530 = arith.addf %527, %529 : vector<2x128xf32>
    %531 = arith.addf %530, %21 : vector<2x128xf32>
    %532 = arith.negf %531 : vector<2x128xf32>
    %533 = math.exp %532 : vector<2x128xf32>
    %cst_95 = arith.constant 1.000000e+00 : f32
    %534 = vector.broadcast %cst_95 : f32 to vector<2x128xf32>
    %535 = arith.addf %534, %533 : vector<2x128xf32>
    %536 = arith.divf %534, %535 : vector<2x128xf32>
    %537 = math.tanh %531 : vector<2x128xf32>
    %538 = vector.extract_strided_slice %536 {offsets = [0, 0], sizes = [2, 32], strides = [1, 1]} : vector<2x128xf32> to vector<2x32xf32>
    %539 = vector.extract_strided_slice %536 {offsets = [0, 32], sizes = [2, 32], strides = [1, 1]} : vector<2x128xf32> to vector<2x32xf32>
    %540 = vector.extract_strided_slice %537 {offsets = [0, 64], sizes = [2, 32], strides = [1, 1]} : vector<2x128xf32> to vector<2x32xf32>
    %541 = vector.extract_strided_slice %536 {offsets = [0, 96], sizes = [2, 32], strides = [1, 1]} : vector<2x128xf32> to vector<2x32xf32>
    %542 = arith.mulf %539, %462 : vector<2x32xf32>
    %543 = arith.mulf %538, %540 : vector<2x32xf32>
    %544 = arith.addf %542, %543 : vector<2x32xf32>
    %545 = math.tanh %544 : vector<2x32xf32>
    %546 = arith.mulf %541, %545 : vector<2x32xf32>
    %547 = arith.truncf %485 : vector<2x32xf32> to vector<2x32xbf16>
    %cst_96 = arith.constant dense<0.000000e+00> : vector<2x128xf32>
    %548 = tpu.matmul %547, %6, %cst_96 {dimension_numbers = #tpu.dot_dimension_numbers<[1], [0], [0], [1], [0, 0, 1, 1], [], []>} : vector<2x32xbf16>, vector<32x128xbf16>, vector<2x128xf32> -> vector<2x128xf32>
    %549 = arith.truncf %464 : vector<2x32xf32> to vector<2x32xbf16>
    %cst_97 = arith.constant dense<0.000000e+00> : vector<2x128xf32>
    %550 = tpu.matmul %549, %12, %cst_97 {dimension_numbers = #tpu.dot_dimension_numbers<[1], [0], [0], [1], [0, 0, 1, 1], [], []>} : vector<2x32xbf16>, vector<32x128xbf16>, vector<2x128xf32> -> vector<2x128xf32>
    %551 = arith.addf %548, %550 : vector<2x128xf32>
    %552 = arith.addf %551, %24 : vector<2x128xf32>
    %553 = arith.negf %552 : vector<2x128xf32>
    %554 = math.exp %553 : vector<2x128xf32>
    %cst_98 = arith.constant 1.000000e+00 : f32
    %555 = vector.broadcast %cst_98 : f32 to vector<2x128xf32>
    %556 = arith.addf %555, %554 : vector<2x128xf32>
    %557 = arith.divf %555, %556 : vector<2x128xf32>
    %558 = math.tanh %552 : vector<2x128xf32>
    %559 = vector.extract_strided_slice %557 {offsets = [0, 0], sizes = [2, 32], strides = [1, 1]} : vector<2x128xf32> to vector<2x32xf32>
    %560 = vector.extract_strided_slice %557 {offsets = [0, 32], sizes = [2, 32], strides = [1, 1]} : vector<2x128xf32> to vector<2x32xf32>
    %561 = vector.extract_strided_slice %558 {offsets = [0, 64], sizes = [2, 32], strides = [1, 1]} : vector<2x128xf32> to vector<2x32xf32>
    %562 = vector.extract_strided_slice %557 {offsets = [0, 96], sizes = [2, 32], strides = [1, 1]} : vector<2x128xf32> to vector<2x32xf32>
    %563 = arith.mulf %560, %483 : vector<2x32xf32>
    %564 = arith.mulf %559, %561 : vector<2x32xf32>
    %565 = arith.addf %563, %564 : vector<2x32xf32>
    %566 = math.tanh %565 : vector<2x32xf32>
    %567 = arith.mulf %562, %566 : vector<2x32xf32>
    %568 = arith.truncf %506 : vector<2x32xf32> to vector<2x32xbf16>
    %cst_99 = arith.constant dense<0.000000e+00> : vector<2x128xf32>
    %569 = tpu.matmul %568, %8, %cst_99 {dimension_numbers = #tpu.dot_dimension_numbers<[1], [0], [0], [1], [0, 0, 1, 1], [], []>} : vector<2x32xbf16>, vector<32x128xbf16>, vector<2x128xf32> -> vector<2x128xf32>
    %570 = arith.truncf %485 : vector<2x32xf32> to vector<2x32xbf16>
    %cst_100 = arith.constant dense<0.000000e+00> : vector<2x128xf32>
    %571 = tpu.matmul %570, %14, %cst_100 {dimension_numbers = #tpu.dot_dimension_numbers<[1], [0], [0], [1], [0, 0, 1, 1], [], []>} : vector<2x32xbf16>, vector<32x128xbf16>, vector<2x128xf32> -> vector<2x128xf32>
    %572 = arith.addf %569, %571 : vector<2x128xf32>
    %573 = arith.addf %572, %27 : vector<2x128xf32>
    %574 = arith.negf %573 : vector<2x128xf32>
    %575 = math.exp %574 : vector<2x128xf32>
    %cst_101 = arith.constant 1.000000e+00 : f32
    %576 = vector.broadcast %cst_101 : f32 to vector<2x128xf32>
    %577 = arith.addf %576, %575 : vector<2x128xf32>
    %578 = arith.divf %576, %577 : vector<2x128xf32>
    %579 = math.tanh %573 : vector<2x128xf32>
    %580 = vector.extract_strided_slice %578 {offsets = [0, 0], sizes = [2, 32], strides = [1, 1]} : vector<2x128xf32> to vector<2x32xf32>
    %581 = vector.extract_strided_slice %578 {offsets = [0, 32], sizes = [2, 32], strides = [1, 1]} : vector<2x128xf32> to vector<2x32xf32>
    %582 = vector.extract_strided_slice %579 {offsets = [0, 64], sizes = [2, 32], strides = [1, 1]} : vector<2x128xf32> to vector<2x32xf32>
    %583 = vector.extract_strided_slice %578 {offsets = [0, 96], sizes = [2, 32], strides = [1, 1]} : vector<2x128xf32> to vector<2x32xf32>
    %584 = arith.mulf %581, %504 : vector<2x32xf32>
    %585 = arith.mulf %580, %582 : vector<2x32xf32>
    %586 = arith.addf %584, %585 : vector<2x32xf32>
    %587 = math.tanh %586 : vector<2x32xf32>
    %588 = arith.mulf %583, %587 : vector<2x32xf32>
    %589 = arith.addf %507, %588 : vector<2x32xf32>
    %590 = arith.truncf %546 : vector<2x32xf32> to vector<2x32xbf16>
    %cst_102 = arith.constant dense<0.000000e+00> : vector<2x128xf32>
    %591 = tpu.matmul %590, %4, %cst_102 {dimension_numbers = #tpu.dot_dimension_numbers<[1], [0], [0], [1], [0, 0, 1, 1], [], []>} : vector<2x32xbf16>, vector<32x128xbf16>, vector<2x128xf32> -> vector<2x128xf32>
    %592 = arith.truncf %525 : vector<2x32xf32> to vector<2x32xbf16>
    %cst_103 = arith.constant dense<0.000000e+00> : vector<2x128xf32>
    %593 = tpu.matmul %592, %10, %cst_103 {dimension_numbers = #tpu.dot_dimension_numbers<[1], [0], [0], [1], [0, 0, 1, 1], [], []>} : vector<2x32xbf16>, vector<32x128xbf16>, vector<2x128xf32> -> vector<2x128xf32>
    %594 = arith.addf %591, %593 : vector<2x128xf32>
    %595 = arith.addf %594, %21 : vector<2x128xf32>
    %596 = arith.negf %595 : vector<2x128xf32>
    %597 = math.exp %596 : vector<2x128xf32>
    %cst_104 = arith.constant 1.000000e+00 : f32
    %598 = vector.broadcast %cst_104 : f32 to vector<2x128xf32>
    %599 = arith.addf %598, %597 : vector<2x128xf32>
    %600 = arith.divf %598, %599 : vector<2x128xf32>
    %601 = math.tanh %595 : vector<2x128xf32>
    %602 = vector.extract_strided_slice %600 {offsets = [0, 0], sizes = [2, 32], strides = [1, 1]} : vector<2x128xf32> to vector<2x32xf32>
    %603 = vector.extract_strided_slice %600 {offsets = [0, 32], sizes = [2, 32], strides = [1, 1]} : vector<2x128xf32> to vector<2x32xf32>
    %604 = vector.extract_strided_slice %601 {offsets = [0, 64], sizes = [2, 32], strides = [1, 1]} : vector<2x128xf32> to vector<2x32xf32>
    %605 = vector.extract_strided_slice %600 {offsets = [0, 96], sizes = [2, 32], strides = [1, 1]} : vector<2x128xf32> to vector<2x32xf32>
    %606 = arith.mulf %603, %544 : vector<2x32xf32>
    %607 = arith.mulf %602, %604 : vector<2x32xf32>
    %608 = arith.addf %606, %607 : vector<2x32xf32>
    %609 = math.tanh %608 : vector<2x32xf32>
    %610 = arith.mulf %605, %609 : vector<2x32xf32>
    %611 = arith.truncf %567 : vector<2x32xf32> to vector<2x32xbf16>
    %cst_105 = arith.constant dense<0.000000e+00> : vector<2x128xf32>
    %612 = tpu.matmul %611, %6, %cst_105 {dimension_numbers = #tpu.dot_dimension_numbers<[1], [0], [0], [1], [0, 0, 1, 1], [], []>} : vector<2x32xbf16>, vector<32x128xbf16>, vector<2x128xf32> -> vector<2x128xf32>
    %613 = arith.truncf %546 : vector<2x32xf32> to vector<2x32xbf16>
    %cst_106 = arith.constant dense<0.000000e+00> : vector<2x128xf32>
    %614 = tpu.matmul %613, %12, %cst_106 {dimension_numbers = #tpu.dot_dimension_numbers<[1], [0], [0], [1], [0, 0, 1, 1], [], []>} : vector<2x32xbf16>, vector<32x128xbf16>, vector<2x128xf32> -> vector<2x128xf32>
    %615 = arith.addf %612, %614 : vector<2x128xf32>
    %616 = arith.addf %615, %24 : vector<2x128xf32>
    %617 = arith.negf %616 : vector<2x128xf32>
    %618 = math.exp %617 : vector<2x128xf32>
    %cst_107 = arith.constant 1.000000e+00 : f32
    %619 = vector.broadcast %cst_107 : f32 to vector<2x128xf32>
    %620 = arith.addf %619, %618 : vector<2x128xf32>
    %621 = arith.divf %619, %620 : vector<2x128xf32>
    %622 = math.tanh %616 : vector<2x128xf32>
    %623 = vector.extract_strided_slice %621 {offsets = [0, 0], sizes = [2, 32], strides = [1, 1]} : vector<2x128xf32> to vector<2x32xf32>
    %624 = vector.extract_strided_slice %621 {offsets = [0, 32], sizes = [2, 32], strides = [1, 1]} : vector<2x128xf32> to vector<2x32xf32>
    %625 = vector.extract_strided_slice %622 {offsets = [0, 64], sizes = [2, 32], strides = [1, 1]} : vector<2x128xf32> to vector<2x32xf32>
    %626 = vector.extract_strided_slice %621 {offsets = [0, 96], sizes = [2, 32], strides = [1, 1]} : vector<2x128xf32> to vector<2x32xf32>
    %627 = arith.mulf %624, %565 : vector<2x32xf32>
    %628 = arith.mulf %623, %625 : vector<2x32xf32>
    %629 = arith.addf %627, %628 : vector<2x32xf32>
    %630 = math.tanh %629 : vector<2x32xf32>
    %631 = arith.mulf %626, %630 : vector<2x32xf32>
    %632 = arith.truncf %588 : vector<2x32xf32> to vector<2x32xbf16>
    %cst_108 = arith.constant dense<0.000000e+00> : vector<2x128xf32>
    %633 = tpu.matmul %632, %8, %cst_108 {dimension_numbers = #tpu.dot_dimension_numbers<[1], [0], [0], [1], [0, 0, 1, 1], [], []>} : vector<2x32xbf16>, vector<32x128xbf16>, vector<2x128xf32> -> vector<2x128xf32>
    %634 = arith.truncf %567 : vector<2x32xf32> to vector<2x32xbf16>
    %cst_109 = arith.constant dense<0.000000e+00> : vector<2x128xf32>
    %635 = tpu.matmul %634, %14, %cst_109 {dimension_numbers = #tpu.dot_dimension_numbers<[1], [0], [0], [1], [0, 0, 1, 1], [], []>} : vector<2x32xbf16>, vector<32x128xbf16>, vector<2x128xf32> -> vector<2x128xf32>
    %636 = arith.addf %633, %635 : vector<2x128xf32>
    %637 = arith.addf %636, %27 : vector<2x128xf32>
    %638 = arith.negf %637 : vector<2x128xf32>
    %639 = math.exp %638 : vector<2x128xf32>
    %cst_110 = arith.constant 1.000000e+00 : f32
    %640 = vector.broadcast %cst_110 : f32 to vector<2x128xf32>
    %641 = arith.addf %640, %639 : vector<2x128xf32>
    %642 = arith.divf %640, %641 : vector<2x128xf32>
    %643 = math.tanh %637 : vector<2x128xf32>
    %644 = vector.extract_strided_slice %642 {offsets = [0, 0], sizes = [2, 32], strides = [1, 1]} : vector<2x128xf32> to vector<2x32xf32>
    %645 = vector.extract_strided_slice %642 {offsets = [0, 32], sizes = [2, 32], strides = [1, 1]} : vector<2x128xf32> to vector<2x32xf32>
    %646 = vector.extract_strided_slice %643 {offsets = [0, 64], sizes = [2, 32], strides = [1, 1]} : vector<2x128xf32> to vector<2x32xf32>
    %647 = vector.extract_strided_slice %642 {offsets = [0, 96], sizes = [2, 32], strides = [1, 1]} : vector<2x128xf32> to vector<2x32xf32>
    %648 = arith.mulf %645, %586 : vector<2x32xf32>
    %649 = arith.mulf %644, %646 : vector<2x32xf32>
    %650 = arith.addf %648, %649 : vector<2x32xf32>
    %651 = math.tanh %650 : vector<2x32xf32>
    %652 = arith.mulf %647, %651 : vector<2x32xf32>
    %653 = arith.addf %589, %652 : vector<2x32xf32>
    %654 = arith.truncf %631 : vector<2x32xf32> to vector<2x32xbf16>
    %cst_111 = arith.constant dense<0.000000e+00> : vector<2x128xf32>
    %655 = tpu.matmul %654, %6, %cst_111 {dimension_numbers = #tpu.dot_dimension_numbers<[1], [0], [0], [1], [0, 0, 1, 1], [], []>} : vector<2x32xbf16>, vector<32x128xbf16>, vector<2x128xf32> -> vector<2x128xf32>
    %656 = arith.truncf %610 : vector<2x32xf32> to vector<2x32xbf16>
    %cst_112 = arith.constant dense<0.000000e+00> : vector<2x128xf32>
    %657 = tpu.matmul %656, %12, %cst_112 {dimension_numbers = #tpu.dot_dimension_numbers<[1], [0], [0], [1], [0, 0, 1, 1], [], []>} : vector<2x32xbf16>, vector<32x128xbf16>, vector<2x128xf32> -> vector<2x128xf32>
    %658 = arith.addf %655, %657 : vector<2x128xf32>
    %659 = arith.addf %658, %24 : vector<2x128xf32>
    %660 = arith.negf %659 : vector<2x128xf32>
    %661 = math.exp %660 : vector<2x128xf32>
    %cst_113 = arith.constant 1.000000e+00 : f32
    %662 = vector.broadcast %cst_113 : f32 to vector<2x128xf32>
    %663 = arith.addf %662, %661 : vector<2x128xf32>
    %664 = arith.divf %662, %663 : vector<2x128xf32>
    %665 = math.tanh %659 : vector<2x128xf32>
    %666 = vector.extract_strided_slice %664 {offsets = [0, 0], sizes = [2, 32], strides = [1, 1]} : vector<2x128xf32> to vector<2x32xf32>
    %667 = vector.extract_strided_slice %664 {offsets = [0, 32], sizes = [2, 32], strides = [1, 1]} : vector<2x128xf32> to vector<2x32xf32>
    %668 = vector.extract_strided_slice %665 {offsets = [0, 64], sizes = [2, 32], strides = [1, 1]} : vector<2x128xf32> to vector<2x32xf32>
    %669 = vector.extract_strided_slice %664 {offsets = [0, 96], sizes = [2, 32], strides = [1, 1]} : vector<2x128xf32> to vector<2x32xf32>
    %670 = arith.mulf %667, %629 : vector<2x32xf32>
    %671 = arith.mulf %666, %668 : vector<2x32xf32>
    %672 = arith.addf %670, %671 : vector<2x32xf32>
    %673 = math.tanh %672 : vector<2x32xf32>
    %674 = arith.mulf %669, %673 : vector<2x32xf32>
    %675 = arith.truncf %652 : vector<2x32xf32> to vector<2x32xbf16>
    %cst_114 = arith.constant dense<0.000000e+00> : vector<2x128xf32>
    %676 = tpu.matmul %675, %8, %cst_114 {dimension_numbers = #tpu.dot_dimension_numbers<[1], [0], [0], [1], [0, 0, 1, 1], [], []>} : vector<2x32xbf16>, vector<32x128xbf16>, vector<2x128xf32> -> vector<2x128xf32>
    %677 = arith.truncf %631 : vector<2x32xf32> to vector<2x32xbf16>
    %cst_115 = arith.constant dense<0.000000e+00> : vector<2x128xf32>
    %678 = tpu.matmul %677, %14, %cst_115 {dimension_numbers = #tpu.dot_dimension_numbers<[1], [0], [0], [1], [0, 0, 1, 1], [], []>} : vector<2x32xbf16>, vector<32x128xbf16>, vector<2x128xf32> -> vector<2x128xf32>
    %679 = arith.addf %676, %678 : vector<2x128xf32>
    %680 = arith.addf %679, %27 : vector<2x128xf32>
    %681 = arith.negf %680 : vector<2x128xf32>
    %682 = math.exp %681 : vector<2x128xf32>
    %cst_116 = arith.constant 1.000000e+00 : f32
    %683 = vector.broadcast %cst_116 : f32 to vector<2x128xf32>
    %684 = arith.addf %683, %682 : vector<2x128xf32>
    %685 = arith.divf %683, %684 : vector<2x128xf32>
    %686 = math.tanh %680 : vector<2x128xf32>
    %687 = vector.extract_strided_slice %685 {offsets = [0, 0], sizes = [2, 32], strides = [1, 1]} : vector<2x128xf32> to vector<2x32xf32>
    %688 = vector.extract_strided_slice %685 {offsets = [0, 32], sizes = [2, 32], strides = [1, 1]} : vector<2x128xf32> to vector<2x32xf32>
    %689 = vector.extract_strided_slice %686 {offsets = [0, 64], sizes = [2, 32], strides = [1, 1]} : vector<2x128xf32> to vector<2x32xf32>
    %690 = vector.extract_strided_slice %685 {offsets = [0, 96], sizes = [2, 32], strides = [1, 1]} : vector<2x128xf32> to vector<2x32xf32>
    %691 = arith.mulf %688, %650 : vector<2x32xf32>
    %692 = arith.mulf %687, %689 : vector<2x32xf32>
    %693 = arith.addf %691, %692 : vector<2x32xf32>
    %694 = math.tanh %693 : vector<2x32xf32>
    %695 = arith.mulf %690, %694 : vector<2x32xf32>
    %696 = arith.addf %653, %695 : vector<2x32xf32>
    %697 = arith.truncf %695 : vector<2x32xf32> to vector<2x32xbf16>
    %cst_117 = arith.constant dense<0.000000e+00> : vector<2x128xf32>
    %698 = tpu.matmul %697, %8, %cst_117 {dimension_numbers = #tpu.dot_dimension_numbers<[1], [0], [0], [1], [0, 0, 1, 1], [], []>} : vector<2x32xbf16>, vector<32x128xbf16>, vector<2x128xf32> -> vector<2x128xf32>
    %699 = arith.truncf %674 : vector<2x32xf32> to vector<2x32xbf16>
    %cst_118 = arith.constant dense<0.000000e+00> : vector<2x128xf32>
    %700 = tpu.matmul %699, %14, %cst_118 {dimension_numbers = #tpu.dot_dimension_numbers<[1], [0], [0], [1], [0, 0, 1, 1], [], []>} : vector<2x32xbf16>, vector<32x128xbf16>, vector<2x128xf32> -> vector<2x128xf32>
    %701 = arith.addf %698, %700 : vector<2x128xf32>
    %702 = arith.addf %701, %27 : vector<2x128xf32>
    %703 = arith.negf %702 : vector<2x128xf32>
    %704 = math.exp %703 : vector<2x128xf32>
    %cst_119 = arith.constant 1.000000e+00 : f32
    %705 = vector.broadcast %cst_119 : f32 to vector<2x128xf32>
    %706 = arith.addf %705, %704 : vector<2x128xf32>
    %707 = arith.divf %705, %706 : vector<2x128xf32>
    %708 = math.tanh %702 : vector<2x128xf32>
    %709 = vector.extract_strided_slice %707 {offsets = [0, 0], sizes = [2, 32], strides = [1, 1]} : vector<2x128xf32> to vector<2x32xf32>
    %710 = vector.extract_strided_slice %707 {offsets = [0, 32], sizes = [2, 32], strides = [1, 1]} : vector<2x128xf32> to vector<2x32xf32>
    %711 = vector.extract_strided_slice %708 {offsets = [0, 64], sizes = [2, 32], strides = [1, 1]} : vector<2x128xf32> to vector<2x32xf32>
    %712 = vector.extract_strided_slice %707 {offsets = [0, 96], sizes = [2, 32], strides = [1, 1]} : vector<2x128xf32> to vector<2x32xf32>
    %713 = arith.mulf %710, %693 : vector<2x32xf32>
    %714 = arith.mulf %709, %711 : vector<2x32xf32>
    %715 = arith.addf %713, %714 : vector<2x32xf32>
    %716 = math.tanh %715 : vector<2x32xf32>
    %717 = arith.mulf %712, %716 : vector<2x32xf32>
    %718 = arith.addf %696, %717 : vector<2x32xf32>
    %cst_120 = arith.constant 1.250000e-01 : f32
    %719 = vector.broadcast %cst_120 : f32 to vector<2x32xf32>
    %720 = arith.mulf %718, %719 : vector<2x32xf32>
    %c0_121 = arith.constant 0 : index
    %c0_122 = arith.constant 0 : index
    %721 = vector.load %arg5[%c0_121, %c0_122] : memref<32x16xf32, #tpu.memory_space<vmem>>, vector<32x16xf32>
    %cst_123 = arith.constant dense<0.000000e+00> : vector<2x16xf32>
    %722 = tpu.matmul %720, %721, %cst_123 {dimension_numbers = #tpu.dot_dimension_numbers<[1], [0], [0], [1], [0, 0, 1, 1], [], []>} : vector<2x32xf32>, vector<32x16xf32>, vector<2x16xf32> -> vector<2x16xf32>
    %c0_124 = arith.constant 0 : index
    %c0_125 = arith.constant 0 : index
    %723 = vector.load %arg6[%c0_124, %c0_125] : memref<1x16xf32, #tpu.memory_space<vmem>>, vector<1x16xf32>
    %724 = vector.broadcast %723 : vector<1x16xf32> to vector<2x16xf32>
    %725 = arith.addf %722, %724 : vector<2x16xf32>
    %cst_126 = arith.constant 0.000000e+00 : f32
    %726 = vector.broadcast %cst_126 : f32 to vector<2x16xf32>
    %727 = arith.maximumf %725, %726 : vector<2x16xf32>
    %c0_127 = arith.constant 0 : index
    %c0_128 = arith.constant 0 : index
    %728 = vector.load %arg7[%c0_127, %c0_128] : memref<1x16xf32, #tpu.memory_space<vmem>>, vector<1x16xf32>
    %729 = vector.broadcast %728 : vector<1x16xf32> to vector<2x16xf32>
    %730 = arith.mulf %727, %729 : vector<2x16xf32>
    %cst_129 = arith.constant dense<0.000000e+00> : vector<2xf32>
    %731 = vector.multi_reduction <add>, %730, %cst_129 [1] : vector<2x16xf32> to vector<2xf32>
    %732 = vector.shape_cast %731 : vector<2xf32> to vector<2x1xf32>
    %c0_130 = arith.constant 0 : index
    %c0_131 = arith.constant 0 : index
    %733 = vector.load %arg8[%c0_130, %c0_131] : memref<1x1xf32, #tpu.memory_space<vmem>>, vector<1x1xf32>
    %734 = vector.broadcast %733 : vector<1x1xf32> to vector<2x1xf32>
    %735 = arith.addf %732, %734 : vector<2x1xf32>
    %c0_132 = arith.constant 0 : index
    %c0_133 = arith.constant 0 : index
    %736 = vector.load %arg9[%c0_132, %c0_133] : memref<2x1xf32, #tpu.memory_space<vmem>>, vector<2x1xf32>
    tpu.vector_store %arg9[%c0_132, %c0_133], %735 {strides = array<i32>} : memref<2x1xf32, #tpu.memory_space<vmem>>, vector<2x1xf32>,
    return
  }
}

</mosaic_0001>

<bundles_post_ra>
// kernel: tpu_custom_call.1
= control target key start
LH: loop header
LB: loop body
LE: loop exit
PB: predicated region body
PF: predicated region fallthrough
CT: control target
= control target key end

     0   :  { %s6148_s0 = inlined_call_operand.vmem [shape: f32[2,8,4], index: 0, kind: input, shape index: {}]   ;;  %s6149_s1 = inlined_call_operand.hbm [shape: bf16[4,128], index: 1, kind: input, shape index: {}]   ;;  %s6150_s2 = inlined_call_operand.hbm [shape: bf16[3,32,128], index: 2, kind: input, shape index: {}]   ;;  %s6151_s3 = inlined_call_operand.vmem [shape: bf16[4,32,128], index: 3, kind: input, shape index: {}]   ;;  %s6152_s4 = inlined_call_operand.hbm [shape: f32[4,128], index: 4, kind: input, shape index: {}]   ;;  %s6153_s5 = inlined_call_operand.vmem [shape: f32[32,16], index: 5, kind: input, shape index: {}]   ;;  %s6154_s6 = inlined_call_operand.vmem [shape: f32[1,16], index: 6, kind: input, shape index: {}]   ;;  %s6155_s7 = inlined_call_operand.vmem [shape: f32[1,16], index: 7, kind: input, shape index: {}]   ;;  %s6156_s8 = inlined_call_operand.<no memory space> [shape: f32[1,1], index: 8, kind: input, shape index: {}]   ;;  %s6157_s9 = inlined_call_operand.vmem [shape: f32[2,1], index: 9, kind: output, shape index: {}]  }
   0x1   :  { %v14_v0 = vstv %s6156_s8 }
   0x2   :  { %15 = vst [vmem:[#allocation2] sm:$0x1] %v14_v0 }
   0x3   :  { %16 = vsyncpa [#allocation4], 0 }
   0x4   :  { %17 = vsyncpa [#allocation6], 0  ;;  %s5147_s11 = smov [#allocation5]  }
   0x5   :  { %s35_s12 = sshll.u32 %s5147_s11, 4  ;;  %s36_s12 = int_to_ptr.vmem [resolvable:$true] %s35_s12 }
   0x6   :  { %s5091_s13 = scalar_lea.vmem %s36_s12, 768  ;;  %p5096_p1 = scmp.lt.s32.totalorder %s36_s12, %s36_s12 }
   0x7   :  { %p5092_p0 = scmp.ne.s32.totalorder %s36_s12, %s5091_s13  ;;  %p5097_p2 = scmp.lt.s32.totalorder %s5091_s13, %s5091_s13 }
   0x9   :  { %p5098_p3 = por %p5097_p2, %p5096_p1 }
   0xb   :  { %p5099_p4 = pnand %p5098_p3, %p5092_p0 }
   0xd   :  { %5102 = shalt.err (!%p5099_p4)
}
   0xe   :  { %s5148_s14 = smov 64   ;;  %s5149_s15 = smov 4  }
   0xf   :  { %41 = dma.hbm_to_vmem [thread:$0]  %s6150_s2, 768, %s36_s12, [#allocation6], %s5148_s14, %s5148_s14, %s5149_s15  }
  0x10   :  { %s5150_s8 = smov [#allocation3]   ;;  %s5151_s19 = smov [#allocation7]  }
  0x11   :  { %s26_s18 = sshll.u32 %s5150_s8, 4  ;;  %s50_s20 = sshll.u32 %s5151_s19, 4  ;;  %s27_s18 = int_to_ptr.vmem [resolvable:$true] %s26_s18  ;;  %s51_s20 = int_to_ptr.vmem [resolvable:$true] %s50_s20 }
  0x12   :  { %s5111_s21 = scalar_lea.vmem %s27_s18, 32  ;;  %p5116_p6 = scmp.lt.s32.totalorder %s27_s18, %s27_s18 }
  0x13   :  { %p5112_p5 = scmp.ne.s32.totalorder %s27_s18, %s5111_s21  ;;  %p5117_p7 = scmp.lt.s32.totalorder %s5111_s21, %s5111_s21 }
  0x15   :  { %p5118_p8 = por %p5117_p7, %p5116_p6 }
  0x17   :  { %p5119_p9 = pnand %p5118_p8, %p5112_p5 }
  0x19   :  { %5122 = shalt.err (!%p5119_p9)
}
  0x1a   :  { %29 = dma.hbm_to_vmem [thread:$0]  %s6149_s1, 32, %s27_s18, [#allocation4]  }
  0x1b   :  { %s5131_s24 = scalar_lea.vmem %s51_s20, 64  ;;  %p5136_p11 = scmp.lt.s32.totalorder %s51_s20, %s51_s20 }
  0x1c   :  { %p5132_p10 = scmp.ne.s32.totalorder %s51_s20, %s5131_s24  ;;  %p5137_p12 = scmp.lt.s32.totalorder %s5131_s24, %s5131_s24 }
  0x1e   :  { %p5138_p13 = por %p5137_p12, %p5136_p11 }
  0x20   :  { %p5139_p0 = pnand %p5138_p13, %p5132_p10 }
  0x22   :  { %5142 = shalt.err (!%p5139_p0)
}
  0x23   :  { %53 = dma.hbm_to_vmem [thread:$0]  %s6152_s4, 64, %s51_s20, [#allocation6]  }
  0x24   :  { %5143 = dma.done.wait [#allocation4], 32  }
  0x25   :  { %5144 = vsyncadd [#allocation4], 4294967264 }
  0x26   :  { %5145 = dma.done.wait [#allocation6], 832  }
  0x27   :  { %5146 = vsyncadd [#allocation6], 4294966464  ;;  %v5152_v1 = vmov 0.0   ;;  %vm5153_vm0 = vmmov 0   ;;  %vm139_vm1 = vcmask 1041408   ;;  %v123_v3 = vld [vmem:[%s6148_s0] sm:$0xff]  ;;  %v107_v36 = vlaneseq }
  0x28   :  { %4283 = vmatprep.subr.bf16.mxu0 %v5152_v1  ;;  %4285 = vmatprep.mubr.msk.bf16.mxu0 %vm5153_vm0, %v5152_v1  ;;  %v72_v2 = vld [vmem:[#allocation3] sm:$0x3]  ;;  %v124_v4 = vld [vmem:[%s6148_s0 + $0x8] sm:$0xff]  ;;  %v125_v6 = vpack.c.bf16 %v123_v3, %v123_v3  ;;  %vm132_vm2 = vcmask 1041409   ;;  %vm135_vm3 = vcmask 31744   ;;  %v5154_v27 = vmov 0  }
  0x29   :  { %4289 = vmatprep.subr.bf16.mxu1 %v5152_v1  ;;  %4291 = vmatprep.mubr.msk.bf16.mxu1 %vm5153_vm0, %v5152_v1  ;;  %v5232_v5 = vsel %vm139_vm1, %v72_v2, 0  ;;  %v126_v7 = vpack.c.bf16 %v124_v4, %v124_v4  ;;  %v5272_v25 = vld [vmem:[%s6151_s3 + $0x8] sm:$0xff]   ;;  %v5279_v26 = vld [vmem:[%s6151_s3] sm:$0xff]   ;;  %v5293_v39 = vshrl.u32 %v107_v36, 7  ;;  %v5296_v43 = vld [vmem:[#allocation7] sm:$0xf] }
  0x2a   :  { %4284 = vmatpush3.bf16.msra.mxu0 %v5232_v5  ;;  %4290 = vmatpush3.bf16.msra.mxu1 %v5232_v5  ;;  %v5237_v8 = vunpack.c.l.b16 %v125_v6  ;;  %s5155_s10 = smov 32   ;;  %v5310_v3 = vld [vmem:[#allocation5 + $0x8] sm:$0xff]   ;;  %vm523_vm4 = vcmask 261120   ;;  %vm3952_vm5 = vcmask 123904   ;;  %vm3964_vm6 = vcmask 1024  }
  0x2b   :  { %4295 = vmatprep.subr.bf16.mxu0 %v5152_v1  ;;  %v5239_v9 = vunpack.c.l.b16 %v126_v7  ;;  %4301 = vmatprep.subr.bf16.mxu1 %v5152_v1  ;;  %v109_v42 = vsub.s32 0, %v5293_v39 }
  0x2c   :  { %v229_v11 = vrot.slane %v5237_v8, 2  ;;  %v323_v17 = vrot.slane %v5237_v8, 4  ;;  %v417_v21 = vrot.slane %v5237_v8, 6  ;;  %v183_v2 = vrot.slane %v5237_v8, 1 }
  0x2d   :  { %v131_v10 = vrot.slane %v5239_v9, 7  ;;  %v230_v12 = vrot.slane %v5239_v9, 1  ;;  %v324_v18 = vrot.slane %v5239_v9, 3  ;;  %v418_v22 = vrot.slane %v5239_v9, 5 }
  0x2e   :  { %v5301_v46 = vrot.slane %v5296_v43, %v109_v42  ;;  %v184_v4 = vsel %vm132_vm2, %v5239_v9, %v183_v2  ;;  %v276_v6 = vrot.slane %v5237_v8, 3  ;;  %v277_v7 = vrot.slane %v5239_v9, 2 }
  0x2f   :  { %v133_v13 = vsel %vm132_vm2, %v131_v10, %v5237_v8  ;;  %v231_v15 = vsel %vm132_vm2, %v230_v12, %v229_v11  ;;  %v325_v19 = vsel %vm132_vm2, %v324_v18, %v323_v17  ;;  %v419_v23 = vsel %vm132_vm2, %v418_v22, %v417_v21  ;;  %v5318_v11 = vld [vmem:[#allocation5] sm:$0xff]  }
  0x30   :  { %v134_v14 = vpack.c.b16 %v133_v13, %v133_v13  ;;  %v232_v16 = vpack.c.b16 %v231_v15, %v231_v15  ;;  %v326_v20 = vpack.c.b16 %v325_v19, %v325_v19  ;;  %v420_v24 = vpack.c.b16 %v419_v23, %v419_v23 }
  0x31   :  { %v185_v10 = vpack.c.b16 %v184_v4, %v184_v4  ;;  %v278_v12 = vsel %vm132_vm2, %v277_v7, %v276_v6  ;;  %v370_v15 = vrot.slane %v5237_v8, 5  ;;  %v464_v19 = vrot.slane %v5237_v8, 7 }
  0x32   :  { %4286 = vmatmul.mubr.msk.bf16.vlgmr.msra.gmra.mxu0 %vm135_vm3, %v134_v14  ;;  %v279_v14 = vpack.c.b16 %v278_v12, %v278_v12 }
  0x33   :  { %4296 = vmatpush3.bf16.msra.mxu0 %v5232_v5  ;;  %4297 = vmatprep.mubr.msk.bf16.mxu0 %vm5153_vm0, %v5152_v1 }
  0x34   :  { %4307 = vmatprep.subr.bf16.mxu0 %v5152_v1  ;;  %4292 = vmatmul.mubr.msk.bf16.vlgmr.msra.gmra.mxu1 %vm135_vm3, %v185_v10 }
  0x35   :  { %4302 = vmatpush3.bf16.msra.mxu1 %v5232_v5  ;;  %4303 = vmatprep.mubr.msk.bf16.mxu1 %vm5153_vm0, %v5152_v1 }
  0x36   :  { %4313 = vmatprep.subr.bf16.mxu1 %v5152_v1 }
  0x3a   :  { %4298 = vmatmul.mubr.msk.bf16.vlgmr.msra.gmra.mxu0 %vm135_vm3, %v232_v16  ;;  %v371_v16 = vrot.slane %v5239_v9, 4 }
  0x3b   :  { %4308 = vmatpush3.bf16.msra.mxu0 %v5232_v5  ;;  %4309 = vmatprep.mubr.msk.bf16.mxu0 %vm5153_vm0, %v5152_v1 }
  0x3c   :  { %4319 = vmatprep.subr.bf16.mxu0 %v5152_v1  ;;  %4304 = vmatmul.mubr.msk.bf16.vlgmr.msra.gmra.mxu1 %vm135_vm3, %v279_v14  ;;  %v372_v17 = vsel %vm132_vm2, %v371_v16, %v370_v15 }
  0x3d   :  { %4314 = vmatpush3.bf16.msra.mxu1 %v5232_v5  ;;  %4315 = vmatprep.mubr.msk.bf16.mxu1 %vm5153_vm0, %v5152_v1  ;;  %v373_v18 = vpack.c.b16 %v372_v17, %v372_v17 }
  0x3e   :  { %4325 = vmatprep.subr.bf16.mxu1 %v5152_v1 }
  0x42   :  { %4310 = vmatmul.mubr.msk.bf16.vlgmr.msra.gmra.mxu0 %vm135_vm3, %v326_v20  ;;  %v465_v20 = vrot.slane %v5239_v9, 6 }
  0x43   :  { %4320 = vmatpush3.bf16.msra.mxu0 %v5232_v5  ;;  %4321 = vmatprep.mubr.msk.bf16.mxu0 %vm5153_vm0, %v5152_v1 }
  0x44   :  { %4331 = vmatprep.subr.bf16.mxu0 %v5152_v1  ;;  %4316 = vmatmul.mubr.msk.bf16.vlgmr.msra.gmra.mxu1 %vm135_vm3, %v373_v18  ;;  %v466_v21 = vsel %vm132_vm2, %v465_v20, %v464_v19 }
  0x45   :  { %4326 = vmatpush3.bf16.msra.mxu1 %v5232_v5  ;;  %4327 = vmatprep.mubr.msk.bf16.mxu1 %vm5153_vm0, %v5152_v1  ;;  %v467_v22 = vpack.c.b16 %v466_v21, %v466_v21 }
  0x46   :  { %4339 = vmatprep.subr.bf16.mxu1 %v5152_v1 }
  0x4a   :  { %4322 = vmatmul.mubr.msk.bf16.vlgmr.msra.gmra.mxu0 %vm135_vm3, %v420_v24 }
  0x4b   :  { %4332 = vmatpush3.bf16.msra.mxu0 %v5272_v25  ;;  %4335 = vmatprep.mubr.msk.bf16.mxu0 %vm5153_vm0, %v5152_v1 }
  0x4c   :  { %4333 = vmatprep.subr.bf16.mxu0 %v5152_v1  ;;  %4328 = vmatmul.mubr.msk.bf16.vlgmr.msra.gmra.mxu1 %vm135_vm3, %v467_v22 }
  0x4d   :  { %4340 = vmatpush3.bf16.msra.mxu1 %v5272_v25  ;;  %4343 = vmatprep.mubr.msk.bf16.mxu1 %vm5153_vm0, %v5152_v1 }
  0x4e   :  { %4341 = vmatprep.subr.bf16.mxu1 %v5152_v1 }
  0x4f   :  { %4334 = vmatpush3.bf16.msra.mxu0 %v5279_v26 }
  0x50   :  { %4347 = vmatprep.subr.bf16.mxu0 %v5152_v1 }
  0x51   :  { %4342 = vmatpush3.bf16.msra.mxu1 %v5279_v26 }
  0x52   :  { %4336 = vmatmul.mubr.bf16.vlgmr.msra.gmra.mxu0 %v5154_v27  ;;  %4355 = vmatprep.subr.bf16.mxu1 %v5152_v1 }
  0x53   :  { %4351 = vmatprep.mubr.msk.bf16.mxu0 %vm5153_vm0, %v5152_v1  ;;  %4348 = vmatpush3.bf16.msra.mxu0 %v5310_v3 }
  0x54   :  { %4349 = vmatprep.subr.bf16.mxu0 %v5152_v1 }
  0x57   :  { %4350 = vmatpush3.bf16.msra.mxu0 %v5318_v11 }
  0x58   :  { %4363 = vmatprep.subr.bf16.mxu0 %v5152_v1 }
  0xf2   :  { %v177_v28 = vpop.f32.mrf.mxu0 }
  0xf3   :  { %v178_v49 = vadd.f32 %v177_v28, %v5301_v46 }
  0xf4   :  { %v4287_v29 = vpop.f32.mrf.mxu0  ;;  %v223_v23 = vpop.f32.mrf.mxu1 }
  0xf6   :  { %v180_v30 = vpop.f32.mrf.mxu0  ;;  %v4293_v24 = vpop.f32.mrf.mxu1 }
  0xf8   :  { %v4288_v31 = vpop.f32.mrf.mxu0  ;;  %v226_v28 = vpop.f32.mrf.mxu1 }
  0xfa   :  { %v5289_v32 = vpop.f32.mrf.mxu0  ;;  %v4294_v29 = vpop.f32.mrf.mxu1 }
  0xfc   :  { %v4299_v33 = vpop.f32.mrf.mxu0  ;;  %v5353_v30 = vpop.f32.mrf.mxu1 }
  0xfe   :  { %v273_v34 = vpop.f32.mrf.mxu0  ;;  %v4305_v31 = vpop.f32.mrf.mxu1 }
 0x100   :  { %v4300_v35 = vpop.f32.mrf.mxu0  ;;  %v320_v33 = vpop.f32.mrf.mxu1 }
 0x102   :  { %v5291_v37 = vpop.f32.mrf.mxu0  ;;  %v4306_v34 = vpop.f32.mrf.mxu1 }
 0x104   :  { %v4311_v38 = vpop.f32.mrf.mxu0  ;;  %v5355_v35 = vpop.f32.mrf.mxu1 }
 0x106   :  { %v367_v40 = vpop.f32.mrf.mxu0  ;;  %v4317_v36 = vpop.f32.mrf.mxu1 }
 0x108   :  { %v4312_v41 = vpop.f32.mrf.mxu0  ;;  %v414_v38 = vpop.f32.mrf.mxu1 }
 0x10a   :  { %v5298_v44 = vpop.f32.mrf.mxu0  ;;  %v4318_v40 = vpop.f32.mrf.mxu1 }
 0x10c   :  { %v4323_v45 = vpop.f32.mrf.mxu0  ;;  %v5357_v41 = vpop.f32.mrf.mxu1 }
 0x10e   :  { %v461_v47 = vpop.f32.mrf.mxu0  ;;  %v4329_v42 = vpop.f32.mrf.mxu1 }
 0x110   :  { %v4324_v48 = vpop.f32.mrf.mxu0  ;;  %v508_v45 = vpop.f32.mrf.mxu1 }
 0x111   :  { %v5362_v48 = vld [vmem:[%s6151_s3 + $0x18] sm:$0xff]  }
 0x112   :  { %v561_v50 = vpop.f32.mrf.mxu0  ;;  %v4330_v47 = vpop.f32.mrf.mxu1 }
 0x113   :  { %v562_v51 = vadd.f32 %v561_v50, %v178_v49  ;;  %v5370_v50 = vld [vmem:[%s6151_s3 + $0x10] sm:$0xff]  }
 0x114   :  { %v4337_v52 = vpop.f32.mrf.mxu0 }
 0x115   :  { %4813 = vtanh.f32 %v562_v51  ;;  %v3994_v56 = vmul.f32 -1.442695, %v562_v51  ;;  %v224_v51 = vadd.f32 %v223_v23, %v5301_v46 }
 0x116   :  { %v564_v53 = vpop.f32.mrf.mxu0 }
 0x117   :  { %4815 = vpow2.f32 %v3994_v56 }
 0x118   :  { %v4338_v54 = vpop.f32.mrf.mxu0 }
 0x122   :  { %v4814_v55 = vpop.eup %4813 }
 0x123   :  { %576 = vrot.lane.b32.xlu0 %v4814_v55, %s5148_s14 }
 0x124   :  { %v4816_v57 = vpop.eup %4815 }
 0x125   :  { %v570_v58 = vadd.f32 1.0, %v4816_v57  ;;  %v113_v57 = vsub.s32 1, %v5293_v39 }
 0x127   :  { %4817 = vrcp.f32 %v570_v58 }
 0x134   :  { %v4818_v59 = vpop.eup %4817 }
 0x135   :  { %v574_v62 = vmul.f32 0.0, %v4818_v59 }
 0x195   :  { %v577_v60 = vpop.permute.xlu0 %576 }
 0x196   :  { %v579_v61 = vmul.f32 %v4818_v59, %v577_v60 }
 0x198   :  { %581 = vrot.lane.b32.xlu0 %v579_v61, %s5155_s10 }
 0x20a   :  { %v582_v63 = vpop.permute.xlu0 %581 }
 0x20b   :  { %v5306_v0 = vadd.f32 %v582_v63, %v574_v62  ;;  %v5393_v62 = vrot.slane %v5296_v43, %v113_v57 }
 0x20d   :  { %4819 = vtanh.f32 %v5306_v0 }
 0x21a   :  { %v4820_v13 = vpop.eup %4819 }
 0x21b   :  { %587 = vrot.lane.b32.xlu1 %v4820_v13, %s5148_s14 }
 0x28d   :  { %v588_v5 = vpop.permute.xlu1 %587 }
 0x28e   :  { %v590_v8 = vmul.f32 %v4818_v59, %v588_v5 }
 0x290   :  { %v591_v9 = vpack.c.bf16 %v590_v8, %v590_v8 }
 0x292   :  { %593 = vrot.lane.b32.xlu1 %v591_v9, %s5155_s10 }
 0x304   :  { %v594_v49 = vpop.permute.xlu1 %593 }
 0x305   :  { %4344 = vmatmul.mubr.msk.bf16.vlgmr.msra.gmra.mxu1 %vm523_vm4, %v594_v49  ;;  %4352 = vmatmul.mubr.msk.bf16.vlgmr.msra.gmra.mxu0 %vm523_vm4, %v594_v49  ;;  %v5411_v49 = vld [vmem:[#allocation5 + $0x18] sm:$0xff]  }
 0x306   :  { %4356 = vmatpush3.bf16.msra.mxu1 %v5362_v48  ;;  %4359 = vmatprep.mubr.msk.bf16.mxu1 %vm5153_vm0, %v5152_v1 }
 0x307   :  { %4357 = vmatprep.subr.bf16.mxu1 %v5152_v1  ;;  %4364 = vmatpush3.bf16.msra.mxu0 %v5272_v25 }
 0x308   :  { %4365 = vmatprep.subr.bf16.mxu0 %v5152_v1  ;;  %4367 = vmatprep.mubr.msk.bf16.mxu0 %vm5153_vm0, %v5152_v1 }
 0x30a   :  { %4358 = vmatpush3.bf16.msra.mxu1 %v5370_v50 }
 0x30b   :  { %4371 = vmatprep.subr.bf16.mxu1 %v5152_v1  ;;  %4366 = vmatpush3.bf16.msra.mxu0 %v5279_v26 }
 0x30c   :  { %4379 = vmatprep.subr.bf16.mxu0 %v5152_v1 }
 0x30d   :  { %4360 = vmatmul.mubr.bf16.vlgmr.msra.gmra.mxu1 %v5154_v27 }
 0x30e   :  { %4372 = vmatpush3.bf16.msra.mxu1 %v5310_v3  ;;  %4375 = vmatprep.mubr.msk.bf16.mxu1 %vm5153_vm0, %v5152_v1 }
 0x30f   :  { %4373 = vmatprep.subr.bf16.mxu1 %v5152_v1 }
 0x312   :  { %4374 = vmatpush3.bf16.msra.mxu1 %v5318_v11 }
 0x313   :  { %4387 = vmatprep.subr.bf16.mxu1 %v5152_v1 }
 0x3c5   :  { %v632_v52 = vpop.f32.mrf.mxu1  ;;  %v708_v53 = vpop.f32.mrf.mxu0 }
 0x3c6   :  { %v633_v54 = vadd.f32 %v632_v52, %v224_v51  ;;  %v5417_v52 = vld [vmem:[#allocation5 + $0x10] sm:$0xff]  }
 0x3c7   :  { %v4345_v55 = vpop.f32.mrf.mxu1  ;;  %v4353_v56 = vpop.f32.mrf.mxu0 }
 0x3c8   :  { %4821 = vtanh.f32 %v633_v54  ;;  %v3996_v14 = vmul.f32 -1.442695, %v633_v54  ;;  %v5440_v55 = vld [vmem:[%s6151_s3 + $0x20] sm:$0xff]   ;;  %v271_v56 = vadd.f32 %v5289_v32, %v5301_v46 }
 0x3c9   :  { %v635_v58 = vpop.f32.mrf.mxu1  ;;  %v711_v59 = vpop.f32.mrf.mxu0 }
 0x3cb   :  { %v4346_v60 = vpop.f32.mrf.mxu1  ;;  %v4354_v61 = vpop.f32.mrf.mxu0 }
 0x3cd   :  { %v760_v63 = vpop.f32.mrf.mxu1 }
 0x3ce   :  { %v761_v2 = vadd.f32 %v760_v63, %v708_v53  ;;  %v5432_v53 = vld [vmem:[%s6151_s3 + $0x28] sm:$0xff]  }
 0x3cf   :  { %v4361_v4 = vpop.f32.mrf.mxu1 }
 0x3d0   :  { %v766_v6 = vadd.f32 %v761_v2, %v5393_v62 }
 0x3d1   :  { %v763_v7 = vpop.f32.mrf.mxu1 }
 0x3d2   :  { %4823 = vtanh.f32 %v766_v6  ;;  %v4002_v15 = vmul.f32 -1.442695, %v766_v6 }
 0x3d3   :  { %v4362_v10 = vpop.f32.mrf.mxu1  ;;  %4825 = vpow2.f32 %v3996_v14 }
 0x3d4   :  { %4827 = vpow2.f32 %v4002_v15 }
 0x3d5   :  { %v4822_v12 = vpop.eup %4821 }
 0x3d6   :  { %647 = vrot.lane.b32.xlu0 %v4822_v12, %s5148_s14 }
 0x3df   :  { %v4824_v13 = vpop.eup %4823 }
 0x3e0   :  { %776 = vrot.lane.b32.xlu1 %v4824_v13, %s5148_s14  ;;  %v4826_v16 = vpop.eup %4825 }
 0x3e1   :  { %v641_v17 = vadd.f32 1.0, %v4826_v16  ;;  %v4828_v18 = vpop.eup %4827  ;;  %v117_v16 = vsub.s32 2, %v5293_v39 }
 0x3e2   :  { %v770_v19 = vadd.f32 1.0, %v4828_v18 }
 0x3e3   :  { %4829 = vrcp.f32 %v641_v17 }
 0x3e4   :  { %4831 = vrcp.f32 %v770_v19 }
 0x3f0   :  { %v4830_v20 = vpop.eup %4829 }
 0x3f1   :  { %v4832_v5 = vpop.eup %4831  ;;  %v645_v23 = vmul.f32 %v4830_v20, %v5306_v0 }
 0x3f2   :  { %v774_v29 = vmul.f32 0.0, %v4832_v5 }
 0x448   :  { %v648_v21 = vpop.permute.xlu0 %647 }
 0x449   :  { %v650_v22 = vmul.f32 %v4830_v20, %v648_v21  ;;  %v5466_v21 = vrot.slane %v5296_v43, %v117_v16 }
 0x44b   :  { %652 = vrot.lane.b32.xlu0 %v650_v22, %s5155_s10 }
 0x452   :  { %v777_v8 = vpop.permute.xlu1 %776 }
 0x453   :  { %v779_v9 = vmul.f32 %v4832_v5, %v777_v8 }
 0x455   :  { %781 = vrot.lane.b32.xlu1 %v779_v9, %s5155_s10 }
 0x4bd   :  { %v653_v24 = vpop.permute.xlu0 %652 }
 0x4be   :  { %v5401_v28 = vadd.f32 %v653_v24, %v645_v23 }
 0x4c0   :  { %4833 = vtanh.f32 %v5401_v28 }
 0x4c7   :  { %v782_v31 = vpop.permute.xlu1 %781 }
 0x4c8   :  { %v5404_v33 = vadd.f32 %v782_v31, %v774_v29 }
 0x4ca   :  { %4835 = vtanh.f32 %v5404_v33 }
 0x4cd   :  { %v4834_v34 = vpop.eup %4833 }
 0x4ce   :  { %658 = vrot.lane.b32.xlu0 %v4834_v34, %s5148_s14 }
 0x4d7   :  { %v4836_v36 = vpop.eup %4835 }
 0x4d8   :  { %787 = vrot.lane.b32.xlu1 %v4836_v36, %s5148_s14 }
 0x540   :  { %v659_v38 = vpop.permute.xlu0 %658 }
 0x541   :  { %v661_v40 = vmul.f32 %v4830_v20, %v659_v38 }
 0x543   :  { %v791_v0 = vpack.c.bf16 %v661_v40, %v661_v40 }
 0x545   :  { %793 = vrot.lane.b32.xlu0 %v791_v0, %s5155_s10 }
 0x54a   :  { %v788_v42 = vpop.permute.xlu1 %787 }
 0x54b   :  { %v790_v45 = vmul.f32 %v4832_v5, %v788_v42 }
 0x54d   :  { %v862_v47 = vpack.c.bf16 %v790_v45, %v790_v45 }
 0x54f   :  { %904 = vrot.lane.b32.xlu1 %v862_v47, %s5155_s10 }
 0x5b7   :  { %v794_v51 = vpop.permute.xlu0 %793 }
 0x5b8   :  { %4368 = vmatmul.mubr.msk.bf16.vlgmr.msra.gmra.mxu0 %vm523_vm4, %v794_v51  ;;  %4376 = vmatmul.mubr.msk.bf16.vlgmr.msra.gmra.mxu1 %vm523_vm4, %v794_v51 }
 0x5b9   :  { %4380 = vmatpush3.bf16.msra.mxu0 %v5362_v48  ;;  %4388 = vmatpush3.bf16.msra.mxu1 %v5411_v49 }
 0x5ba   :  { %4381 = vmatprep.subr.bf16.mxu0 %v5152_v1  ;;  %4389 = vmatprep.subr.bf16.mxu1 %v5152_v1 }
 0x5bb   :  { %4383 = vmatprep.mubr.msk.bf16.mxu0 %vm5153_vm0, %v5152_v1  ;;  %4391 = vmatprep.mubr.msk.bf16.mxu1 %vm5153_vm0, %v5152_v1 }
 0x5bd   :  { %4382 = vmatpush3.bf16.msra.mxu0 %v5370_v50  ;;  %4390 = vmatpush3.bf16.msra.mxu1 %v5417_v52 }
 0x5be   :  { %4395 = vmatprep.subr.bf16.mxu0 %v5152_v1  ;;  %4403 = vmatprep.subr.bf16.mxu1 %v5152_v1 }
 0x5c1   :  { %v905_v54 = vpop.permute.xlu1 %904 }
 0x5c2   :  { %4384 = vmatmul.mubr.msk.bf16.vlgmr.msra.gmra.mxu0 %vm523_vm4, %v905_v54  ;;  %4392 = vmatmul.mubr.msk.bf16.vlgmr.msra.gmra.mxu1 %vm523_vm4, %v905_v54 }
 0x5c3   :  { %4396 = vmatpush3.bf16.msra.mxu0 %v5432_v53  ;;  %4399 = vmatprep.mubr.msk.bf16.mxu0 %vm5153_vm0, %v5152_v1 }
 0x5c4   :  { %4397 = vmatprep.subr.bf16.mxu0 %v5152_v1  ;;  %4404 = vmatpush3.bf16.msra.mxu1 %v5272_v25 }
 0x5c5   :  { %4405 = vmatprep.subr.bf16.mxu1 %v5152_v1  ;;  %4407 = vmatprep.mubr.msk.bf16.mxu1 %vm5153_vm0, %v5152_v1 }
 0x5c7   :  { %4398 = vmatpush3.bf16.msra.mxu0 %v5440_v55 }
 0x5c8   :  { %4411 = vmatprep.subr.bf16.mxu0 %v5152_v1  ;;  %4406 = vmatpush3.bf16.msra.mxu1 %v5279_v26 }
 0x5c9   :  { %4419 = vmatprep.subr.bf16.mxu1 %v5152_v1 }
 0x5ca   :  { %4400 = vmatmul.mubr.bf16.vlgmr.msra.gmra.mxu0 %v5154_v27 }
 0x5cb   :  { %4412 = vmatpush3.bf16.msra.mxu0 %v5310_v3  ;;  %4415 = vmatprep.mubr.msk.bf16.mxu0 %vm5153_vm0, %v5152_v1 }
 0x5cc   :  { %4413 = vmatprep.subr.bf16.mxu0 %v5152_v1 }
 0x5cf   :  { %4414 = vmatpush3.bf16.msra.mxu0 %v5318_v11 }
 0x5d0   :  { %4427 = vmatprep.subr.bf16.mxu0 %v5152_v1 }
 0x678   :  { %v832_v57 = vpop.f32.mrf.mxu0  ;;  %v897_v58 = vpop.f32.mrf.mxu1 }
 0x679   :  { %v833_v59 = vadd.f32 %v832_v57, %v271_v56 }
 0x67a   :  { %v4369_v60 = vpop.f32.mrf.mxu0  ;;  %v4377_v61 = vpop.f32.mrf.mxu1 }
 0x67b   :  { %4837 = vtanh.f32 %v833_v59  ;;  %v4004_v34 = vmul.f32 -1.442695, %v833_v59 }
 0x67c   :  { %v835_v63 = vpop.f32.mrf.mxu0  ;;  %v900_v2 = vpop.f32.mrf.mxu1 }
 0x67e   :  { %v4370_v4 = vpop.f32.mrf.mxu0  ;;  %v4378_v6 = vpop.f32.mrf.mxu1 }
 0x682   :  { %v943_v7 = vpop.f32.mrf.mxu0  ;;  %v1020_v10 = vpop.f32.mrf.mxu1 }
 0x683   :  { %v944_v12 = vadd.f32 %v943_v7, %v897_v58 }
 0x684   :  { %v4385_v13 = vpop.f32.mrf.mxu0  ;;  %v4393_v14 = vpop.f32.mrf.mxu1 }
 0x685   :  { %v949_v15 = vadd.f32 %v944_v12, %v5393_v62 }
 0x686   :  { %v946_v32 = vpop.f32.mrf.mxu0  ;;  %v1023_v17 = vpop.f32.mrf.mxu1 }
 0x687   :  { %4839 = vtanh.f32 %v949_v15  ;;  %v4007_v36 = vmul.f32 -1.442695, %v949_v15 }
 0x688   :  { %v4838_v18 = vpop.eup %4837  ;;  %v4386_v19 = vpop.f32.mrf.mxu0 }
 0x689   :  { %v4394_v20 = vpop.f32.mrf.mxu1  ;;  %847 = vrot.lane.b32.xlu0 %v4838_v18, %s5148_s14 }
 0x68a   :  { %v1072_v22 = vpop.f32.mrf.mxu0 }
 0x68b   :  { %v1073_v5 = vadd.f32 %v1072_v22, %v1020_v10 }
 0x68c   :  { %v4401_v8 = vpop.f32.mrf.mxu0 }
 0x68d   :  { %v1078_v9 = vadd.f32 %v1073_v5, %v5466_v21 }
 0x68e   :  { %v1075_v23 = vpop.f32.mrf.mxu0 }
 0x68f   :  { %4841 = vtanh.f32 %v1078_v9  ;;  %v4013_v0 = vmul.f32 -1.442695, %v1078_v9 }
 0x690   :  { %v4402_v24 = vpop.f32.mrf.mxu0  ;;  %4843 = vpow2.f32 %v4004_v34  ;;  %v5511_v34 = vld [vmem:[#allocation5 + $0x20] sm:$0xff]  }
 0x691   :  { %4845 = vpow2.f32 %v4007_v36  ;;  %v5524_v36 = vld [vmem:[%s6151_s3 + $0x38] sm:$0xff]  }
 0x694   :  { %v4840_v29 = vpop.eup %4839 }
 0x695   :  { %959 = vrot.lane.b32.xlu1 %v4840_v29, %s5148_s14  ;;  %v5505_v29 = vld [vmem:[#allocation5 + $0x28] sm:$0xff]  }
 0x69c   :  { %v4842_v31 = vpop.eup %4841 }
 0x69d   :  { %1088 = vrot.lane.b32.xlu0 %v4842_v31, %s5148_s14  ;;  %v4844_v38 = vpop.eup %4843 }
 0x69e   :  { %v841_v40 = vadd.f32 1.0, %v4844_v38  ;;  %v4846_v42 = vpop.eup %4845 }
 0x69f   :  { %v953_v45 = vadd.f32 1.0, %v4846_v42 }
 0x6a0   :  { %4847 = vrcp.f32 %v841_v40  ;;  %v5534_v40 = vld [vmem:[%s6151_s3 + $0x30] sm:$0xff]  }
 0x6a1   :  { %4849 = vpow2.f32 %v4013_v0 }
 0x6a2   :  { %4851 = vrcp.f32 %v953_v45 }
 0x6ad   :  { %v4848_v47 = vpop.eup %4847 }
 0x6ae   :  { %v4850_v51 = vpop.eup %4849  ;;  %v845_v4 = vmul.f32 %v4848_v47, %v5401_v28 }
 0x6af   :  { %v1082_v57 = vadd.f32 1.0, %v4850_v51  ;;  %v4852_v58 = vpop.eup %4851 }
 0x6b0   :  { %v957_v10 = vmul.f32 %v4852_v58, %v5404_v33 }
 0x6b1   :  { %4853 = vrcp.f32 %v1082_v57 }
 0x6be   :  { %v4854_v61 = vpop.eup %4853 }
 0x6bf   :  { %v1086_v15 = vmul.f32 0.0, %v4854_v61 }
 0x6fb   :  { %v848_v54 = vpop.permute.xlu0 %847 }
 0x6fc   :  { %v850_v56 = vmul.f32 %v4848_v47, %v848_v54 }
 0x6fe   :  { %852 = vrot.lane.b32.xlu1 %v850_v56, %s5155_s10 }
 0x707   :  { %v960_v59 = vpop.permute.xlu1 %959 }
 0x708   :  { %v962_v60 = vmul.f32 %v4852_v58, %v960_v59 }
 0x70a   :  { %964 = vrot.lane.b32.xlu0 %v962_v60, %s5155_s10 }
 0x70f   :  { %v1089_v63 = vpop.permute.xlu0 %1088 }
 0x710   :  { %v1091_v2 = vmul.f32 %v4854_v61, %v1089_v63 }
 0x712   :  { %1093 = vrot.lane.b32.xlu1 %v1091_v2, %s5155_s10 }
 0x770   :  { %v853_v6 = vpop.permute.xlu1 %852 }
 0x771   :  { %v5475_v7 = vadd.f32 %v853_v6, %v845_v4 }
 0x773   :  { %4855 = vtanh.f32 %v5475_v7 }
 0x77c   :  { %v965_v12 = vpop.permute.xlu0 %964 }
 0x77d   :  { %v5479_v13 = vadd.f32 %v965_v12, %v957_v10 }
 0x77f   :  { %4857 = vtanh.f32 %v5479_v13 }
 0x780   :  { %v4856_v14 = vpop.eup %4855 }
 0x781   :  { %858 = vrot.lane.b32.xlu0 %v4856_v14, %s5148_s14 }
 0x784   :  { %v1094_v16 = vpop.permute.xlu1 %1093 }
 0x785   :  { %v5483_v32 = vadd.f32 %v1094_v16, %v1086_v15 }
 0x787   :  { %4859 = vtanh.f32 %v5483_v32 }
 0x78c   :  { %v4858_v28 = vpop.eup %4857 }
 0x78d   :  { %970 = vrot.lane.b32.xlu1 %v4858_v28, %s5148_s14 }
 0x794   :  { %v4860_v17 = vpop.eup %4859 }
 0x795   :  { %1099 = vrot.lane.b32.xlu0 %v4860_v17, %s5148_s14 }
 0x7f3   :  { %v859_v33 = vpop.permute.xlu0 %858 }
 0x7f4   :  { %v861_v18 = vmul.f32 %v4848_v47, %v859_v33  ;;  %v121_v33 = vsub.s32 3, %v5293_v39 }
 0x7f6   :  { %v1103_v19 = vpack.c.bf16 %v861_v18, %v861_v18 }
 0x7f8   :  { %1105 = vrot.lane.b32.xlu1 %v1103_v19, %s5155_s10 }
 0x7ff   :  { %v971_v20 = vpop.permute.xlu1 %970 }
 0x800   :  { %v973_v22 = vmul.f32 %v4852_v58, %v971_v20 }
 0x802   :  { %v1174_v5 = vpack.c.bf16 %v973_v22, %v973_v22 }
 0x804   :  { %1216 = vrot.lane.b32.xlu0 %v1174_v5, %s5155_s10  ;;  %v5561_v5 = vrot.slane %v5296_v43, %v121_v33 }
 0x807   :  { %v1100_v8 = vpop.permute.xlu0 %1099 }
 0x808   :  { %v1102_v9 = vmul.f32 %v4854_v61, %v1100_v8 }
 0x80a   :  { %v1286_v23 = vpack.c.bf16 %v1102_v9, %v1102_v9 }
 0x80c   :  { %1328 = vrot.lane.b32.xlu1 %v1286_v23, %s5155_s10 }
 0x86a   :  { %v1106_v24 = vpop.permute.xlu1 %1105 }
 0x86b   :  { %4408 = vmatmul.mubr.msk.bf16.vlgmr.msra.gmra.mxu1 %vm523_vm4, %v1106_v24  ;;  %4416 = vmatmul.mubr.msk.bf16.vlgmr.msra.gmra.mxu0 %vm523_vm4, %v1106_v24 }
 0x86c   :  { %4420 = vmatpush3.bf16.msra.mxu1 %v5362_v48  ;;  %4428 = vmatpush3.bf16.msra.mxu0 %v5411_v49 }
 0x86d   :  { %4421 = vmatprep.subr.bf16.mxu1 %v5152_v1  ;;  %4429 = vmatprep.subr.bf16.mxu0 %v5152_v1 }
 0x86e   :  { %4423 = vmatprep.mubr.msk.bf16.mxu1 %vm5153_vm0, %v5152_v1  ;;  %4431 = vmatprep.mubr.msk.bf16.mxu0 %vm5153_vm0, %v5152_v1 }
 0x870   :  { %4422 = vmatpush3.bf16.msra.mxu1 %v5370_v50  ;;  %4430 = vmatpush3.bf16.msra.mxu0 %v5417_v52 }
 0x871   :  { %4435 = vmatprep.subr.bf16.mxu1 %v5152_v1  ;;  %4443 = vmatprep.subr.bf16.mxu0 %v5152_v1 }
 0x876   :  { %v1217_v31 = vpop.permute.xlu0 %1216 }
 0x877   :  { %4424 = vmatmul.mubr.msk.bf16.vlgmr.msra.gmra.mxu1 %vm523_vm4, %v1217_v31  ;;  %4432 = vmatmul.mubr.msk.bf16.vlgmr.msra.gmra.mxu0 %vm523_vm4, %v1217_v31 }
 0x878   :  { %4436 = vmatpush3.bf16.msra.mxu1 %v5432_v53  ;;  %4444 = vmatpush3.bf16.msra.mxu0 %v5505_v29 }
 0x879   :  { %4437 = vmatprep.subr.bf16.mxu1 %v5152_v1  ;;  %4445 = vmatprep.subr.bf16.mxu0 %v5152_v1 }
 0x87a   :  { %4439 = vmatprep.mubr.msk.bf16.mxu1 %vm5153_vm0, %v5152_v1  ;;  %4447 = vmatprep.mubr.msk.bf16.mxu0 %vm5153_vm0, %v5152_v1 }
 0x87c   :  { %4438 = vmatpush3.bf16.msra.mxu1 %v5440_v55  ;;  %4446 = vmatpush3.bf16.msra.mxu0 %v5511_v34 }
 0x87d   :  { %4451 = vmatprep.subr.bf16.mxu1 %v5152_v1  ;;  %4459 = vmatprep.subr.bf16.mxu0 %v5152_v1 }
 0x87e   :  { %v1329_v38 = vpop.permute.xlu1 %1328 }
 0x87f   :  { %4440 = vmatmul.mubr.msk.bf16.vlgmr.msra.gmra.mxu1 %vm523_vm4, %v1329_v38  ;;  %4448 = vmatmul.mubr.msk.bf16.vlgmr.msra.gmra.mxu0 %vm523_vm4, %v1329_v38 }
 0x880   :  { %4452 = vmatpush3.bf16.msra.mxu1 %v5524_v36  ;;  %4455 = vmatprep.mubr.msk.bf16.mxu1 %vm5153_vm0, %v5152_v1 }
 0x881   :  { %4453 = vmatprep.subr.bf16.mxu1 %v5152_v1  ;;  %4460 = vmatpush3.bf16.msra.mxu0 %v5272_v25  ;;  %v318_v25 = vadd.f32 %v5353_v30, %v5301_v46 }
 0x882   :  { %4461 = vmatprep.subr.bf16.mxu0 %v5152_v1  ;;  %4463 = vmatprep.mubr.msk.bf16.mxu0 %vm5153_vm0, %v5152_v1 }
 0x884   :  { %4454 = vmatpush3.bf16.msra.mxu1 %v5534_v40 }
 0x885   :  { %4467 = vmatprep.subr.bf16.mxu1 %v5152_v1  ;;  %4462 = vmatpush3.bf16.msra.mxu0 %v5279_v26 }
 0x886   :  { %4475 = vmatprep.subr.bf16.mxu0 %v5152_v1 }
 0x887   :  { %4456 = vmatmul.mubr.bf16.vlgmr.msra.gmra.mxu1 %v5154_v27 }
 0x888   :  { %4468 = vmatpush3.bf16.msra.mxu1 %v5310_v3  ;;  %4471 = vmatprep.mubr.msk.bf16.mxu1 %vm5153_vm0, %v5152_v1 }
 0x889   :  { %4469 = vmatprep.subr.bf16.mxu1 %v5152_v1 }
 0x88c   :  { %4470 = vmatpush3.bf16.msra.mxu1 %v5318_v11 }
 0x88d   :  { %4483 = vmatprep.subr.bf16.mxu1 %v5152_v1 }
 0x92b   :  { %v1144_v0 = vpop.f32.mrf.mxu1  ;;  %v1209_v26 = vpop.f32.mrf.mxu0 }
 0x92c   :  { %v1145_v42 = vadd.f32 %v1144_v0, %v318_v25 }
 0x92d   :  { %v4409_v45 = vpop.f32.mrf.mxu1  ;;  %v4417_v47 = vpop.f32.mrf.mxu0 }
 0x92e   :  { %4861 = vtanh.f32 %v1145_v42 }
 0x92f   :  { %v1147_v27 = vpop.f32.mrf.mxu1  ;;  %v1212_v51 = vpop.f32.mrf.mxu0 }
 0x931   :  { %v4410_v54 = vpop.f32.mrf.mxu1  ;;  %v4418_v56 = vpop.f32.mrf.mxu0 }
 0x937   :  { %v1255_v57 = vpop.f32.mrf.mxu1  ;;  %v1321_v58 = vpop.f32.mrf.mxu0 }
 0x938   :  { %v1256_v59 = vadd.f32 %v1255_v57, %v1209_v26  ;;  %v4015_v26 = vmul.f32 -1.442695, %v1145_v42 }
 0x939   :  { %v4425_v60 = vpop.f32.mrf.mxu1  ;;  %v4433_v61 = vpop.f32.mrf.mxu0 }
 0x93a   :  { %v1261_v63 = vadd.f32 %v1256_v59, %v5393_v62 }
 0x93b   :  { %v4862_v2 = vpop.eup %4861  ;;  %v1258_v4 = vpop.f32.mrf.mxu1 }
 0x93c   :  { %v1324_v30 = vpop.f32.mrf.mxu0  ;;  %4863 = vtanh.f32 %v1261_v63  ;;  %1159 = vrot.lane.b32.xlu0 %v4862_v2, %s5148_s14  ;;  %v4018_v43 = vmul.f32 -1.442695, %v1261_v63 }
 0x93d   :  { %v4426_v6 = vpop.f32.mrf.mxu1 }
 0x93e   :  { %v4434_v10 = vpop.f32.mrf.mxu0 }
 0x93f   :  { %v1367_v12 = vpop.f32.mrf.mxu1 }
 0x940   :  { %v1444_v14 = vpop.f32.mrf.mxu0  ;;  %v1368_v15 = vadd.f32 %v1367_v12, %v1321_v58 }
 0x941   :  { %v4441_v16 = vpop.f32.mrf.mxu1 }
 0x942   :  { %v4449_v28 = vpop.f32.mrf.mxu0  ;;  %v1373_v17 = vadd.f32 %v1368_v15, %v5466_v21 }
 0x943   :  { %v1370_v18 = vpop.f32.mrf.mxu1 }
 0x944   :  { %v1447_v19 = vpop.f32.mrf.mxu0  ;;  %4865 = vtanh.f32 %v1373_v17  ;;  %v4021_v27 = vmul.f32 -1.442695, %v1373_v17 }
 0x945   :  { %v4442_v20 = vpop.f32.mrf.mxu1 }
 0x946   :  { %v4450_v22 = vpop.f32.mrf.mxu0 }
 0x947   :  { %v1496_v8 = vpop.f32.mrf.mxu1 }
 0x948   :  { %v1497_v9 = vadd.f32 %v1496_v8, %v1444_v14 }
 0x949   :  { %v4864_v23 = vpop.eup %4863  ;;  %v4457_v24 = vpop.f32.mrf.mxu1 }
 0x94a   :  { %v1502_v31 = vadd.f32 %v1497_v9, %v5561_v5  ;;  %1271 = vrot.lane.b32.xlu1 %v4864_v23, %s5148_s14 }
 0x94b   :  { %v1499_v38 = vpop.f32.mrf.mxu1 }
 0x94c   :  { %4867 = vtanh.f32 %v1502_v31  ;;  %v4027_v51 = vmul.f32 -1.442695, %v1502_v31 }
 0x94d   :  { %v4458_v25 = vpop.f32.mrf.mxu1  ;;  %4869 = vpow2.f32 %v4015_v26 }
 0x94e   :  { %4871 = vpow2.f32 %v4018_v43 }
 0x951   :  { %v4866_v39 = vpop.eup %4865 }
 0x952   :  { %1383 = vrot.lane.b32.xlu0 %v4866_v39, %s5148_s14 }
 0x959   :  { %v4868_v0 = vpop.eup %4867 }
 0x95a   :  { %1512 = vrot.lane.b32.xlu1 %v4868_v0, %s5148_s14  ;;  %v4870_v45 = vpop.eup %4869 }
 0x95b   :  { %v1153_v47 = vadd.f32 1.0, %v4870_v45  ;;  %v4872_v54 = vpop.eup %4871 }
 0x95c   :  { %v1265_v56 = vadd.f32 1.0, %v4872_v54 }
 0x95d   :  { %4873 = vrcp.f32 %v1153_v47 }
 0x95e   :  { %4875 = vpow2.f32 %v4021_v27 }
 0x95f   :  { %4877 = vpow2.f32 %v4027_v51 }
 0x960   :  { %4879 = vrcp.f32 %v1265_v56 }
 0x96a   :  { %v4874_v57 = vpop.eup %4873 }
 0x96b   :  { %v4876_v60 = vpop.eup %4875  ;;  %v1157_v28 = vmul.f32 %v4874_v57, %v5475_v7 }
 0x96c   :  { %v1377_v42 = vadd.f32 1.0, %v4876_v60  ;;  %v4878_v61 = vpop.eup %4877  ;;  %v5646_v60 = vld [vmem:[%s6151_s3] sm:$0xff]  }
 0x96d   :  { %v1506_v63 = vadd.f32 1.0, %v4878_v61  ;;  %v4880_v2 = vpop.eup %4879  ;;  %v365_v61 = vadd.f32 %v5291_v37, %v5301_v46 }
 0x96e   :  { %4881 = vrcp.f32 %v1377_v42  ;;  %v1269_v18 = vmul.f32 %v4880_v2, %v5479_v13 }
 0x96f   :  { %4883 = vrcp.f32 %v1506_v63 }
 0x97b   :  { %v4882_v6 = vpop.eup %4881 }
 0x97c   :  { %v4884_v14 = vpop.eup %4883  ;;  %v1381_v8 = vmul.f32 %v4882_v6, %v5483_v32 }
 0x97d   :  { %v1510_v7 = vmul.f32 0.0, %v4884_v14 }
 0x9ae   :  { %v1160_v58 = vpop.permute.xlu0 %1159 }
 0x9af   :  { %v1162_v59 = vmul.f32 %v4874_v57, %v1160_v58 }
 0x9b1   :  { %1164 = vrot.lane.b32.xlu0 %v1162_v59, %s5155_s10  ;;  %v5635_v59 = vld [vmem:[%s6151_s3 + $0x8] sm:$0xff]  }
 0x9bc   :  { %v1272_v4 = vpop.permute.xlu1 %1271 }
 0x9bd   :  { %v1274_v30 = vmul.f32 %v4880_v2, %v1272_v4 }
 0x9bf   :  { %1276 = vrot.lane.b32.xlu1 %v1274_v30, %s5155_s10 }
 0x9c4   :  { %v1384_v10 = vpop.permute.xlu0 %1383 }
 0x9c5   :  { %v1386_v12 = vmul.f32 %v4882_v6, %v1384_v10 }
 0x9c7   :  { %1388 = vrot.lane.b32.xlu0 %v1386_v12, %s5155_s10 }
 0x9cc   :  { %v1513_v15 = vpop.permute.xlu1 %1512 }
 0x9cd   :  { %v1515_v16 = vmul.f32 %v4884_v14, %v1513_v15 }
 0x9cf   :  { %1517 = vrot.lane.b32.xlu1 %v1515_v16, %s5155_s10 }
 0xa23   :  { %v1165_v17 = vpop.permute.xlu0 %1164 }
 0xa24   :  { %v5572_v33 = vadd.f32 %v1165_v17, %v1157_v28 }
 0xa26   :  { %4885 = vtanh.f32 %v5572_v33 }
 0xa31   :  { %v1277_v19 = vpop.permute.xlu1 %1276 }
 0xa32   :  { %v5576_v20 = vadd.f32 %v1277_v19, %v1269_v18 }
 0xa33   :  { %v4886_v22 = vpop.eup %4885 }
 0xa34   :  { %4887 = vtanh.f32 %v5576_v20  ;;  %1170 = vrot.lane.b32.xlu0 %v4886_v22, %s5148_s14 }
 0xa39   :  { %v1389_v9 = vpop.permute.xlu0 %1388 }
 0xa3a   :  { %v5581_v23 = vadd.f32 %v1389_v9, %v1381_v8 }
 0xa3c   :  { %4889 = vtanh.f32 %v5581_v23 }
 0xa41   :  { %v4888_v24 = vpop.eup %4887  ;;  %v1518_v31 = vpop.permute.xlu1 %1517 }
 0xa42   :  { %v5584_v38 = vadd.f32 %v1518_v31, %v1510_v7  ;;  %1282 = vrot.lane.b32.xlu1 %v4888_v24, %s5148_s14 }
 0xa44   :  { %4891 = vtanh.f32 %v5584_v38 }
 0xa49   :  { %v4890_v13 = vpop.eup %4889 }
 0xa4a   :  { %1394 = vrot.lane.b32.xlu0 %v4890_v13, %s5148_s14 }
 0xa51   :  { %v4892_v25 = vpop.eup %4891 }
 0xa52   :  { %1523 = vrot.lane.b32.xlu1 %v4892_v25, %s5148_s14 }
 0xaa6   :  { %v1171_v32 = vpop.permute.xlu0 %1170 }
 0xaa7   :  { %v1173_v39 = vmul.f32 %v4874_v57, %v1171_v32 }
 0xaa9   :  { %v1528_v0 = vpack.c.bf16 %v1173_v39, %v1173_v39 }
 0xaab   :  { %1530 = vrot.lane.b32.xlu0 %v1528_v0, %s5155_s10 }
 0xab4   :  { %v1283_v26 = vpop.permute.xlu1 %1282 }
 0xab5   :  { %v1285_v43 = vmul.f32 %v4880_v2, %v1283_v26 }
 0xab7   :  { %v1599_v45 = vpack.c.bf16 %v1285_v43, %v1285_v43 }
 0xab9   :  { %1641 = vrot.lane.b32.xlu1 %v1599_v45, %s5155_s10 }
 0xabc   :  { %v1395_v47 = vpop.permute.xlu0 %1394 }
 0xabd   :  { %v1397_v27 = vmul.f32 %v4882_v6, %v1395_v47 }
 0xabf   :  { %v1711_v51 = vpack.c.bf16 %v1397_v27, %v1397_v27 }
 0xac1   :  { %1753 = vrot.lane.b32.xlu0 %v1711_v51, %s5155_s10 }
 0xac4   :  { %v1524_v54 = vpop.permute.xlu1 %1523 }
 0xac5   :  { %v5593_v56 = vmul.f32 %v4884_v14, %v1524_v54 }
 0xac7   :  { %v1823_v58 = vpack.c.bf16 %v5593_v56, %v5593_v56 }
 0xac9   :  { %1865 = vrot.lane.b32.xlu1 %v1823_v58, %s5155_s10 }
 0xb1d   :  { %v1531_v57 = vpop.permute.xlu0 %1530 }
 0xb1e   :  { %4464 = vmatmul.mubr.msk.bf16.vlgmr.msra.gmra.mxu0 %vm523_vm4, %v1531_v57  ;;  %4472 = vmatmul.mubr.msk.bf16.vlgmr.msra.gmra.mxu1 %vm523_vm4, %v1531_v57 }
 0xb1f   :  { %4476 = vmatpush3.bf16.msra.mxu0 %v5362_v48  ;;  %4484 = vmatpush3.bf16.msra.mxu1 %v5411_v49 }
 0xb20   :  { %4477 = vmatprep.subr.bf16.mxu0 %v5152_v1  ;;  %4485 = vmatprep.subr.bf16.mxu1 %v5152_v1 }
 0xb21   :  { %4479 = vmatprep.mubr.msk.bf16.mxu0 %vm5153_vm0, %v5152_v1  ;;  %4487 = vmatprep.mubr.msk.bf16.mxu1 %vm5153_vm0, %v5152_v1 }
 0xb23   :  { %4478 = vmatpush3.bf16.msra.mxu0 %v5370_v50  ;;  %4486 = vmatpush3.bf16.msra.mxu1 %v5417_v52 }
 0xb24   :  { %4491 = vmatprep.subr.bf16.mxu0 %v5152_v1  ;;  %4499 = vmatprep.subr.bf16.mxu1 %v5152_v1 }
 0xb2b   :  { %v1642_v48 = vpop.permute.xlu1 %1641 }
 0xb2c   :  { %4480 = vmatmul.mubr.msk.bf16.vlgmr.msra.gmra.mxu0 %vm523_vm4, %v1642_v48  ;;  %4488 = vmatmul.mubr.msk.bf16.vlgmr.msra.gmra.mxu1 %vm523_vm4, %v1642_v48 }
 0xb2d   :  { %4492 = vmatpush3.bf16.msra.mxu0 %v5432_v53  ;;  %4500 = vmatpush3.bf16.msra.mxu1 %v5505_v29 }
 0xb2e   :  { %4493 = vmatprep.subr.bf16.mxu0 %v5152_v1  ;;  %4501 = vmatprep.subr.bf16.mxu1 %v5152_v1 }
 0xb2f   :  { %4495 = vmatprep.mubr.msk.bf16.mxu0 %vm5153_vm0, %v5152_v1  ;;  %4503 = vmatprep.mubr.msk.bf16.mxu1 %vm5153_vm0, %v5152_v1 }
 0xb31   :  { %4494 = vmatpush3.bf16.msra.mxu0 %v5440_v55  ;;  %4502 = vmatpush3.bf16.msra.mxu1 %v5511_v34 }
 0xb32   :  { %4507 = vmatprep.subr.bf16.mxu0 %v5152_v1  ;;  %4515 = vmatprep.subr.bf16.mxu1 %v5152_v1 }
 0xb33   :  { %v1754_v50 = vpop.permute.xlu0 %1753 }
 0xb34   :  { %4496 = vmatmul.mubr.msk.bf16.vlgmr.msra.gmra.mxu0 %vm523_vm4, %v1754_v50  ;;  %4504 = vmatmul.mubr.msk.bf16.vlgmr.msra.gmra.mxu1 %vm523_vm4, %v1754_v50 }
 0xb35   :  { %4508 = vmatpush3.bf16.msra.mxu0 %v5524_v36  ;;  %4511 = vmatprep.mubr.msk.bf16.mxu0 %vm5153_vm0, %v5152_v1 }
 0xb36   :  { %4509 = vmatprep.subr.bf16.mxu0 %v5152_v1  ;;  %4516 = vmatpush3.bf16.msra.mxu1 %v5635_v59 }
 0xb37   :  { %4517 = vmatprep.subr.bf16.mxu1 %v5152_v1  ;;  %4519 = vmatprep.mubr.msk.bf16.mxu1 %vm5153_vm0, %v5152_v1 }
 0xb39   :  { %4510 = vmatpush3.bf16.msra.mxu0 %v5534_v40 }
 0xb3a   :  { %4523 = vmatprep.subr.bf16.mxu0 %v5152_v1  ;;  %4518 = vmatpush3.bf16.msra.mxu1 %v5646_v60 }
 0xb3b   :  { %v1866_v42 = vpop.permute.xlu1 %1865  ;;  %4531 = vmatprep.subr.bf16.mxu1 %v5152_v1 }
 0xb3c   :  { %4512 = vmatmul.mubr.msk.bf16.vlgmr.msra.gmra.mxu0 %vm523_vm4, %v1866_v42 }
 0xb3d   :  { %4524 = vmatpush3.bf16.msra.mxu0 %v5310_v3  ;;  %4527 = vmatprep.mubr.msk.bf16.mxu0 %vm5153_vm0, %v5152_v1 }
 0xb3e   :  { %4525 = vmatprep.subr.bf16.mxu0 %v5152_v1 }
 0xb41   :  { %4526 = vmatpush3.bf16.msra.mxu0 %v5318_v11 }
 0xb42   :  { %4539 = vmatprep.subr.bf16.mxu0 %v5152_v1 }
 0xbde   :  { %v1569_v63 = vpop.f32.mrf.mxu0  ;;  %v1634_v2 = vpop.f32.mrf.mxu1 }
 0xbdf   :  { %v1570_v4 = vadd.f32 %v1569_v63, %v365_v61 }
 0xbe0   :  { %v4465_v30 = vpop.f32.mrf.mxu0  ;;  %v4473_v6 = vpop.f32.mrf.mxu1 }
 0xbe1   :  { %4893 = vtanh.f32 %v1570_v4  ;;  %v4029_v42 = vmul.f32 -1.442695, %v1570_v4 }
 0xbe2   :  { %v1572_v10 = vpop.f32.mrf.mxu0  ;;  %v1637_v3 = vpop.f32.mrf.mxu1 }
 0xbe4   :  { %v4466_v12 = vpop.f32.mrf.mxu0  ;;  %v4474_v14 = vpop.f32.mrf.mxu1 }
 0xbec   :  { %v1680_v15 = vpop.f32.mrf.mxu0  ;;  %v1746_v16 = vpop.f32.mrf.mxu1 }
 0xbed   :  { %v1681_v28 = vadd.f32 %v1680_v15, %v1634_v2 }
 0xbee   :  { %v4894_v17 = vpop.eup %4893  ;;  %v4481_v11 = vpop.f32.mrf.mxu0 }
 0xbef   :  { %v4489_v18 = vpop.f32.mrf.mxu1  ;;  %v1686_v19 = vadd.f32 %v1681_v28, %v5393_v62  ;;  %1584 = vrot.lane.b32.xlu0 %v4894_v17, %s5148_s14 }
 0xbf0   :  { %v1683_v37 = vpop.f32.mrf.mxu0 }
 0xbf1   :  { %v1749_v22 = vpop.f32.mrf.mxu1  ;;  %4895 = vtanh.f32 %v1686_v19  ;;  %v4032_v61 = vmul.f32 -1.442695, %v1686_v19 }
 0xbf2   :  { %v4482_v8 = vpop.f32.mrf.mxu0 }
 0xbf3   :  { %v4490_v9 = vpop.f32.mrf.mxu1 }
 0xbf4   :  { %v1792_v7 = vpop.f32.mrf.mxu0 }
 0xbf5   :  { %v1858_v24 = vpop.f32.mrf.mxu1  ;;  %v1793_v31 = vadd.f32 %v1792_v7, %v1746_v16 }
 0xbf6   :  { %v4497_v13 = vpop.f32.mrf.mxu0 }
 0xbf7   :  { %v4505_v25 = vpop.f32.mrf.mxu1  ;;  %v1798_v32 = vadd.f32 %v1793_v31, %v5466_v21 }
 0xbf8   :  { %v1795_v39 = vpop.f32.mrf.mxu0 }
 0xbf9   :  { %v1861_v0 = vpop.f32.mrf.mxu1  ;;  %4897 = vtanh.f32 %v1798_v32  ;;  %v4035_v30 = vmul.f32 -1.442695, %v1798_v32 }
 0xbfa   :  { %v4498_v26 = vpop.f32.mrf.mxu0 }
 0xbfb   :  { %v4506_v43 = vpop.f32.mrf.mxu1 }
 0xbfc   :  { %v1904_v45 = vpop.f32.mrf.mxu0 }
 0xbfd   :  { %v1905_v47 = vadd.f32 %v1904_v45, %v1858_v24 }
 0xbfe   :  { %v4896_v27 = vpop.eup %4895  ;;  %v4513_v51 = vpop.f32.mrf.mxu0 }
 0xbff   :  { %v1910_v54 = vadd.f32 %v1905_v47, %v5561_v5  ;;  %1696 = vrot.lane.b32.xlu1 %v4896_v27, %s5148_s14 }
 0xc00   :  { %v1907_v58 = vpop.f32.mrf.mxu0 }
 0xc01   :  { %4899 = vtanh.f32 %v1910_v54  ;;  %v4038_v6 = vmul.f32 -1.442695, %v1910_v54 }
 0xc02   :  { %v4514_v57 = vpop.f32.mrf.mxu0  ;;  %4901 = vpow2.f32 %v4029_v42 }
 0xc03   :  { %4903 = vpow2.f32 %v4032_v61 }
 0xc06   :  { %v4898_v48 = vpop.eup %4897 }
 0xc07   :  { %1808 = vrot.lane.b32.xlu0 %v4898_v48, %s5148_s14 }
 0xc0e   :  { %v4900_v50 = vpop.eup %4899 }
 0xc0f   :  { %1920 = vrot.lane.b32.xlu1 %v4900_v50, %s5148_s14  ;;  %v4902_v63 = vpop.eup %4901 }
 0xc10   :  { %v1578_v2 = vadd.f32 1.0, %v4902_v63  ;;  %v4904_v10 = vpop.eup %4903 }
 0xc11   :  { %v1690_v3 = vadd.f32 1.0, %v4904_v10 }
 0xc12   :  { %4905 = vrcp.f32 %v1578_v2 }
 0xc13   :  { %4907 = vpow2.f32 %v4035_v30 }
 0xc14   :  { %4909 = vpow2.f32 %v4038_v6 }
 0xc15   :  { %4911 = vrcp.f32 %v1690_v3 }
 0xc1f   :  { %v4906_v12 = vpop.eup %4905 }
 0xc20   :  { %v4908_v16 = vpop.eup %4907  ;;  %v1582_v31 = vmul.f32 %v4906_v12, %v5572_v33 }
 0xc21   :  { %v1802_v4 = vadd.f32 1.0, %v4908_v16  ;;  %v4910_v28 = vpop.eup %4909 }
 0xc22   :  { %v1914_v17 = vadd.f32 1.0, %v4910_v28  ;;  %v4912_v11 = vpop.eup %4911 }
 0xc23   :  { %4913 = vrcp.f32 %v1802_v4  ;;  %v1694_v32 = vmul.f32 %v4912_v11, %v5576_v20 }
 0xc24   :  { %4915 = vrcp.f32 %v1914_v17 }
 0xc30   :  { %v4914_v37 = vpop.eup %4913 }
 0xc31   :  { %v4916_v9 = vpop.eup %4915  ;;  %v1806_v43 = vmul.f32 %v4914_v37, %v5581_v23 }
 0xc32   :  { %v1918_v33 = vmul.f32 %v4916_v9, %v5584_v38 }
 0xc61   :  { %v1585_v14 = vpop.permute.xlu0 %1584 }
 0xc62   :  { %v1587_v15 = vmul.f32 %v4906_v12, %v1585_v14  ;;  %v5716_v14 = vld [vmem:[%s6151_s3 + $0x10] sm:$0xff]  }
 0xc64   :  { %1589 = vrot.lane.b32.xlu0 %v1587_v15, %s5155_s10 }
 0xc71   :  { %v1697_v18 = vpop.permute.xlu1 %1696 }
 0xc72   :  { %v1699_v19 = vmul.f32 %v4912_v11, %v1697_v18 }
 0xc74   :  { %1701 = vrot.lane.b32.xlu1 %v1699_v19, %s5155_s10 }
 0xc79   :  { %v1809_v22 = vpop.permute.xlu0 %1808 }
 0xc7a   :  { %v1811_v8 = vmul.f32 %v4914_v37, %v1809_v22 }
 0xc7c   :  { %1813 = vrot.lane.b32.xlu0 %v1811_v8, %s5155_s10 }
 0xc81   :  { %v1921_v7 = vpop.permute.xlu1 %1920 }
 0xc82   :  { %v1923_v24 = vmul.f32 %v4916_v9, %v1921_v7 }
 0xc84   :  { %1925 = vrot.lane.b32.xlu1 %v1923_v24, %s5155_s10 }
 0xcd6   :  { %v1590_v13 = vpop.permute.xlu0 %1589 }
 0xcd7   :  { %v5671_v25 = vadd.f32 %v1590_v13, %v1582_v31 }
 0xcd9   :  { %4917 = vtanh.f32 %v5671_v25 }
 0xce6   :  { %v4918_v39 = vpop.eup %4917  ;;  %v1702_v0 = vpop.permute.xlu1 %1701 }
 0xce7   :  { %v5675_v26 = vadd.f32 %v1702_v0, %v1694_v32  ;;  %1595 = vrot.lane.b32.xlu0 %v4918_v39, %s5148_s14 }
 0xce9   :  { %4919 = vtanh.f32 %v5675_v26 }
 0xcee   :  { %v1814_v45 = vpop.permute.xlu0 %1813 }
 0xcef   :  { %v5680_v47 = vadd.f32 %v1814_v45, %v1806_v43 }
 0xcf1   :  { %4921 = vtanh.f32 %v5680_v47 }
 0xcf6   :  { %v4920_v27 = vpop.eup %4919  ;;  %v1926_v51 = vpop.permute.xlu1 %1925 }
 0xcf7   :  { %v5684_v20 = vadd.f32 %v1926_v51, %v1918_v33  ;;  %1707 = vrot.lane.b32.xlu1 %v4920_v27, %s5148_s14 }
 0xcf9   :  { %4923 = vtanh.f32 %v5684_v20 }
 0xcfe   :  { %v4922_v54 = vpop.eup %4921 }
 0xcff   :  { %1819 = vrot.lane.b32.xlu0 %v4922_v54, %s5148_s14 }
 0xd06   :  { %v4924_v58 = vpop.eup %4923 }
 0xd07   :  { %1931 = vrot.lane.b32.xlu1 %v4924_v58, %s5148_s14 }
 0xd59   :  { %v1596_v23 = vpop.permute.xlu0 %1595 }
 0xd5a   :  { %v1598_v57 = vmul.f32 %v4906_v12, %v1596_v23  ;;  %v5703_v12 = vld [vmem:[%s6151_s3 + $0x18] sm:$0xff]  }
 0xd5c   :  { %v1936_v48 = vpack.c.bf16 %v1598_v57, %v1598_v57 }
 0xd5e   :  { %1938 = vrot.lane.b32.xlu0 %v1936_v48, %s5155_s10 }
 0xd69   :  { %v1708_v38 = vpop.permute.xlu1 %1707 }
 0xd6a   :  { %v1710_v50 = vmul.f32 %v4912_v11, %v1708_v38 }
 0xd6c   :  { %v2007_v42 = vpack.c.bf16 %v1710_v50, %v1710_v50 }
 0xd6e   :  { %2049 = vrot.lane.b32.xlu1 %v2007_v42, %s5155_s10 }
 0xd71   :  { %v1820_v61 = vpop.permute.xlu0 %1819 }
 0xd72   :  { %v1822_v63 = vmul.f32 %v4914_v37, %v1820_v61 }
 0xd74   :  { %v2119_v2 = vpack.c.bf16 %v1822_v63, %v1822_v63 }
 0xd76   :  { %2161 = vrot.lane.b32.xlu0 %v2119_v2, %s5155_s10 }
 0xd79   :  { %v1932_v30 = vpop.permute.xlu1 %1931 }
 0xd7a   :  { %v5693_v6 = vmul.f32 %v4916_v9, %v1932_v30 }
 0xd7c   :  { %v2231_v10 = vpack.c.bf16 %v5693_v6, %v5693_v6 }
 0xd7e   :  { %2273 = vrot.lane.b32.xlu1 %v2231_v10, %s5155_s10 }
 0xdd0   :  { %v1939_v3 = vpop.permute.xlu0 %1938 }
 0xdd1   :  { %4520 = vmatmul.mubr.msk.bf16.vlgmr.msra.gmra.mxu1 %vm523_vm4, %v1939_v3  ;;  %4528 = vmatmul.mubr.msk.bf16.vlgmr.msra.gmra.mxu0 %vm523_vm4, %v1939_v3 }
 0xdd2   :  { %4532 = vmatpush3.bf16.msra.mxu1 %v5703_v12  ;;  %4540 = vmatpush3.bf16.msra.mxu0 %v5411_v49 }
 0xdd3   :  { %4533 = vmatprep.subr.bf16.mxu1 %v5152_v1  ;;  %4541 = vmatprep.subr.bf16.mxu0 %v5152_v1 }
 0xdd4   :  { %4535 = vmatprep.mubr.msk.bf16.mxu1 %vm5153_vm0, %v5152_v1  ;;  %4543 = vmatprep.mubr.msk.bf16.mxu0 %vm5153_vm0, %v5152_v1 }
 0xdd6   :  { %4534 = vmatpush3.bf16.msra.mxu1 %v5716_v14  ;;  %4542 = vmatpush3.bf16.msra.mxu0 %v5417_v52 }
 0xdd7   :  { %4547 = vmatprep.subr.bf16.mxu1 %v5152_v1  ;;  %4555 = vmatprep.subr.bf16.mxu0 %v5152_v1 }
 0xde0   :  { %v2050_v49 = vpop.permute.xlu1 %2049 }
 0xde1   :  { %4536 = vmatmul.mubr.msk.bf16.vlgmr.msra.gmra.mxu1 %vm523_vm4, %v2050_v49  ;;  %4544 = vmatmul.mubr.msk.bf16.vlgmr.msra.gmra.mxu0 %vm523_vm4, %v2050_v49 }
 0xde2   :  { %4548 = vmatpush3.bf16.msra.mxu1 %v5432_v53  ;;  %4556 = vmatpush3.bf16.msra.mxu0 %v5505_v29  ;;  %v5757_v29 = vld [vmem:[#allocation5] sm:$0xff]  }
 0xde3   :  { %4549 = vmatprep.subr.bf16.mxu1 %v5152_v1  ;;  %4557 = vmatprep.subr.bf16.mxu0 %v5152_v1 }
 0xde4   :  { %4551 = vmatprep.mubr.msk.bf16.mxu1 %vm5153_vm0, %v5152_v1  ;;  %4559 = vmatprep.mubr.msk.bf16.mxu0 %vm5153_vm0, %v5152_v1 }
 0xde6   :  { %4550 = vmatpush3.bf16.msra.mxu1 %v5440_v55  ;;  %4558 = vmatpush3.bf16.msra.mxu0 %v5511_v34  ;;  %v5751_v55 = vld [vmem:[#allocation5 + $0x8] sm:$0xff]   ;;  %v412_v34 = vadd.f32 %v5355_v35, %v5301_v46 }
 0xde7   :  { %4563 = vmatprep.subr.bf16.mxu1 %v5152_v1  ;;  %4571 = vmatprep.subr.bf16.mxu0 %v5152_v1 }
 0xde8   :  { %v2162_v52 = vpop.permute.xlu0 %2161 }
 0xde9   :  { %4552 = vmatmul.mubr.msk.bf16.vlgmr.msra.gmra.mxu1 %vm523_vm4, %v2162_v52  ;;  %4560 = vmatmul.mubr.msk.bf16.vlgmr.msra.gmra.mxu0 %vm523_vm4, %v2162_v52 }
 0xdea   :  { %4564 = vmatpush3.bf16.msra.mxu1 %v5524_v36  ;;  %4567 = vmatprep.mubr.msk.bf16.mxu1 %vm5153_vm0, %v5152_v1 }
 0xdeb   :  { %4565 = vmatprep.subr.bf16.mxu1 %v5152_v1  ;;  %4572 = vmatpush3.bf16.msra.mxu0 %v5635_v59 }
 0xdec   :  { %4573 = vmatprep.subr.bf16.mxu0 %v5152_v1  ;;  %4575 = vmatprep.mubr.msk.bf16.mxu0 %vm5153_vm0, %v5152_v1 }
 0xdee   :  { %4566 = vmatpush3.bf16.msra.mxu1 %v5534_v40 }
 0xdef   :  { %4579 = vmatprep.subr.bf16.mxu1 %v5152_v1  ;;  %4574 = vmatpush3.bf16.msra.mxu0 %v5646_v60 }
 0xdf0   :  { %v2274_v53 = vpop.permute.xlu1 %2273  ;;  %4587 = vmatprep.subr.bf16.mxu0 %v5152_v1 }
 0xdf1   :  { %4568 = vmatmul.mubr.msk.bf16.vlgmr.msra.gmra.mxu1 %vm523_vm4, %v2274_v53 }
 0xdf2   :  { %4580 = vmatpush3.bf16.msra.mxu1 %v5751_v55  ;;  %4583 = vmatprep.mubr.msk.bf16.mxu1 %vm5153_vm0, %v5152_v1 }
 0xdf3   :  { %4581 = vmatprep.subr.bf16.mxu1 %v5152_v1 }
 0xdf6   :  { %4582 = vmatpush3.bf16.msra.mxu1 %v5757_v29 }
 0xdf7   :  { %4595 = vmatprep.subr.bf16.mxu1 %v5152_v1 }
 0xe91   :  { %v1977_v36 = vpop.f32.mrf.mxu1  ;;  %v2042_v40 = vpop.f32.mrf.mxu0 }
 0xe92   :  { %v1978_v15 = vadd.f32 %v1977_v36, %v412_v34 }
 0xe93   :  { %v4521_v16 = vpop.f32.mrf.mxu1  ;;  %v4529_v4 = vpop.f32.mrf.mxu0 }
 0xe94   :  { %4925 = vtanh.f32 %v1978_v15  ;;  %v4040_v10 = vmul.f32 -1.442695, %v1978_v15 }
 0xe95   :  { %v1980_v28 = vpop.f32.mrf.mxu1  ;;  %v2045_v17 = vpop.f32.mrf.mxu0 }
 0xe97   :  { %v4522_v11 = vpop.f32.mrf.mxu1  ;;  %v4530_v18 = vpop.f32.mrf.mxu0 }
 0xea1   :  { %v4926_v19 = vpop.eup %4925  ;;  %v2088_v37 = vpop.f32.mrf.mxu1 }
 0xea2   :  { %v2154_v22 = vpop.f32.mrf.mxu0  ;;  %v2089_v8 = vadd.f32 %v2088_v37, %v2042_v40  ;;  %1992 = vrot.lane.b32.xlu0 %v4926_v19, %s5148_s14 }
 0xea3   :  { %v4537_v9 = vpop.f32.mrf.mxu1 }
 0xea4   :  { %v4545_v7 = vpop.f32.mrf.mxu0  ;;  %v2094_v35 = vadd.f32 %v2089_v8, %v5393_v62 }
 0xea5   :  { %v2091_v24 = vpop.f32.mrf.mxu1 }
 0xea6   :  { %v2157_v31 = vpop.f32.mrf.mxu0  ;;  %4927 = vtanh.f32 %v2094_v35  ;;  %v4043_v49 = vmul.f32 -1.442695, %v2094_v35 }
 0xea7   :  { %v4538_v13 = vpop.f32.mrf.mxu1 }
 0xea8   :  { %v4546_v32 = vpop.f32.mrf.mxu0 }
 0xea9   :  { %v2200_v39 = vpop.f32.mrf.mxu1 }
 0xeaa   :  { %v2266_v0 = vpop.f32.mrf.mxu0  ;;  %v2201_v43 = vadd.f32 %v2200_v39, %v2154_v22 }
 0xeab   :  { %v4553_v45 = vpop.f32.mrf.mxu1 }
 0xeac   :  { %v4561_v33 = vpop.f32.mrf.mxu0  ;;  %v2206_v27 = vadd.f32 %v2201_v43, %v5466_v21 }
 0xead   :  { %v2203_v51 = vpop.f32.mrf.mxu1 }
 0xeae   :  { %v2269_v54 = vpop.f32.mrf.mxu0  ;;  %4929 = vtanh.f32 %v2206_v27  ;;  %v4046_v53 = vmul.f32 -1.442695, %v2206_v27 }
 0xeaf   :  { %v4554_v58 = vpop.f32.mrf.mxu1 }
 0xeb0   :  { %v4562_v23 = vpop.f32.mrf.mxu0 }
 0xeb1   :  { %v2312_v57 = vpop.f32.mrf.mxu1 }
 0xeb2   :  { %v2313_v48 = vadd.f32 %v2312_v57, %v2266_v0 }
 0xeb3   :  { %v4569_v38 = vpop.f32.mrf.mxu1  ;;  %v4928_v50 = vpop.eup %4927 }
 0xeb4   :  { %v2318_v42 = vadd.f32 %v2313_v48, %v5561_v5  ;;  %2104 = vrot.lane.b32.xlu1 %v4928_v50, %s5148_s14 }
 0xeb5   :  { %v2315_v61 = vpop.f32.mrf.mxu1 }
 0xeb6   :  { %4931 = vtanh.f32 %v2318_v42  ;;  %v4049_v34 = vmul.f32 -1.442695, %v2318_v42 }
 0xeb7   :  { %v4570_v63 = vpop.f32.mrf.mxu1  ;;  %4933 = vpow2.f32 %v4040_v10 }
 0xeb8   :  { %4935 = vpow2.f32 %v4043_v49 }
 0xebb   :  { %v4930_v2 = vpop.eup %4929 }
 0xebc   :  { %2216 = vrot.lane.b32.xlu0 %v4930_v2, %s5148_s14 }
 0xec3   :  { %v4932_v30 = vpop.eup %4931 }
 0xec4   :  { %2328 = vrot.lane.b32.xlu1 %v4932_v30, %s5148_s14  ;;  %v4934_v3 = vpop.eup %4933 }
 0xec5   :  { %v1986_v52 = vadd.f32 1.0, %v4934_v3  ;;  %v4936_v36 = vpop.eup %4935  ;;  %v1935_v3 = vadd.f32 %v5693_v6, %v5593_v56  ;;  %v5815_v56 = vld [vmem:[#allocation5 + $0x10] sm:$0xff]  }
 0xec6   :  { %v2098_v28 = vadd.f32 1.0, %v4936_v36  ;;  %v5805_v36 = vld [vmem:[#allocation5 + $0x18] sm:$0xff]  }
 0xec7   :  { %4937 = vrcp.f32 %v1986_v52 }
 0xec8   :  { %4939 = vpow2.f32 %v4046_v53 }
 0xec9   :  { %4941 = vpow2.f32 %v4049_v34 }
 0xeca   :  { %4943 = vrcp.f32 %v2098_v28  ;;  %v5843_v28 = vld [vmem:[#allocation5 + $0x20] sm:$0xff]  }
 0xed4   :  { %v4938_v40 = vpop.eup %4937 }
 0xed5   :  { %v4940_v17 = vpop.eup %4939  ;;  %v1990_v13 = vmul.f32 %v4938_v40, %v5671_v25 }
 0xed6   :  { %v2210_v15 = vadd.f32 1.0, %v4940_v17  ;;  %v4942_v11 = vpop.eup %4941 }
 0xed7   :  { %v2322_v18 = vadd.f32 1.0, %v4942_v11  ;;  %v4944_v19 = vpop.eup %4943  ;;  %v5866_v11 = vld [vmem:[%s6151_s3 + $0x30] sm:$0xff]  }
 0xed8   :  { %4945 = vrcp.f32 %v2210_v15  ;;  %v2102_v43 = vmul.f32 %v4944_v19, %v5675_v26  ;;  %v5853_v15 = vld [vmem:[%s6151_s3 + $0x38] sm:$0xff]  }
 0xed9   :  { %4947 = vrcp.f32 %v2322_v18 }
 0xee5   :  { %v4946_v8 = vpop.eup %4945 }
 0xee6   :  { %v4948_v35 = vpop.eup %4947  ;;  %v2214_v27 = vmul.f32 %v4946_v8, %v5680_v47 }
 0xee7   :  { %v2326_v25 = vmul.f32 %v4948_v35, %v5684_v20 }
 0xf14   :  { %v1993_v16 = vpop.permute.xlu0 %1992 }
 0xf15   :  { %v1995_v4 = vmul.f32 %v4938_v40, %v1993_v16  ;;  %v5828_v16 = vld [vmem:[#allocation5 + $0x28] sm:$0xff]  }
 0xf17   :  { %1997 = vrot.lane.b32.xlu0 %v1995_v4, %s5155_s10  ;;  %v5840_v4 = vld [vmem:[%s6151_s3 + $0x20] sm:$0xff]  }
 0xf26   :  { %v2105_v37 = vpop.permute.xlu1 %2104 }
 0xf27   :  { %v2107_v22 = vmul.f32 %v4944_v19, %v2105_v37 }
 0xf29   :  { %2109 = vrot.lane.b32.xlu1 %v2107_v22, %s5155_s10 }
 0xf2e   :  { %v2217_v9 = vpop.permute.xlu0 %2216 }
 0xf2f   :  { %v2219_v7 = vmul.f32 %v4946_v8, %v2217_v9 }
 0xf31   :  { %2221 = vrot.lane.b32.xlu0 %v2219_v7, %s5155_s10 }
 0xf36   :  { %v2329_v24 = vpop.permute.xlu1 %2328 }
 0xf37   :  { %v2331_v31 = vmul.f32 %v4948_v35, %v2329_v24 }
 0xf39   :  { %2333 = vrot.lane.b32.xlu1 %v2331_v31, %s5155_s10 }
 0xf89   :  { %v1998_v32 = vpop.permute.xlu0 %1997 }
 0xf8a   :  { %v5775_v39 = vadd.f32 %v1998_v32, %v1990_v13 }
 0xf8c   :  { %4949 = vtanh.f32 %v5775_v39 }
 0xf99   :  { %v4950_v0 = vpop.eup %4949 }
 0xf9a   :  { %2003 = vrot.lane.b32.xlu0 %v4950_v0, %s5148_s14 }
 0xf9b   :  { %v2110_v45 = vpop.permute.xlu1 %2109 }
 0xf9c   :  { %v5780_v33 = vadd.f32 %v2110_v45, %v2102_v43 }
 0xf9e   :  { %4951 = vtanh.f32 %v5780_v33 }
 0xfa3   :  { %v2222_v51 = vpop.permute.xlu0 %2221 }
 0xfa4   :  { %v5784_v54 = vadd.f32 %v2222_v51, %v2214_v27 }
 0xfa6   :  { %4953 = vtanh.f32 %v5784_v54 }
 0xfab   :  { %v2334_v58 = vpop.permute.xlu1 %2333  ;;  %v4952_v23 = vpop.eup %4951 }
 0xfac   :  { %v5788_v57 = vadd.f32 %v2334_v58, %v2326_v25  ;;  %2115 = vrot.lane.b32.xlu1 %v4952_v23, %s5148_s14 }
 0xfae   :  { %4955 = vtanh.f32 %v5788_v57 }
 0xfb3   :  { %v4954_v26 = vpop.eup %4953 }
 0xfb4   :  { %2227 = vrot.lane.b32.xlu0 %v4954_v26, %s5148_s14 }
 0xfbb   :  { %v4956_v48 = vpop.eup %4955 }
 0xfbc   :  { %2339 = vrot.lane.b32.xlu1 %v4956_v48, %s5148_s14 }
0x100c   :  { %v2004_v47 = vpop.permute.xlu0 %2003 }
0x100d   :  { %v2006_v38 = vmul.f32 %v4938_v40, %v2004_v47  ;;  %v5825_v40 = vld [vmem:[%s6151_s3 + $0x28] sm:$0xff]  }
0x100f   :  { %v2344_v50 = vpack.c.bf16 %v2006_v38, %v2006_v38 }
0x1011   :  { %2346 = vrot.lane.b32.xlu0 %v2344_v50, %s5155_s10 }
0x101e   :  { %v2116_v20 = vpop.permute.xlu1 %2115 }
0x101f   :  { %v2118_v42 = vmul.f32 %v4944_v19, %v2116_v20 }
0x1021   :  { %v2415_v61 = vpack.c.bf16 %v2118_v42, %v2118_v42 }
0x1023   :  { %2457 = vrot.lane.b32.xlu1 %v2415_v61, %s5155_s10 }
0x1026   :  { %v2228_v63 = vpop.permute.xlu0 %2227 }
0x1027   :  { %v2230_v2 = vmul.f32 %v4946_v8, %v2228_v63 }
0x1029   :  { %v2527_v30 = vpack.c.bf16 %v2230_v2, %v2230_v2 }
0x102b   :  { %2569 = vrot.lane.b32.xlu0 %v2527_v30, %s5155_s10 }
0x102e   :  { %v2340_v10 = vpop.permute.xlu1 %2339 }
0x102f   :  { %v2342_v49 = vmul.f32 %v4948_v35, %v2340_v10 }
0x1031   :  { %v5799_v52 = vadd.f32 %v2342_v49, %v1935_v3  ;;  %v2639_v53 = vpack.c.bf16 %v2342_v49, %v2342_v49 }
0x1033   :  { %2681 = vrot.lane.b32.xlu1 %v2639_v53, %s5155_s10 }
0x1083   :  { %v2347_v34 = vpop.permute.xlu0 %2346 }
0x1084   :  { %4576 = vmatmul.mubr.msk.bf16.vlgmr.msra.gmra.mxu0 %vm523_vm4, %v2347_v34  ;;  %4584 = vmatmul.mubr.msk.bf16.vlgmr.msra.gmra.mxu1 %vm523_vm4, %v2347_v34 }
0x1085   :  { %4588 = vmatpush3.bf16.msra.mxu0 %v5703_v12  ;;  %4596 = vmatpush3.bf16.msra.mxu1 %v5805_v36 }
0x1086   :  { %4589 = vmatprep.subr.bf16.mxu0 %v5152_v1  ;;  %4597 = vmatprep.subr.bf16.mxu1 %v5152_v1 }
0x1087   :  { %4591 = vmatprep.mubr.msk.bf16.mxu0 %vm5153_vm0, %v5152_v1  ;;  %4599 = vmatprep.mubr.msk.bf16.mxu1 %vm5153_vm0, %v5152_v1 }
0x1089   :  { %4590 = vmatpush3.bf16.msra.mxu0 %v5716_v14  ;;  %4598 = vmatpush3.bf16.msra.mxu1 %v5815_v56 }
0x108a   :  { %4603 = vmatprep.subr.bf16.mxu0 %v5152_v1  ;;  %4611 = vmatprep.subr.bf16.mxu1 %v5152_v1 }
0x1095   :  { %v2458_v6 = vpop.permute.xlu1 %2457 }
0x1096   :  { %4592 = vmatmul.mubr.msk.bf16.vlgmr.msra.gmra.mxu0 %vm523_vm4, %v2458_v6  ;;  %4600 = vmatmul.mubr.msk.bf16.vlgmr.msra.gmra.mxu1 %vm523_vm4, %v2458_v6 }
0x1097   :  { %4604 = vmatpush3.bf16.msra.mxu0 %v5825_v40  ;;  %4612 = vmatpush3.bf16.msra.mxu1 %v5828_v16 }
0x1098   :  { %4605 = vmatprep.subr.bf16.mxu0 %v5152_v1  ;;  %4613 = vmatprep.subr.bf16.mxu1 %v5152_v1 }
0x1099   :  { %4607 = vmatprep.mubr.msk.bf16.mxu0 %vm5153_vm0, %v5152_v1  ;;  %4615 = vmatprep.mubr.msk.bf16.mxu1 %vm5153_vm0, %v5152_v1 }
0x109b   :  { %4606 = vmatpush3.bf16.msra.mxu0 %v5840_v4  ;;  %4614 = vmatpush3.bf16.msra.mxu1 %v5843_v28 }
0x109c   :  { %4619 = vmatprep.subr.bf16.mxu0 %v5152_v1  ;;  %4627 = vmatprep.subr.bf16.mxu1 %v5152_v1 }
0x109d   :  { %v2570_v17 = vpop.permute.xlu0 %2569 }
0x109e   :  { %4608 = vmatmul.mubr.msk.bf16.vlgmr.msra.gmra.mxu0 %vm523_vm4, %v2570_v17  ;;  %4616 = vmatmul.mubr.msk.bf16.vlgmr.msra.gmra.mxu1 %vm523_vm4, %v2570_v17 }
0x109f   :  { %4620 = vmatpush3.bf16.msra.mxu0 %v5853_v15  ;;  %4623 = vmatprep.mubr.msk.bf16.mxu0 %vm5153_vm0, %v5152_v1 }
0x10a0   :  { %4621 = vmatprep.subr.bf16.mxu0 %v5152_v1  ;;  %4628 = vmatpush3.bf16.msra.mxu1 %v5635_v59  ;;  %v459_v59 = vadd.f32 %v5298_v44, %v5301_v46 }
0x10a1   :  { %4629 = vmatprep.subr.bf16.mxu1 %v5152_v1  ;;  %4631 = vmatprep.mubr.msk.bf16.mxu1 %vm5153_vm0, %v5152_v1 }
0x10a3   :  { %4622 = vmatpush3.bf16.msra.mxu0 %v5866_v11 }
0x10a4   :  { %4635 = vmatprep.subr.bf16.mxu0 %v5152_v1  ;;  %4630 = vmatpush3.bf16.msra.mxu1 %v5646_v60 }
0x10a5   :  { %v2682_v18 = vpop.permute.xlu1 %2681  ;;  %4643 = vmatprep.subr.bf16.mxu1 %v5152_v1 }
0x10a6   :  { %4624 = vmatmul.mubr.msk.bf16.vlgmr.msra.gmra.mxu0 %vm523_vm4, %v2682_v18 }
0x10a7   :  { %4636 = vmatpush3.bf16.msra.mxu0 %v5751_v55  ;;  %4639 = vmatprep.mubr.msk.bf16.mxu0 %vm5153_vm0, %v5152_v1 }
0x10a8   :  { %4637 = vmatprep.subr.bf16.mxu0 %v5152_v1 }
0x10ab   :  { %4638 = vmatpush3.bf16.msra.mxu0 %v5757_v29 }
0x10ac   :  { %4651 = vmatprep.subr.bf16.mxu0 %v5152_v1 }
0x1144   :  { %v2385_v19 = vpop.f32.mrf.mxu0  ;;  %v2450_v60 = vpop.f32.mrf.mxu1 }
0x1145   :  { %v2386_v37 = vadd.f32 %v2385_v19, %v459_v59 }
0x1146   :  { %v4577_v22 = vpop.f32.mrf.mxu0  ;;  %v4585_v8 = vpop.f32.mrf.mxu1 }
0x1147   :  { %4957 = vtanh.f32 %v2386_v37  ;;  %v4051_v18 = vmul.f32 -1.442695, %v2386_v37 }
0x1148   :  { %v2388_v9 = vpop.f32.mrf.mxu0  ;;  %v2453_v7 = vpop.f32.mrf.mxu1 }
0x114a   :  { %v4578_v35 = vpop.f32.mrf.mxu0  ;;  %v4586_v24 = vpop.f32.mrf.mxu1 }
0x1154   :  { %v4958_v31 = vpop.eup %4957 }
0x1155   :  { %2400 = vrot.lane.b32.xlu0 %v4958_v31, %s5148_s14 }
0x1156   :  { %v2496_v13 = vpop.f32.mrf.mxu0  ;;  %v2562_v32 = vpop.f32.mrf.mxu1 }
0x1157   :  { %v2497_v0 = vadd.f32 %v2496_v13, %v2450_v60 }
0x1158   :  { %v4593_v43 = vpop.f32.mrf.mxu0  ;;  %v4601_v45 = vpop.f32.mrf.mxu1 }
0x1159   :  { %v2502_v44 = vadd.f32 %v2497_v0, %v5393_v62 }
0x115a   :  { %v2499_v27 = vpop.f32.mrf.mxu0  ;;  %v2565_v51 = vpop.f32.mrf.mxu1 }
0x115b   :  { %4959 = vtanh.f32 %v2502_v44  ;;  %v4054_v60 = vmul.f32 -1.442695, %v2502_v44 }
0x115c   :  { %v4594_v25 = vpop.f32.mrf.mxu0  ;;  %v4602_v58 = vpop.f32.mrf.mxu1 }
0x115e   :  { %v2608_v23 = vpop.f32.mrf.mxu0  ;;  %v2674_v26 = vpop.f32.mrf.mxu1 }
0x115f   :  { %v2609_v48 = vadd.f32 %v2608_v23, %v2562_v32 }
0x1160   :  { %v4609_v47 = vpop.f32.mrf.mxu0  ;;  %v4617_v38 = vpop.f32.mrf.mxu1 }
0x1161   :  { %v2614_v50 = vadd.f32 %v2609_v48, %v5466_v21 }
0x1162   :  { %v2611_v20 = vpop.f32.mrf.mxu0  ;;  %v2677_v42 = vpop.f32.mrf.mxu1 }
0x1163   :  { %4961 = vtanh.f32 %v2614_v50  ;;  %v4057_v22 = vmul.f32 -1.442695, %v2614_v50 }
0x1164   :  { %v4610_v61 = vpop.f32.mrf.mxu0  ;;  %v4618_v63 = vpop.f32.mrf.mxu1 }
0x1166   :  { %v2720_v2 = vpop.f32.mrf.mxu0 }
0x1167   :  { %v2721_v30 = vadd.f32 %v2720_v2, %v2674_v26 }
0x1168   :  { %v4960_v10 = vpop.eup %4959  ;;  %v4625_v3 = vpop.f32.mrf.mxu0 }
0x1169   :  { %v2726_v49 = vadd.f32 %v2721_v30, %v5561_v5  ;;  %2512 = vrot.lane.b32.xlu1 %v4960_v10, %s5148_s14 }
0x116a   :  { %v2723_v53 = vpop.f32.mrf.mxu0 }
0x116b   :  { %4963 = vtanh.f32 %v2726_v49  ;;  %v4060_v9 = vmul.f32 -1.442695, %v2726_v49 }
0x116c   :  { %v4626_v34 = vpop.f32.mrf.mxu0  ;;  %4965 = vpow2.f32 %v4051_v18 }
0x1170   :  { %v4962_v6 = vpop.eup %4961 }
0x1171   :  { %2624 = vrot.lane.b32.xlu0 %v4962_v6, %s5148_s14 }
0x1178   :  { %v4964_v17 = vpop.eup %4963 }
0x1179   :  { %2736 = vrot.lane.b32.xlu1 %v4964_v17, %s5148_s14  ;;  %v4966_v59 = vpop.eup %4965 }
0x117a   :  { %v2394_v19 = vadd.f32 1.0, %v4966_v59 }
0x117c   :  { %4967 = vrcp.f32 %v2394_v19 }
0x117d   :  { %4969 = vpow2.f32 %v4054_v60 }
0x117e   :  { %4971 = vpow2.f32 %v4057_v22 }
0x117f   :  { %4973 = vpow2.f32 %v4060_v9 }
0x1189   :  { %v4968_v8 = vpop.eup %4967 }
0x118a   :  { %v4970_v35 = vpop.eup %4969  ;;  %v2398_v48 = vmul.f32 %v4968_v8, %v5775_v39 }
0x118b   :  { %v2506_v31 = vadd.f32 1.0, %v4970_v35  ;;  %v4972_v13 = vpop.eup %4971 }
0x118c   :  { %v2618_v37 = vadd.f32 1.0, %v4972_v13  ;;  %v4974_v32 = vpop.eup %4973 }
0x118d   :  { %4975 = vrcp.f32 %v2506_v31  ;;  %v2730_v0 = vadd.f32 1.0, %v4974_v32 }
0x118e   :  { %4977 = vrcp.f32 %v2618_v37 }
0x118f   :  { %4979 = vrcp.f32 %v2730_v0 }
0x119a   :  { %v4976_v43 = vpop.eup %4975 }
0x119b   :  { %v4978_v27 = vpop.eup %4977  ;;  %v2510_v20 = vmul.f32 %v4976_v43, %v5780_v33 }
0x119c   :  { %v4980_v58 = vpop.eup %4979  ;;  %v2622_v63 = vmul.f32 %v4978_v27, %v5784_v54 }
0x119d   :  { %v2734_v39 = vmul.f32 %v4980_v58, %v5788_v57 }
0x11c7   :  { %v2401_v7 = vpop.permute.xlu0 %2400 }
0x11c8   :  { %v2403_v24 = vmul.f32 %v4968_v8, %v2401_v7 }
0x11ca   :  { %2405 = vrot.lane.b32.xlu0 %v2403_v24, %s5155_s10 }
0x11db   :  { %v2513_v45 = vpop.permute.xlu1 %2512 }
0x11dc   :  { %v2515_v44 = vmul.f32 %v4976_v43, %v2513_v45 }
0x11de   :  { %2517 = vrot.lane.b32.xlu1 %v2515_v44, %s5155_s10 }
0x11e3   :  { %v2625_v51 = vpop.permute.xlu0 %2624 }
0x11e4   :  { %v2627_v25 = vmul.f32 %v4978_v27, %v2625_v51 }
0x11e6   :  { %2629 = vrot.lane.b32.xlu0 %v2627_v25, %s5155_s10 }
0x11eb   :  { %v2737_v23 = vpop.permute.xlu1 %2736 }
0x11ec   :  { %v2739_v26 = vmul.f32 %v4980_v58, %v2737_v23 }
0x11ee   :  { %2741 = vrot.lane.b32.xlu1 %v2739_v26, %s5155_s10 }
0x123c   :  { %v2406_v47 = vpop.permute.xlu0 %2405 }
0x123d   :  { %v5893_v38 = vadd.f32 %v2406_v47, %v2398_v48 }
0x123f   :  { %4981 = vtanh.f32 %v5893_v38 }
0x124c   :  { %v4982_v50 = vpop.eup %4981 }
0x124d   :  { %2411 = vrot.lane.b32.xlu0 %v4982_v50, %s5148_s14 }
0x1250   :  { %v2518_v42 = vpop.permute.xlu1 %2517 }
0x1251   :  { %v5898_v61 = vadd.f32 %v2518_v42, %v2510_v20 }
0x1253   :  { %4983 = vtanh.f32 %v5898_v61 }
0x1258   :  { %v2630_v2 = vpop.permute.xlu0 %2629 }
0x1259   :  { %v5902_v30 = vadd.f32 %v2630_v2, %v2622_v63 }
0x125b   :  { %4985 = vtanh.f32 %v5902_v30 }
0x1260   :  { %v4984_v10 = vpop.eup %4983  ;;  %v2742_v3 = vpop.permute.xlu1 %2741 }
0x1261   :  { %v5906_v49 = vadd.f32 %v2742_v3, %v2734_v39  ;;  %2523 = vrot.lane.b32.xlu1 %v4984_v10, %s5148_s14 }
0x1263   :  { %4987 = vtanh.f32 %v5906_v49 }
0x1268   :  { %v4986_v33 = vpop.eup %4985 }
0x1269   :  { %2635 = vrot.lane.b32.xlu0 %v4986_v33, %s5148_s14 }
0x1270   :  { %v4988_v53 = vpop.eup %4987 }
0x1271   :  { %2747 = vrot.lane.b32.xlu1 %v4988_v53, %s5148_s14 }
0x12bf   :  { %v2412_v54 = vpop.permute.xlu0 %2411 }
0x12c0   :  { %v2414_v34 = vmul.f32 %v4968_v8, %v2412_v54 }
0x12c2   :  { %v2752_v6 = vpack.c.bf16 %v2414_v34, %v2414_v34 }
0x12c4   :  { %2754 = vrot.lane.b32.xlu0 %v2752_v6, %s5155_s10 }
0x12d3   :  { %v2524_v57 = vpop.permute.xlu1 %2523 }
0x12d4   :  { %v2526_v17 = vmul.f32 %v4976_v43, %v2524_v57 }
0x12d6   :  { %v2823_v18 = vpack.c.bf16 %v2526_v17, %v2526_v17 }
0x12d8   :  { %2865 = vrot.lane.b32.xlu1 %v2823_v18, %s5155_s10 }
0x12db   :  { %v2636_v59 = vpop.permute.xlu0 %2635 }
0x12dc   :  { %v2638_v19 = vmul.f32 %v4978_v27, %v2636_v59 }
0x12de   :  { %v2935_v60 = vpack.c.bf16 %v2638_v19, %v2638_v19 }
0x12e0   :  { %2977 = vrot.lane.b32.xlu0 %v2935_v60, %s5155_s10 }
0x12e3   :  { %v2748_v22 = vpop.permute.xlu1 %2747 }
0x12e4   :  { %v2750_v9 = vmul.f32 %v4980_v58, %v2748_v22 }
0x12e6   :  { %v5916_v7 = vadd.f32 %v2750_v9, %v5799_v52  ;;  %v3047_v35 = vpack.c.bf16 %v2750_v9, %v2750_v9 }
0x12e8   :  { %3089 = vrot.lane.b32.xlu1 %v3047_v35, %s5155_s10 }
0x1336   :  { %v2755_v8 = vpop.permute.xlu0 %2754 }
0x1337   :  { %4632 = vmatmul.mubr.msk.bf16.vlgmr.msra.gmra.mxu1 %vm523_vm4, %v2755_v8  ;;  %4640 = vmatmul.mubr.msk.bf16.vlgmr.msra.gmra.mxu0 %vm523_vm4, %v2755_v8 }
0x1338   :  { %4644 = vmatpush3.bf16.msra.mxu1 %v5703_v12  ;;  %4652 = vmatpush3.bf16.msra.mxu0 %v5805_v36 }
0x1339   :  { %4645 = vmatprep.subr.bf16.mxu1 %v5152_v1  ;;  %4653 = vmatprep.subr.bf16.mxu0 %v5152_v1 }
0x133a   :  { %4647 = vmatprep.mubr.msk.bf16.mxu1 %vm5153_vm0, %v5152_v1  ;;  %4655 = vmatprep.mubr.msk.bf16.mxu0 %vm5153_vm0, %v5152_v1 }
0x133c   :  { %4646 = vmatpush3.bf16.msra.mxu1 %v5716_v14  ;;  %4654 = vmatpush3.bf16.msra.mxu0 %v5815_v56 }
0x133d   :  { %4659 = vmatprep.subr.bf16.mxu1 %v5152_v1  ;;  %4667 = vmatprep.subr.bf16.mxu0 %v5152_v1 }
0x134a   :  { %v2866_v52 = vpop.permute.xlu1 %2865 }
0x134b   :  { %4648 = vmatmul.mubr.msk.bf16.vlgmr.msra.gmra.mxu1 %vm523_vm4, %v2866_v52  ;;  %4656 = vmatmul.mubr.msk.bf16.vlgmr.msra.gmra.mxu0 %vm523_vm4, %v2866_v52 }
0x134c   :  { %4660 = vmatpush3.bf16.msra.mxu1 %v5825_v40  ;;  %4668 = vmatpush3.bf16.msra.mxu0 %v5828_v16 }
0x134d   :  { %4661 = vmatprep.subr.bf16.mxu1 %v5152_v1  ;;  %4669 = vmatprep.subr.bf16.mxu0 %v5152_v1 }
0x134e   :  { %4663 = vmatprep.mubr.msk.bf16.mxu1 %vm5153_vm0, %v5152_v1  ;;  %4671 = vmatprep.mubr.msk.bf16.mxu0 %vm5153_vm0, %v5152_v1 }
0x1350   :  { %4662 = vmatpush3.bf16.msra.mxu1 %v5840_v4  ;;  %4670 = vmatpush3.bf16.msra.mxu0 %v5843_v28 }
0x1351   :  { %4675 = vmatprep.subr.bf16.mxu1 %v5152_v1  ;;  %4683 = vmatprep.subr.bf16.mxu0 %v5152_v1 }
0x1352   :  { %v2978_v24 = vpop.permute.xlu0 %2977 }
0x1353   :  { %4664 = vmatmul.mubr.msk.bf16.vlgmr.msra.gmra.mxu1 %vm523_vm4, %v2978_v24  ;;  %4672 = vmatmul.mubr.msk.bf16.vlgmr.msra.gmra.mxu0 %vm523_vm4, %v2978_v24 }
0x1354   :  { %4676 = vmatpush3.bf16.msra.mxu1 %v5853_v15  ;;  %4679 = vmatprep.mubr.msk.bf16.mxu1 %vm5153_vm0, %v5152_v1 }
0x1355   :  { %4677 = vmatprep.subr.bf16.mxu1 %v5152_v1  ;;  %4684 = vmatpush3.bf16.msra.mxu0 %v5751_v55  ;;  %v506_v55 = vadd.f32 %v5357_v41, %v5301_v46 }
0x1356   :  { %4685 = vmatprep.subr.bf16.mxu0 %v5152_v1  ;;  %4687 = vmatprep.mubr.msk.bf16.mxu0 %vm5153_vm0, %v5152_v1 }
0x1358   :  { %4678 = vmatpush3.bf16.msra.mxu1 %v5866_v11 }
0x1359   :  { %4686 = vmatpush3.bf16.msra.mxu0 %v5757_v29  ;;  %4691 = vmatprep.subr.bf16.mxu1 %v5152_v1 }
0x135a   :  { %v3090_v31 = vpop.permute.xlu1 %3089  ;;  %4699 = vmatprep.subr.bf16.mxu0 %v5152_v1 }
0x135b   :  { %4680 = vmatmul.mubr.msk.bf16.vlgmr.msra.gmra.mxu1 %vm523_vm4, %v3090_v31 }
0x135c   :  { %4692 = vmatpush3.bf16.msra.mxu1 %v5703_v12  ;;  %4695 = vmatprep.mubr.msk.bf16.mxu1 %vm5153_vm0, %v5152_v1 }
0x135d   :  { %4693 = vmatprep.subr.bf16.mxu1 %v5152_v1 }
0x1360   :  { %4694 = vmatpush3.bf16.msra.mxu1 %v5716_v14 }
0x1361   :  { %4707 = vmatprep.subr.bf16.mxu1 %v5152_v1 }
0x13f7   :  { %v2793_v29 = vpop.f32.mrf.mxu1  ;;  %v2858_v13 = vpop.f32.mrf.mxu0 }
0x13f8   :  { %v2794_v37 = vadd.f32 %v2793_v29, %v506_v55 }
0x13f9   :  { %v4633_v32 = vpop.f32.mrf.mxu1  ;;  %v4641_v0 = vpop.f32.mrf.mxu0 }
0x13fa   :  { %4989 = vtanh.f32 %v2794_v37  ;;  %v4062_v22 = vmul.f32 -1.442695, %v2794_v37 }
0x13fb   :  { %v2796_v43 = vpop.f32.mrf.mxu1  ;;  %v2861_v12 = vpop.f32.mrf.mxu0 }
0x13fd   :  { %v4634_v45 = vpop.f32.mrf.mxu1  ;;  %v4642_v44 = vpop.f32.mrf.mxu0 }
0x1407   :  { %v4990_v27 = vpop.eup %4989 }
0x1408   :  { %2808 = vrot.lane.b32.xlu0 %v4990_v27, %s5148_s14 }
0x140b   :  { %v2904_v51 = vpop.f32.mrf.mxu1  ;;  %v2970_v14 = vpop.f32.mrf.mxu0 }
0x140c   :  { %v2905_v25 = vadd.f32 %v2904_v51, %v2858_v13 }
0x140d   :  { %v4649_v58 = vpop.f32.mrf.mxu1  ;;  %v4657_v23 = vpop.f32.mrf.mxu0 }
0x140e   :  { %v2910_v46 = vadd.f32 %v2905_v25, %v5393_v62 }
0x140f   :  { %v2907_v41 = vpop.f32.mrf.mxu1  ;;  %v2973_v26 = vpop.f32.mrf.mxu0 }
0x1410   :  { %4991 = vtanh.f32 %v2910_v46  ;;  %v4065_v8 = vmul.f32 -1.442695, %v2910_v46 }
0x1411   :  { %v4650_v48 = vpop.f32.mrf.mxu1  ;;  %v4658_v47 = vpop.f32.mrf.mxu0 }
0x1413   :  { %v3016_v50 = vpop.f32.mrf.mxu1  ;;  %v3082_v20 = vpop.f32.mrf.mxu0 }
0x1414   :  { %v3017_v42 = vadd.f32 %v3016_v50, %v2970_v14 }
0x1415   :  { %v4665_v63 = vpop.f32.mrf.mxu1  ;;  %v4673_v2 = vpop.f32.mrf.mxu0 }
0x1416   :  { %v3022_v39 = vadd.f32 %v3017_v42, %v5466_v21 }
0x1417   :  { %v3019_v10 = vpop.f32.mrf.mxu1  ;;  %v3085_v3 = vpop.f32.mrf.mxu0 }
0x1418   :  { %4993 = vtanh.f32 %v3022_v39  ;;  %v4068_v52 = vmul.f32 -1.442695, %v3022_v39 }
0x1419   :  { %v4666_v33 = vpop.f32.mrf.mxu1  ;;  %v4674_v53 = vpop.f32.mrf.mxu0 }
0x141b   :  { %v3128_v54 = vpop.f32.mrf.mxu1 }
0x141c   :  { %v3129_v34 = vadd.f32 %v3128_v54, %v3082_v20 }
0x141d   :  { %v4992_v6 = vpop.eup %4991  ;;  %v4681_v57 = vpop.f32.mrf.mxu1 }
0x141e   :  { %v3134_v17 = vadd.f32 %v3129_v34, %v5561_v5  ;;  %2920 = vrot.lane.b32.xlu1 %v4992_v6, %s5148_s14 }
0x141f   :  { %v3131_v18 = vpop.f32.mrf.mxu1 }
0x1420   :  { %4995 = vtanh.f32 %v3134_v17  ;;  %v4071_v29 = vmul.f32 -1.442695, %v3134_v17 }
0x1421   :  { %v4682_v59 = vpop.f32.mrf.mxu1  ;;  %4997 = vpow2.f32 %v4062_v22 }
0x1425   :  { %v4994_v19 = vpop.eup %4993 }
0x1426   :  { %3032 = vrot.lane.b32.xlu0 %v4994_v19, %s5148_s14 }
0x142d   :  { %v4996_v60 = vpop.eup %4995 }
0x142e   :  { %3144 = vrot.lane.b32.xlu1 %v4996_v60, %s5148_s14  ;;  %v4998_v9 = vpop.eup %4997 }
0x142f   :  { %v2802_v35 = vadd.f32 1.0, %v4998_v9 }
0x1431   :  { %4999 = vrcp.f32 %v2802_v35 }
0x1432   :  { %5001 = vpow2.f32 %v4065_v8 }
0x1433   :  { %5003 = vpow2.f32 %v4068_v52 }
0x1434   :  { %5005 = vpow2.f32 %v4071_v29 }
0x143e   :  { %v5000_v24 = vpop.eup %4999 }
0x143f   :  { %v5002_v13 = vpop.eup %5001  ;;  %v2806_v41 = vmul.f32 %v5000_v24, %v5893_v38 }
0x1440   :  { %v2914_v32 = vadd.f32 1.0, %v5002_v13  ;;  %v5004_v0 = vpop.eup %5003 }
0x1441   :  { %v3026_v37 = vadd.f32 1.0, %v5004_v0  ;;  %v5006_v43 = vpop.eup %5005 }
0x1442   :  { %5007 = vrcp.f32 %v2914_v32  ;;  %v3138_v12 = vadd.f32 1.0, %v5006_v43 }
0x1443   :  { %5009 = vrcp.f32 %v3026_v37 }
0x1444   :  { %5011 = vrcp.f32 %v3138_v12 }
0x144f   :  { %v5008_v45 = vpop.eup %5007 }
0x1450   :  { %v5010_v51 = vpop.eup %5009  ;;  %v2918_v50 = vmul.f32 %v5008_v45, %v5898_v61 }
0x1451   :  { %v5012_v58 = vpop.eup %5011  ;;  %v3030_v63 = vmul.f32 %v5010_v51, %v5902_v30 }
0x1452   :  { %v3142_v38 = vmul.f32 %v5012_v58, %v5906_v49 }
0x147a   :  { %v2809_v31 = vpop.permute.xlu0 %2808 }
0x147b   :  { %v2811_v55 = vmul.f32 %v5000_v24, %v2809_v31 }
0x147d   :  { %2813 = vrot.lane.b32.xlu0 %v2811_v55, %s5155_s10 }
0x1490   :  { %v2921_v44 = vpop.permute.xlu1 %2920 }
0x1491   :  { %v2923_v27 = vmul.f32 %v5008_v45, %v2921_v44 }
0x1493   :  { %2925 = vrot.lane.b32.xlu1 %v2923_v27, %s5155_s10 }
0x1498   :  { %v3033_v14 = vpop.permute.xlu0 %3032 }
0x1499   :  { %v3035_v25 = vmul.f32 %v5010_v51, %v3033_v14 }
0x149b   :  { %3037 = vrot.lane.b32.xlu0 %v3035_v25, %s5155_s10 }
0x14a0   :  { %v3145_v23 = vpop.permute.xlu1 %3144 }
0x14a1   :  { %v3147_v46 = vmul.f32 %v5012_v58, %v3145_v23 }
0x14a3   :  { %3149 = vrot.lane.b32.xlu1 %v3147_v46, %s5155_s10 }
0x14ef   :  { %v2814_v26 = vpop.permute.xlu0 %2813 }
0x14f0   :  { %v2816_v48 = vadd.f32 %v2814_v26, %v2806_v41 }
0x14f2   :  { %5013 = vtanh.f32 %v2816_v48 }
0x14ff   :  { %v5014_v47 = vpop.eup %5013 }
0x1500   :  { %2819 = vrot.lane.b32.xlu0 %v5014_v47, %s5148_s14 }
0x1505   :  { %v2926_v20 = vpop.permute.xlu1 %2925 }
0x1506   :  { %v5984_v42 = vadd.f32 %v2926_v20, %v2918_v50 }
0x1508   :  { %5015 = vtanh.f32 %v5984_v42 }
0x150d   :  { %v3038_v2 = vpop.permute.xlu0 %3037 }
0x150e   :  { %v5988_v39 = vadd.f32 %v3038_v2, %v3030_v63 }
0x1510   :  { %5017 = vtanh.f32 %v5988_v39 }
0x1515   :  { %v5016_v10 = vpop.eup %5015  ;;  %v3150_v3 = vpop.permute.xlu1 %3149 }
0x1516   :  { %v5992_v33 = vadd.f32 %v3150_v3, %v3142_v38  ;;  %2931 = vrot.lane.b32.xlu1 %v5016_v10, %s5148_s14 }
0x1518   :  { %5019 = vtanh.f32 %v5992_v33 }
0x151d   :  { %v5018_v61 = vpop.eup %5017 }
0x151e   :  { %3043 = vrot.lane.b32.xlu0 %v5018_v61, %s5148_s14 }
0x1525   :  { %v5020_v53 = vpop.eup %5019 }
0x1526   :  { %3155 = vrot.lane.b32.xlu1 %v5020_v53, %s5148_s14 }
0x1572   :  { %v2820_v30 = vpop.permute.xlu0 %2819 }
0x1573   :  { %v2822_v54 = vmul.f32 %v5000_v24, %v2820_v30 }
0x1575   :  { %v3161_v34 = vpack.c.bf16 %v2822_v54, %v2822_v54 }
0x1577   :  { %3163 = vrot.lane.b32.xlu0 %v3161_v34, %s5155_s10 }
0x1588   :  { %v2932_v49 = vpop.permute.xlu1 %2931 }
0x1589   :  { %v2934_v6 = vmul.f32 %v5008_v45, %v2932_v49 }
0x158b   :  { %v3160_v57 = vpack.c.bf16 %v2934_v6, %v2934_v6 }
0x158d   :  { %3209 = vrot.lane.b32.xlu1 %v3160_v57, %s5155_s10 }
0x1590   :  { %v3044_v17 = vpop.permute.xlu0 %3043 }
0x1591   :  { %v3046_v18 = vmul.f32 %v5010_v51, %v3044_v17 }
0x1593   :  { %v3279_v59 = vpack.c.bf16 %v3046_v18, %v3046_v18 }
0x1595   :  { %3321 = vrot.lane.b32.xlu0 %v3279_v59, %s5155_s10 }
0x1598   :  { %v3156_v19 = vpop.permute.xlu1 %3155 }
0x1599   :  { %v3158_v60 = vmul.f32 %v5012_v58, %v3156_v19 }
0x159b   :  { %v6002_v22 = vadd.f32 %v3158_v60, %v5916_v7  ;;  %v3391_v9 = vpack.c.bf16 %v3158_v60, %v3158_v60 }
0x159d   :  { %3433 = vrot.lane.b32.xlu1 %v3391_v9, %s5155_s10 }
0x15e9   :  { %v3164_v35 = vpop.permute.xlu0 %3163 }
0x15ea   :  { %4688 = vmatmul.mubr.msk.bf16.vlgmr.msra.gmra.mxu0 %vm523_vm4, %v3164_v35 }
0x15eb   :  { %4700 = vmatpush3.bf16.msra.mxu0 %v5805_v36  ;;  %4703 = vmatprep.mubr.msk.bf16.mxu0 %vm5153_vm0, %v5152_v1 }
0x15ec   :  { %4701 = vmatprep.subr.bf16.mxu0 %v5152_v1 }
0x15ef   :  { %4702 = vmatpush3.bf16.msra.mxu0 %v5815_v56 }
0x15f0   :  { %4715 = vmatprep.subr.bf16.mxu0 %v5152_v1 }
0x15ff   :  { %v3210_v8 = vpop.permute.xlu1 %3209 }
0x1600   :  { %4696 = vmatmul.mubr.msk.bf16.vlgmr.msra.gmra.mxu1 %vm523_vm4, %v3210_v8  ;;  %4704 = vmatmul.mubr.msk.bf16.vlgmr.msra.gmra.mxu0 %vm523_vm4, %v3210_v8 }
0x1601   :  { %4708 = vmatpush3.bf16.msra.mxu1 %v5825_v40  ;;  %4716 = vmatpush3.bf16.msra.mxu0 %v5828_v16 }
0x1602   :  { %4709 = vmatprep.subr.bf16.mxu1 %v5152_v1  ;;  %4717 = vmatprep.subr.bf16.mxu0 %v5152_v1 }
0x1603   :  { %4711 = vmatprep.mubr.msk.bf16.mxu1 %vm5153_vm0, %v5152_v1  ;;  %4719 = vmatprep.mubr.msk.bf16.mxu0 %vm5153_vm0, %v5152_v1 }
0x1605   :  { %4710 = vmatpush3.bf16.msra.mxu1 %v5840_v4  ;;  %4718 = vmatpush3.bf16.msra.mxu0 %v5843_v28 }
0x1606   :  { %4723 = vmatprep.subr.bf16.mxu1 %v5152_v1  ;;  %4731 = vmatprep.subr.bf16.mxu0 %v5152_v1 }
0x1607   :  { %v3322_v7 = vpop.permute.xlu0 %3321 }
0x1608   :  { %4712 = vmatmul.mubr.msk.bf16.vlgmr.msra.gmra.mxu1 %vm523_vm4, %v3322_v7  ;;  %4720 = vmatmul.mubr.msk.bf16.vlgmr.msra.gmra.mxu0 %vm523_vm4, %v3322_v7 }
0x1609   :  { %4724 = vmatpush3.bf16.msra.mxu1 %v5853_v15  ;;  %4727 = vmatprep.mubr.msk.bf16.mxu1 %vm5153_vm0, %v5152_v1 }
0x160a   :  { %4725 = vmatprep.subr.bf16.mxu1 %v5152_v1  ;;  %4732 = vmatpush3.bf16.msra.mxu0 %v5805_v36 }
0x160b   :  { %4733 = vmatprep.subr.bf16.mxu0 %v5152_v1  ;;  %4735 = vmatprep.mubr.msk.bf16.mxu0 %vm5153_vm0, %v5152_v1 }
0x160d   :  { %4726 = vmatpush3.bf16.msra.mxu1 %v5866_v11 }
0x160e   :  { %4734 = vmatpush3.bf16.msra.mxu0 %v5815_v56  ;;  %4739 = vmatprep.subr.bf16.mxu1 %v5152_v1 }
0x160f   :  { %v3434_v52 = vpop.permute.xlu1 %3433  ;;  %4747 = vmatprep.subr.bf16.mxu0 %v5152_v1 }
0x1610   :  { %4728 = vmatmul.mubr.msk.bf16.vlgmr.msra.gmra.mxu1 %vm523_vm4, %v3434_v52 }
0x1611   :  { %4740 = vmatpush3.bf16.msra.mxu1 %v5825_v40  ;;  %4743 = vmatprep.mubr.msk.bf16.mxu1 %vm5153_vm0, %v5152_v1 }
0x1612   :  { %4741 = vmatprep.subr.bf16.mxu1 %v5152_v1 }
0x1615   :  { %4742 = vmatpush3.bf16.msra.mxu1 %v5840_v4 }
0x1616   :  { %4755 = vmatprep.subr.bf16.mxu1 %v5152_v1 }
0x16aa   :  { %v3202_v36 = vpop.f32.mrf.mxu0 }
0x16ac   :  { %v4689_v56 = vpop.f32.mrf.mxu0 }
0x16ae   :  { %v3205_v24 = vpop.f32.mrf.mxu0 }
0x16b0   :  { %v4690_v31 = vpop.f32.mrf.mxu0 }
0x16c0   :  { %v3248_v55 = vpop.f32.mrf.mxu1  ;;  %v3314_v29 = vpop.f32.mrf.mxu0 }
0x16c1   :  { %v3249_v13 = vadd.f32 %v3248_v55, %v3202_v36 }
0x16c2   :  { %v4697_v32 = vpop.f32.mrf.mxu1  ;;  %v4705_v0 = vpop.f32.mrf.mxu0 }
0x16c3   :  { %v3254_v40 = vadd.f32 %v3249_v13, %v5393_v62 }
0x16c4   :  { %v3251_v37 = vpop.f32.mrf.mxu1  ;;  %v3317_v43 = vpop.f32.mrf.mxu0 }
0x16c5   :  { %5021 = vtanh.f32 %v3254_v40  ;;  %v4074_v10 = vmul.f32 -1.442695, %v3254_v40 }
0x16c6   :  { %v4698_v12 = vpop.f32.mrf.mxu1  ;;  %v4706_v45 = vpop.f32.mrf.mxu0 }
0x16c8   :  { %v3360_v44 = vpop.f32.mrf.mxu1  ;;  %v3426_v4 = vpop.f32.mrf.mxu0 }
0x16c9   :  { %v3361_v27 = vadd.f32 %v3360_v44, %v3314_v29 }
0x16ca   :  { %v4713_v51 = vpop.f32.mrf.mxu1  ;;  %v4721_v14 = vpop.f32.mrf.mxu0 }
0x16cb   :  { %v3366_v25 = vadd.f32 %v3361_v27, %v5466_v21 }
0x16cc   :  { %v3363_v58 = vpop.f32.mrf.mxu1  ;;  %v3429_v23 = vpop.f32.mrf.mxu0 }
0x16cd   :  { %5023 = vtanh.f32 %v3366_v25  ;;  %v4077_v3 = vmul.f32 -1.442695, %v3366_v25 }
0x16ce   :  { %v4714_v46 = vpop.f32.mrf.mxu1  ;;  %v4722_v41 = vpop.f32.mrf.mxu0 }
0x16d0   :  { %v3472_v26 = vpop.f32.mrf.mxu1 }
0x16d1   :  { %v3473_v48 = vadd.f32 %v3472_v26, %v3426_v4 }
0x16d2   :  { %v5022_v62 = vpop.eup %5021  ;;  %v4729_v47 = vpop.f32.mrf.mxu1 }
0x16d3   :  { %v3478_v50 = vadd.f32 %v3473_v48, %v5561_v5  ;;  %3264 = vrot.lane.b32.xlu0 %v5022_v62, %s5148_s14 }
0x16d4   :  { %v3475_v20 = vpop.f32.mrf.mxu1 }
0x16d5   :  { %5025 = vtanh.f32 %v3478_v50  ;;  %v4080_v61 = vmul.f32 -1.442695, %v3478_v50 }
0x16d6   :  { %v4730_v63 = vpop.f32.mrf.mxu1  ;;  %5027 = vpow2.f32 %v4074_v10 }
0x16d7   :  { %5029 = vpow2.f32 %v4077_v3 }
0x16d8   :  { %5031 = vpow2.f32 %v4080_v61 }
0x16da   :  { %v5024_v2 = vpop.eup %5023 }
0x16db   :  { %3376 = vrot.lane.b32.xlu1 %v5024_v2, %s5148_s14 }
0x16e2   :  { %v5026_v38 = vpop.eup %5025 }
0x16e3   :  { %3488 = vrot.lane.b32.xlu0 %v5026_v38, %s5148_s14  ;;  %v5028_v53 = vpop.eup %5027 }
0x16e4   :  { %v3258_v30 = vadd.f32 1.0, %v5028_v53  ;;  %v5030_v54 = vpop.eup %5029 }
0x16e5   :  { %v3370_v34 = vadd.f32 1.0, %v5030_v54  ;;  %v5032_v49 = vpop.eup %5031 }
0x16e6   :  { %5033 = vrcp.f32 %v3258_v30  ;;  %v3482_v6 = vadd.f32 1.0, %v5032_v49 }
0x16e7   :  { %5035 = vrcp.f32 %v3370_v34 }
0x16e8   :  { %5037 = vrcp.f32 %v3482_v6 }
0x16f3   :  { %v5034_v57 = vpop.eup %5033 }
0x16f4   :  { %v5036_v59 = vpop.eup %5035  ;;  %v3262_v7 = vmul.f32 %v5034_v57, %v5984_v42 }
0x16f5   :  { %v5038_v9 = vpop.eup %5037  ;;  %v3374_v56 = vmul.f32 %v5036_v59, %v5988_v39 }
0x16f6   :  { %v3486_v55 = vmul.f32 %v5038_v9, %v5992_v33 }
0x1745   :  { %v3265_v17 = vpop.permute.xlu0 %3264 }
0x1746   :  { %v3267_v18 = vmul.f32 %v5034_v57, %v3265_v17 }
0x1748   :  { %3269 = vrot.lane.b32.xlu1 %v3267_v18, %s5155_s10 }
0x174d   :  { %v3377_v19 = vpop.permute.xlu1 %3376 }
0x174e   :  { %v3379_v60 = vmul.f32 %v5036_v59, %v3377_v19 }
0x1750   :  { %3381 = vrot.lane.b32.xlu0 %v3379_v60, %s5155_s10 }
0x1755   :  { %v3489_v35 = vpop.permute.xlu0 %3488 }
0x1756   :  { %v3491_v8 = vmul.f32 %v5038_v9, %v3489_v35 }
0x1758   :  { %3493 = vrot.lane.b32.xlu1 %v3491_v8, %s5155_s10 }
0x17ba   :  { %v3270_v52 = vpop.permute.xlu1 %3269 }
0x17bb   :  { %v3272_v36 = vadd.f32 %v3270_v52, %v3262_v7 }
0x17bd   :  { %5039 = vtanh.f32 %v3272_v36 }
0x17c2   :  { %v3382_v24 = vpop.permute.xlu0 %3381 }
0x17c3   :  { %v6058_v31 = vadd.f32 %v3382_v24, %v3374_v56 }
0x17c5   :  { %5041 = vtanh.f32 %v6058_v31 }
0x17ca   :  { %v5040_v29 = vpop.eup %5039  ;;  %v3494_v13 = vpop.permute.xlu1 %3493 }
0x17cb   :  { %v6062_v32 = vadd.f32 %v3494_v13, %v3486_v55  ;;  %3275 = vrot.lane.b32.xlu0 %v5040_v29, %s5148_s14 }
0x17cd   :  { %5043 = vtanh.f32 %v6062_v32 }
0x17d2   :  { %v5042_v42 = vpop.eup %5041 }
0x17d3   :  { %3387 = vrot.lane.b32.xlu1 %v5042_v42, %s5148_s14 }
0x17da   :  { %v5044_v0 = vpop.eup %5043 }
0x17db   :  { %3499 = vrot.lane.b32.xlu0 %v5044_v0, %s5148_s14 }
0x183d   :  { %v3276_v39 = vpop.permute.xlu0 %3275 }
0x183e   :  { %v3278_v40 = vmul.f32 %v5034_v57, %v3276_v39 }
0x1840   :  { %v3505_v37 = vpack.c.bf16 %v3278_v40, %v3278_v40 }
0x1842   :  { %3507 = vrot.lane.b32.xlu1 %v3505_v37, %s5155_s10 }
0x1845   :  { %v3388_v33 = vpop.permute.xlu1 %3387 }
0x1846   :  { %v3390_v43 = vmul.f32 %v5036_v59, %v3388_v33 }
0x1848   :  { %v3504_v12 = vpack.c.bf16 %v3390_v43, %v3390_v43 }
0x184a   :  { %3553 = vrot.lane.b32.xlu0 %v3504_v12, %s5155_s10 }
0x184d   :  { %v3500_v45 = vpop.permute.xlu0 %3499 }
0x184e   :  { %v3502_v44 = vmul.f32 %v5038_v9, %v3500_v45 }
0x1850   :  { %v6071_v4 = vadd.f32 %v3502_v44, %v6002_v22  ;;  %v3623_v27 = vpack.c.bf16 %v3502_v44, %v3502_v44 }
0x1852   :  { %3665 = vrot.lane.b32.xlu1 %v3623_v27, %s5155_s10 }
0x18b4   :  { %v3508_v51 = vpop.permute.xlu1 %3507 }
0x18b5   :  { %4736 = vmatmul.mubr.msk.bf16.vlgmr.msra.gmra.mxu0 %vm523_vm4, %v3508_v51 }
0x18b6   :  { %4748 = vmatpush3.bf16.msra.mxu0 %v5828_v16  ;;  %4751 = vmatprep.mubr.msk.bf16.mxu0 %vm5153_vm0, %v5152_v1 }
0x18b7   :  { %4749 = vmatprep.subr.bf16.mxu0 %v5152_v1 }
0x18ba   :  { %4750 = vmatpush3.bf16.msra.mxu0 %v5843_v28 }
0x18bb   :  { %4763 = vmatprep.subr.bf16.mxu0 %v5152_v1 }
0x18bc   :  { %v3554_v14 = vpop.permute.xlu0 %3553 }
0x18bd   :  { %4744 = vmatmul.mubr.msk.bf16.vlgmr.msra.gmra.mxu1 %vm523_vm4, %v3554_v14  ;;  %4752 = vmatmul.mubr.msk.bf16.vlgmr.msra.gmra.mxu0 %vm523_vm4, %v3554_v14 }
0x18be   :  { %4756 = vmatpush3.bf16.msra.mxu1 %v5853_v15  ;;  %4759 = vmatprep.mubr.msk.bf16.mxu1 %vm5153_vm0, %v5152_v1 }
0x18bf   :  { %4757 = vmatprep.subr.bf16.mxu1 %v5152_v1  ;;  %4764 = vmatpush3.bf16.msra.mxu0 %v5828_v16 }
0x18c0   :  { %4765 = vmatprep.subr.bf16.mxu0 %v5152_v1  ;;  %4767 = vmatprep.mubr.msk.bf16.mxu0 %vm5153_vm0, %v5152_v1 }
0x18c2   :  { %4758 = vmatpush3.bf16.msra.mxu1 %v5866_v11 }
0x18c3   :  { %4766 = vmatpush3.bf16.msra.mxu0 %v5843_v28  ;;  %4771 = vmatprep.subr.bf16.mxu1 %v5152_v1 }
0x18c4   :  { %v3666_v22 = vpop.permute.xlu1 %3665  ;;  %4779 = vmatprep.subr.mxu0 %v5152_v1 }
0x18c5   :  { %4760 = vmatmul.mubr.msk.bf16.vlgmr.msra.gmra.mxu1 %vm523_vm4, %v3666_v22 }
0x18c6   :  { %4772 = vmatpush3.bf16.msra.mxu1 %v5853_v15  ;;  %4775 = vmatprep.mubr.msk.bf16.mxu1 %vm5153_vm0, %v5152_v1 }
0x18c7   :  { %4773 = vmatprep.subr.bf16.mxu1 %v5152_v1 }
0x18ca   :  { %4774 = vmatpush3.bf16.msra.mxu1 %v5866_v11 }
0x1975   :  { %v3546_v16 = vpop.f32.mrf.mxu0 }
0x1977   :  { %v4737_v25 = vpop.f32.mrf.mxu0 }
0x1979   :  { %v3549_v58 = vpop.f32.mrf.mxu0 }
0x197b   :  { %v4738_v28 = vpop.f32.mrf.mxu0 }
0x197d   :  { %v3592_v23 = vpop.f32.mrf.mxu1  ;;  %v3658_v46 = vpop.f32.mrf.mxu0 }
0x197e   :  { %v3593_v41 = vadd.f32 %v3592_v23, %v3546_v16 }
0x197f   :  { %v4745_v26 = vpop.f32.mrf.mxu1  ;;  %v4753_v48 = vpop.f32.mrf.mxu0 }
0x1980   :  { %v3598_v62 = vadd.f32 %v3593_v41, %v5466_v21 }
0x1981   :  { %v3595_v47 = vpop.f32.mrf.mxu1  ;;  %v3661_v15 = vpop.f32.mrf.mxu0 }
0x1982   :  { %5045 = vtanh.f32 %v3598_v62  ;;  %v4083_v21 = vmul.f32 -1.442695, %v3598_v62  ;;  %v3859_v62 = vld [vmem:[%s6153_s5 + $0x10] sm:$0xff]  ;;  %v3858_v47 = vld [vmem:[%s6153_s5 + $0x8] sm:$0xff]  ;;  %v3857_v15 = vld [vmem:[%s6153_s5] sm:$0xff] }
0x1983   :  { %v4746_v50 = vpop.f32.mrf.mxu1  ;;  %v4754_v20 = vpop.f32.mrf.mxu0 }
0x1985   :  { %v3704_v63 = vpop.f32.mrf.mxu1 }
0x1986   :  { %v3705_v2 = vadd.f32 %v3704_v63, %v3658_v46 }
0x1987   :  { %v4761_v38 = vpop.f32.mrf.mxu1 }
0x1988   :  { %v3710_v11 = vadd.f32 %v3705_v2, %v5561_v5 }
0x1989   :  { %v3707_v10 = vpop.f32.mrf.mxu1 }
0x198a   :  { %5047 = vtanh.f32 %v3710_v11  ;;  %v4086_v30 = vmul.f32 -1.442695, %v3710_v11  ;;  %v4090_v10 = vld [vmem:[%s6154_s6] ss:$0 sm:$0xff] }
0x198b   :  { %v4762_v3 = vpop.f32.mrf.mxu1  ;;  %5049 = vpow2.f32 %v4083_v21 }
0x198c   :  { %5051 = vpow2.f32 %v4086_v30 }
0x198f   :  { %v5046_v61 = vpop.eup %5045 }
0x1990   :  { %3608 = vrot.lane.b32.xlu0 %v5046_v61, %s5148_s14 }
0x1997   :  { %v5048_v53 = vpop.eup %5047 }
0x1998   :  { %3720 = vrot.lane.b32.xlu1 %v5048_v53, %s5148_s14  ;;  %v5050_v54 = vpop.eup %5049 }
0x1999   :  { %v3602_v34 = vadd.f32 1.0, %v5050_v54  ;;  %v5052_v49 = vpop.eup %5051 }
0x199a   :  { %v3714_v6 = vadd.f32 1.0, %v5052_v49 }
0x199b   :  { %5053 = vrcp.f32 %v3602_v34  ;;  %v4093_v34 = vld [vmem:[#allocation2] ss:$0 sm:$0xff] }
0x199c   :  { %5055 = vrcp.f32 %v3714_v6 }
0x19a8   :  { %v5054_v57 = vpop.eup %5053 }
0x19a9   :  { %v5056_v59 = vpop.eup %5055  ;;  %v3606_v9 = vmul.f32 %v5054_v57, %v6058_v31 }
0x19aa   :  { %v3718_v7 = vmul.f32 %v5056_v59, %v6062_v32 }
0x1a02   :  { %v3609_v17 = vpop.permute.xlu0 %3608 }
0x1a03   :  { %v3611_v18 = vmul.f32 %v5054_v57, %v3609_v17 }
0x1a05   :  { %3613 = vrot.lane.b32.xlu0 %v3611_v18, %s5155_s10 }
0x1a0a   :  { %v3721_v19 = vpop.permute.xlu1 %3720 }
0x1a0b   :  { %v3723_v60 = vmul.f32 %v5056_v59, %v3721_v19 }
0x1a0d   :  { %3725 = vrot.lane.b32.xlu1 %v3723_v60, %s5155_s10 }
0x1a77   :  { %v3614_v35 = vpop.permute.xlu0 %3613 }
0x1a78   :  { %v3616_v8 = vadd.f32 %v3614_v35, %v3606_v9 }
0x1a7a   :  { %5057 = vtanh.f32 %v3616_v8 }
0x1a7f   :  { %v3726_v52 = vpop.permute.xlu1 %3725 }
0x1a80   :  { %v3728_v36 = vadd.f32 %v3726_v52, %v3718_v7 }
0x1a82   :  { %5059 = vtanh.f32 %v3728_v36 }
0x1a87   :  { %v5058_v56 = vpop.eup %5057 }
0x1a88   :  { %3619 = vrot.lane.b32.xlu0 %v5058_v56, %s5148_s14 }
0x1a8f   :  { %v5060_v24 = vpop.eup %5059 }
0x1a90   :  { %3731 = vrot.lane.b32.xlu1 %v5060_v24, %s5148_s14 }
0x1afa   :  { %v3620_v55 = vpop.permute.xlu0 %3619 }
0x1afb   :  { %v3622_v29 = vmul.f32 %v5054_v57, %v3620_v55 }
0x1afd   :  { %v3737_v13 = vpack.c.bf16 %v3622_v29, %v3622_v29 }
0x1aff   :  { %3739 = vrot.lane.b32.xlu0 %v3737_v13, %s5155_s10 }
0x1b02   :  { %v3732_v31 = vpop.permute.xlu1 %3731 }
0x1b03   :  { %v3734_v42 = vmul.f32 %v5056_v59, %v3732_v31 }
0x1b05   :  { %v3735_v0 = vadd.f32 %v3734_v42, %v6071_v4  ;;  %v3736_v39 = vpack.c.bf16 %v3734_v42, %v3734_v42 }
0x1b07   :  { %3785 = vrot.lane.b32.xlu1 %v3736_v39, %s5155_s10 }
0x1b71   :  { %v3740_v32 = vpop.permute.xlu0 %3739 }
0x1b72   :  { %4768 = vmatmul.mubr.msk.bf16.vlgmr.msra.gmra.mxu0 %vm523_vm4, %v3740_v32 }
0x1b73   :  { %4787 = vmatprep.mubr.msk.f32.mxu0 %vm5153_vm0, %v5152_v1 }
0x1b79   :  { %v3786_v40 = vpop.permute.xlu1 %3785 }
0x1b7a   :  { %4776 = vmatmul.mubr.msk.bf16.vlgmr.msra.gmra.mxu1 %vm523_vm4, %v3786_v40 }
0x1c32   :  { %v3778_v37 = vpop.f32.mrf.mxu0 }
0x1c34   :  { %v4769_v33 = vpop.f32.mrf.mxu0 }
0x1c36   :  { %v3781_v43 = vpop.f32.mrf.mxu0 }
0x1c38   :  { %v4770_v12 = vpop.f32.mrf.mxu0 }
0x1c3a   :  { %v3824_v45 = vpop.f32.mrf.mxu1 }
0x1c3b   :  { %v3825_v44 = vadd.f32 %v3824_v45, %v3778_v37 }
0x1c3c   :  { %v4777_v27 = vpop.f32.mrf.mxu1 }
0x1c3d   :  { %v3830_v4 = vadd.f32 %v3825_v44, %v5561_v5  ;;  %v3860_v5 = vld [vmem:[%s6153_s5 + $0x18] sm:$0xff] }
0x1c3e   :  { %v3827_v51 = vpop.f32.mrf.mxu1  ;;  %4780 = vmatpush3.msra.mxu0 %v3860_v5 }
0x1c3f   :  { %5061 = vtanh.f32 %v3830_v4  ;;  %v4089_v16 = vmul.f32 -1.442695, %v3830_v4  ;;  %4781 = vmatprep.subr.mxu0 %v5152_v1 }
0x1c40   :  { %v4778_v14 = vpop.f32.mrf.mxu1  ;;  %4782 = vmatpush3.msra.mxu0 %v3859_v62 }
0x1c41   :  { %5063 = vpow2.f32 %v4089_v16  ;;  %4783 = vmatprep.subr.mxu0 %v5152_v1 }
0x1c42   :  { %4784 = vmatpush3.msra.mxu0 %v3858_v47 }
0x1c43   :  { %4785 = vmatprep.subr.mxu0 %v5152_v1  ;;  %v4092_v1 = vld [vmem:[%s6155_s7] ss:$0 sm:$0xff] }
0x1c44   :  { %4786 = vmatpush3.msra.mxu0 %v3857_v15 }
0x1c4c   :  { %v5062_v22 = vpop.eup %5061 }
0x1c4d   :  { %3840 = vrot.lane.b32.xlu0 %v5062_v22, %s5148_s14 }
0x1c4e   :  { %v5064_v25 = vpop.eup %5063 }
0x1c4f   :  { %v3834_v58 = vadd.f32 1.0, %v5064_v25 }
0x1c51   :  { %5065 = vrcp.f32 %v3834_v58 }
0x1c5e   :  { %v5066_v28 = vpop.eup %5065 }
0x1c5f   :  { %v3838_v41 = vmul.f32 %v5066_v28, %v3728_v36 }
0x1cbf   :  { %v3841_v23 = vpop.permute.xlu0 %3840 }
0x1cc0   :  { %v3843_v46 = vmul.f32 %v5066_v28, %v3841_v23 }
0x1cc2   :  { %3845 = vrot.lane.b32.xlu1 %v3843_v46, %s5155_s10 }
0x1d34   :  { %v3846_v26 = vpop.permute.xlu1 %3845 }
0x1d35   :  { %v3848_v48 = vadd.f32 %v3846_v26, %v3838_v41 }
0x1d37   :  { %5067 = vtanh.f32 %v3848_v48 }
0x1d44   :  { %v5068_v50 = vpop.eup %5067 }
0x1d45   :  { %3851 = vrot.lane.b32.xlu0 %v5068_v50, %s5148_s14 }
0x1db7   :  { %v3852_v20 = vpop.permute.xlu0 %3851 }
0x1db8   :  { %v3854_v63 = vmul.f32 %v5066_v28, %v3852_v20 }
0x1dba   :  { %v3855_v2 = vadd.f32 %v3854_v63, %v3735_v0 }
0x1dbc   :  { %v3856_v38 = vmul.f32 0.125, %v3855_v2 }
0x1dbe   :  { %3869 = vrot.lane.b32.xlu1 %v3856_v38, %s5155_s10 }
0x1e30   :  { %v3870_v11 = vpop.permute.xlu1 %3869 }
0x1e31   :  { %4788 = vmatmul.mubr.msk.f32.vlgmr.msra.gmra.mxu0 %vm523_vm4, %v3870_v11 }
0x1ef1   :  { %v3939_v3 = vpop.f32.mrf.mxu0 }
0x1ef2   :  { %v3940_v61 = vadd.f32 %v4090_v10, %v3939_v3 }
0x1ef3   :  { %v4789_v53 = vpop.f32.mrf.mxu0 }
0x1ef4   :  { %v3943_v21 = vmax.f32 %v3940_v61, 0.0 }
0x1ef6   :  { %v3951_v30 = vmul.f32 %v4092_v1, %v3943_v21 }
0x1ef8   :  { %v3953_v54 = vsel %vm3952_vm5, %v3951_v30, 0.0 }
0x1ef9   :  { %3954 = vadd.xlane.f32.xlu0 %v3953_v54 }
0x1f82   :  { %v3955_v49 = vpop.xlane.xlu0 %3954 }
0x1f83   :  { %v3963_v6 = vadd.f32 %v4093_v34, %v3955_v49 }
0x1f85   :  { %3965 = vst.msk [vmem:[%s6157_s9] sm:$0x3] %vm3964_vm6, %v3963_v6 }
0x1f86   :  { %3970 = vsyncpa [#allocation4], 1 }
0x1f87   :  { %3971 = vsyncpa [#allocation6], 1 }

</bundles_post_ra>
